<compile_context>
chip_gen: v7x
topology: tpu7x:2x2x1
jax: 0.10.0
libtpu: 0.0.40
codegen_flags: <defaults>
</compile_context>

<pallas_src>
import jax
import jax.numpy as jnp
from jax.experimental import pallas as pl
from jax.experimental.pallas import tpu as pltpu

LANE = 128

_COMPILER_PARAMS = pltpu.CompilerParams(
    dimension_semantics=("parallel",),          # M-row axis: independent -> megacore on v7x
    vmem_limit_bytes=32 * 1024 * 1024,
)


def _round_up(x, m):
    return (x + m - 1) // m * m


def _pick_row_tile(m, cap=512):
    """Row-tile size: cap for large M (double-buffered pipelining), else full (8-aligned)."""
    if m >= cap:
        return cap
    return max(8, _round_up(m, 8))


# ----------------------------------------------------------------------------
# Fused conv(+bias)+ReLU+MaxPool(2,2) kernel.
# Inputs are the 4 im2col patch slabs (one per pool-window quadrant), so the
# pooled output is produced directly by an elementwise max in the epilogue.
# ----------------------------------------------------------------------------
def _conv_relu_pool_kernel(p00_ref, p01_ref, p10_ref, p11_ref, w_ref, b_ref, o_ref):
    w = w_ref[...]          # (K_pad, 128) bf16, resident in VMEM for all row tiles
    b = b_ref[...]          # (1, 128) f32

    def branch(p_ref):
        y = jnp.dot(p_ref[...], w, preferred_element_type=jnp.float32)
        return jnp.maximum(y + b, 0.0)          # bias + ReLU in f32

    m = jnp.maximum(jnp.maximum(branch(p00_ref), branch(p01_ref)),
                    jnp.maximum(branch(p10_ref), branch(p11_ref)))
    o_ref[...] = m.astype(o_ref.dtype)


def conv_relu_pool(x, w_pad, b_pad, kh, kw):
    """x: (N, H, W, Cin) bf16 channels-last.
    w_pad: (K_pad, 128) bf16 (rows = kh*kw*Cin patch features, zero-padded).
    b_pad: (1, 128) f32.  Returns pooled (N, OH//2, OW//2, 128) bf16."""
    n, h, w_dim, c = x.shape
    oh, ow = h - kh + 1, w_dim - kw + 1
    assert oh % 2 == 0 and ow % 2 == 0
    k = kh * kw * c
    k_pad, oc_pad = w_pad.shape
    assert k_pad >= k and k_pad % LANE == 0 and oc_pad % LANE == 0

    # im2col, channels-last feature order (kh, kw, c)  -- no transposes needed.
    cols = [x[:, i:i + oh, j:j + ow, :] for i in range(kh) for j in range(kw)]
    p = jnp.concatenate(cols, axis=-1)                            # (N, OH, OW, k)
    if k_pad > k:
        p = jnp.pad(p, ((0, 0), (0, 0), (0, 0), (0, k_pad - k)))

    ohp, owp = oh // 2, ow // 2
    m_rows = n * ohp * owp
    quads = [p[:, di::2, dj::2, :].reshape(m_rows, k_pad)
             for di in (0, 1) for dj in (0, 1)]

    tm = _pick_row_tile(m_rows)
    m_pad = _round_up(m_rows, tm)
    if m_pad > m_rows:
        quads = [jnp.pad(q, ((0, m_pad - m_rows), (0, 0))) for q in quads]

    row_spec = pl.BlockSpec((tm, k_pad), lambda i: (i, 0))
    out = pl.pallas_call(
        _conv_relu_pool_kernel,
        grid=(m_pad // tm,),
        out_shape=jax.ShapeDtypeStruct((m_pad, oc_pad), jnp.bfloat16),
        in_specs=[row_spec, row_spec, row_spec, row_spec,
                  pl.BlockSpec((k_pad, oc_pad), lambda i: (0, 0)),
                  pl.BlockSpec((1, oc_pad), lambda i: (0, 0))],
        out_specs=pl.BlockSpec((tm, oc_pad), lambda i: (i, 0)),
        compiler_params=_COMPILER_PARAMS,
    )(*quads, w_pad, b_pad)

    return out[:m_rows].reshape(n, ohp, owp, oc_pad)


# ----------------------------------------------------------------------------
# Fused fc1 -> ReLU -> fc2 -> ReLU -> fc3 kernel (all weights resident in VMEM).
# ----------------------------------------------------------------------------
def _fc_stack_kernel(x_ref, w1_ref, b1_ref, w2_ref, b2_ref, w3_ref, b3_ref, o_ref):
    h = jnp.dot(x_ref[...], w1_ref[...], preferred_element_type=jnp.float32)
    h = jnp.maximum(h + b1_ref[...], 0.0).astype(jnp.bfloat16)
    h = jnp.dot(h, w2_ref[...], preferred_element_type=jnp.float32)
    h = jnp.maximum(h + b2_ref[...], 0.0).astype(jnp.bfloat16)
    y = jnp.dot(h, w3_ref[...], preferred_element_type=jnp.float32)
    o_ref[...] = (y + b3_ref[...]).astype(o_ref.dtype)


def fc_stack(x, w1, b1, w2, b2, w3, b3):
    """x: (M, 3200) bf16. Weights bf16 (K_pad, 128); biases f32 (1, 128)."""
    m, k1 = x.shape
    tm = _pick_row_tile(m, cap=256)
    m_pad = _round_up(m, tm)
    if m_pad > m:
        x = jnp.pad(x, ((0, m_pad - m), (0, 0)))
    n_out = w3.shape[1]

    out = pl.pallas_call(
        _fc_stack_kernel,
        grid=(m_pad // tm,),
        out_shape=jax.ShapeDtypeStruct((m_pad, n_out), jnp.float32),
        in_specs=[
            pl.BlockSpec((tm, k1), lambda i: (i, 0)),
            pl.BlockSpec(w1.shape, lambda i: (0, 0)),
            pl.BlockSpec((1, w1.shape[1]), lambda i: (0, 0)),
            pl.BlockSpec(w2.shape, lambda i: (0, 0)),
            pl.BlockSpec((1, w2.shape[1]), lambda i: (0, 0)),
            pl.BlockSpec(w3.shape, lambda i: (0, 0)),
            pl.BlockSpec((1, w3.shape[1]), lambda i: (0, 0)),
        ],
        out_specs=pl.BlockSpec((tm, n_out), lambda i: (i, 0)),
        compiler_params=_COMPILER_PARAMS,
    )(x, w1, b1, w2, b2, w3, b3)
    return out[:m]


# ----------------------------------------------------------------------------
# Parameters: PyTorch-layout init, then one-time conversion to padded kernel layout.
# ----------------------------------------------------------------------------
def init_params(key):
    def uniform(k, shape, fan_in):
        bound = 1.0 / (fan_in ** 0.5)
        return jax.random.uniform(k, shape, jnp.float32, -bound, bound)

    ks = jax.random.split(key, 10)
    return {
        "conv1_w": uniform(ks[0], (6, 3, 5, 5), 3 * 5 * 5),
        "conv1_b": uniform(ks[1], (6,), 3 * 5 * 5),
        "conv2_w": uniform(ks[2], (16, 6, 5, 5), 6 * 5 * 5),
        "conv2_b": uniform(ks[3], (16,), 6 * 5 * 5),
        # fc weights stored (in_features, out_features); in-feature order matches
        # PyTorch's NCHW flatten (c, h, w) for fc1.
        "fc1_w": uniform(ks[4], (16 * 5 * 5, 120), 16 * 5 * 5),
        "fc1_b": uniform(ks[5], (120,), 16 * 5 * 5),
        "fc2_w": uniform(ks[6], (120, 84), 120),
        "fc2_b": uniform(ks[7], (84,), 120),
        "fc3_w": uniform(ks[8], (84, 10), 84),
        "fc3_b": uniform(ks[9], (10,), 84),
    }


def prepare_params(params):
    """Convert PyTorch-layout params to padded, lane-dense, bf16 kernel layouts."""
    def pad_to(a, shape):
        return jnp.pad(a, [(0, t - s) for s, t in zip(a.shape, shape)])

    p = {}
    # conv weights: (OC, C, KH, KW) -> (KH*KW*C, OC), pad to (K_pad, 128).
    w1 = params["conv1_w"].transpose(2, 3, 1, 0).reshape(75, 6)         # K=75
    p["conv1_w"] = pad_to(w1, (128, 128)).astype(jnp.bfloat16)
    p["conv1_b"] = pad_to(params["conv1_b"].reshape(1, 6), (1, 128)).astype(jnp.float32)

    w2 = params["conv2_w"].transpose(2, 3, 1, 0).reshape(150, 16)       # K=150
    p["conv2_w"] = pad_to(w2, (256, 128)).astype(jnp.bfloat16)
    p["conv2_b"] = pad_to(params["conv2_b"].reshape(1, 16), (1, 128)).astype(jnp.float32)

    # fc1: rows are in PyTorch (c, h, w) flatten order; activations here are flattened
    # channels-last with the channel axis zero-padded to 128 -> reorder to (h, w, c)
    # and pad c 16->128, giving a (3200, 128) weight whose extra rows/cols are zero.
    w = params["fc1_w"].reshape(16, 5, 5, 120).transpose(1, 2, 0, 3)    # (5,5,16,120)
    w = jnp.pad(w, ((0, 0), (0, 0), (0, 112), (0, 8)))                  # (5,5,128,128)
    p["fc1_w"] = w.reshape(3200, 128).astype(jnp.bfloat16)
    p["fc1_b"] = pad_to(params["fc1_b"].reshape(1, 120), (1, 128)).astype(jnp.float32)

    p["fc2_w"] = pad_to(params["fc2_w"], (128, 128)).astype(jnp.bfloat16)
    p["fc2_b"] = pad_to(params["fc2_b"].reshape(1, 84), (1, 128)).astype(jnp.float32)

    p["fc3_w"] = pad_to(params["fc3_w"], (128, 128)).astype(jnp.bfloat16)
    p["fc3_b"] = pad_to(params["fc3_b"].reshape(1, 10), (1, 128)).astype(jnp.float32)
    return p


# ----------------------------------------------------------------------------
# Full forward pass (matches PyTorch Net.forward semantics).
# ----------------------------------------------------------------------------
def net_forward(prepped, x):
    # x: (N, 3, 32, 32) NCHW f32 -> channels-last bf16 once, at the boundary.
    x = jnp.transpose(x, (0, 2, 3, 1)).astype(jnp.bfloat16)                # (N,32,32,3)
    x = conv_relu_pool(x, prepped["conv1_w"], prepped["conv1_b"], 5, 5)    # (N,14,14,128)
    x = x[..., :6]                                                         # drop zero-padded channels
    x = conv_relu_pool(x, prepped["conv2_w"], prepped["conv2_b"], 5, 5)    # (N,5,5,128)
    n = x.shape[0]
    x = x.reshape(n, 5 * 5 * 128)                                          # channels-last flatten
    logits = fc_stack(x, prepped["fc1_w"], prepped["fc1_b"],
                      prepped["fc2_w"], prepped["fc2_b"],
                      prepped["fc3_w"], prepped["fc3_b"])                  # (N,128) f32
    return logits[:, :10]                                                  # strip zero-padded classes


if __name__ == "__main__":
    key = jax.random.PRNGKey(0)
    pkey, xkey = jax.random.split(key)
    params = init_params(pkey)
    prepped = prepare_params(params)
    # Input must be 32x32 so the flattened feature size is 16*5*5 = 400.
    x = jax.random.normal(xkey, (2, 3, 32, 32), jnp.float32)

    out = jax.block_until_ready(jax.jit(net_forward)(prepped, x))
    assert out.shape == (2, 10) and out.dtype == jnp.float32
    print("KERNEL_OK")
</pallas_src>

<mosaic_0001>
module attributes {stable_mosaic.version = 11 : i64} {
  func.func @_conv_relu_pool_kernel(%arg0: i32, %arg1: memref<392x128xbf16, #tpu.memory_space<vmem>>, %arg2: memref<392x128xbf16, #tpu.memory_space<vmem>>, %arg3: memref<392x128xbf16, #tpu.memory_space<vmem>>, %arg4: memref<392x128xbf16, #tpu.memory_space<vmem>>, %arg5: memref<128x128xbf16, #tpu.memory_space<vmem>>, %arg6: memref<1x128xf32, #tpu.memory_space<vmem>>, %arg7: memref<392x128xbf16, #tpu.memory_space<vmem>>) attributes {dimension_semantics = [#tpu.dimension_semantics<parallel>], iteration_bounds = array<i64: 1>, scalar_prefetch = 0 : i64, scratch_operands = 0 : i64, tpu.core_type = #tpu.core_type<tc>, window_params = [{transform_indices = @transform_0, window_bounds = array<i64: 392, 128>}, {transform_indices = @transform_1, window_bounds = array<i64: 392, 128>}, {transform_indices = @transform_2, window_bounds = array<i64: 392, 128>}, {transform_indices = @transform_3, window_bounds = array<i64: 392, 128>}, {pipeline_mode = #tpu.pipeline_mode<synchronous>, transform_indices = @transform_4, window_bounds = array<i64: 128, 128>}, {pipeline_mode = #tpu.pipeline_mode<synchronous>, transform_indices = @transform_5, window_bounds = array<i64: 1, 128>}, {transform_indices = @transform_6, window_bounds = array<i64: 392, 128>}]} {
    %c0 = arith.constant 0 : index
    %c0_0 = arith.constant 0 : index
    %0 = vector.load %arg5[%c0, %c0_0] : memref<128x128xbf16, #tpu.memory_space<vmem>>, vector<128x128xbf16>
    %c0_1 = arith.constant 0 : index
    %c0_2 = arith.constant 0 : index
    %1 = vector.load %arg6[%c0_1, %c0_2] : memref<1x128xf32, #tpu.memory_space<vmem>>, vector<1x128xf32>
    %c0_3 = arith.constant 0 : index
    %c0_4 = arith.constant 0 : index
    %2 = vector.load %arg1[%c0_3, %c0_4] : memref<392x128xbf16, #tpu.memory_space<vmem>>, vector<392x128xbf16>
    %cst = arith.constant dense<0.000000e+00> : vector<392x128xf32>
    %3 = tpu.matmul %2, %0, %cst {dimension_numbers = #tpu.dot_dimension_numbers<[1], [0], [0], [1], [0, 0, 1, 1], [], []>} : vector<392x128xbf16>, vector<128x128xbf16>, vector<392x128xf32> -> vector<392x128xf32>
    %4 = vector.broadcast %1 : vector<1x128xf32> to vector<392x128xf32>
    %5 = arith.addf %3, %4 : vector<392x128xf32>
    %cst_5 = arith.constant 0.000000e+00 : f32
    %6 = vector.broadcast %cst_5 : f32 to vector<392x128xf32>
    %7 = arith.maximumf %5, %6 : vector<392x128xf32>
    %c0_6 = arith.constant 0 : index
    %c0_7 = arith.constant 0 : index
    %8 = vector.load %arg2[%c0_6, %c0_7] : memref<392x128xbf16, #tpu.memory_space<vmem>>, vector<392x128xbf16>
    %cst_8 = arith.constant dense<0.000000e+00> : vector<392x128xf32>
    %9 = tpu.matmul %8, %0, %cst_8 {dimension_numbers = #tpu.dot_dimension_numbers<[1], [0], [0], [1], [0, 0, 1, 1], [], []>} : vector<392x128xbf16>, vector<128x128xbf16>, vector<392x128xf32> -> vector<392x128xf32>
    %10 = vector.broadcast %1 : vector<1x128xf32> to vector<392x128xf32>
    %11 = arith.addf %9, %10 : vector<392x128xf32>
    %cst_9 = arith.constant 0.000000e+00 : f32
    %12 = vector.broadcast %cst_9 : f32 to vector<392x128xf32>
    %13 = arith.maximumf %11, %12 : vector<392x128xf32>
    %14 = arith.maximumf %7, %13 : vector<392x128xf32>
    %c0_10 = arith.constant 0 : index
    %c0_11 = arith.constant 0 : index
    %15 = vector.load %arg3[%c0_10, %c0_11] : memref<392x128xbf16, #tpu.memory_space<vmem>>, vector<392x128xbf16>
    %cst_12 = arith.constant dense<0.000000e+00> : vector<392x128xf32>
    %16 = tpu.matmul %15, %0, %cst_12 {dimension_numbers = #tpu.dot_dimension_numbers<[1], [0], [0], [1], [0, 0, 1, 1], [], []>} : vector<392x128xbf16>, vector<128x128xbf16>, vector<392x128xf32> -> vector<392x128xf32>
    %17 = vector.broadcast %1 : vector<1x128xf32> to vector<392x128xf32>
    %18 = arith.addf %16, %17 : vector<392x128xf32>
    %cst_13 = arith.constant 0.000000e+00 : f32
    %19 = vector.broadcast %cst_13 : f32 to vector<392x128xf32>
    %20 = arith.maximumf %18, %19 : vector<392x128xf32>
    %c0_14 = arith.constant 0 : index
    %c0_15 = arith.constant 0 : index
    %21 = vector.load %arg4[%c0_14, %c0_15] : memref<392x128xbf16, #tpu.memory_space<vmem>>, vector<392x128xbf16>
    %cst_16 = arith.constant dense<0.000000e+00> : vector<392x128xf32>
    %22 = tpu.matmul %21, %0, %cst_16 {dimension_numbers = #tpu.dot_dimension_numbers<[1], [0], [0], [1], [0, 0, 1, 1], [], []>} : vector<392x128xbf16>, vector<128x128xbf16>, vector<392x128xf32> -> vector<392x128xf32>
    %23 = vector.broadcast %1 : vector<1x128xf32> to vector<392x128xf32>
    %24 = arith.addf %22, %23 : vector<392x128xf32>
    %cst_17 = arith.constant 0.000000e+00 : f32
    %25 = vector.broadcast %cst_17 : f32 to vector<392x128xf32>
    %26 = arith.maximumf %24, %25 : vector<392x128xf32>
    %27 = arith.maximumf %20, %26 : vector<392x128xf32>
    %28 = arith.maximumf %14, %27 : vector<392x128xf32>
    %29 = arith.truncf %28 : vector<392x128xf32> to vector<392x128xbf16>
    %c0_18 = arith.constant 0 : index
    %c0_19 = arith.constant 0 : index
    %30 = vector.load %arg7[%c0_18, %c0_19] : memref<392x128xbf16, #tpu.memory_space<vmem>>, vector<392x128xbf16>
    tpu.vector_store %arg7[%c0_18, %c0_19], %29 {strides = array<i32>} : memref<392x128xbf16, #tpu.memory_space<vmem>>, vector<392x128xbf16>,
    return
  }
  func.func @transform_0(%arg0: i32) -> (i32, i32) {
    %c0_i32 = arith.constant 0 : i32
    %c0_i32_0 = arith.constant 0 : i32
    return %arg0, %c0_i32 : i32, i32
  }
  func.func @transform_1(%arg0: i32) -> (i32, i32) {
    %c0_i32 = arith.constant 0 : i32
    %c0_i32_0 = arith.constant 0 : i32
    return %arg0, %c0_i32 : i32, i32
  }
  func.func @transform_2(%arg0: i32) -> (i32, i32) {
    %c0_i32 = arith.constant 0 : i32
    %c0_i32_0 = arith.constant 0 : i32
    return %arg0, %c0_i32 : i32, i32
  }
  func.func @transform_3(%arg0: i32) -> (i32, i32) {
    %c0_i32 = arith.constant 0 : i32
    %c0_i32_0 = arith.constant 0 : i32
    return %arg0, %c0_i32 : i32, i32
  }
  func.func @transform_4(%arg0: i32) -> (i32, i32) {
    %c0_i32 = arith.constant 0 : i32
    %c0_i32_0 = arith.constant 0 : i32
    %c0_i32_1 = arith.constant 0 : i32
    return %c0_i32, %c0_i32_0 : i32, i32
  }
  func.func @transform_5(%arg0: i32) -> (i32, i32) {
    %c0_i32 = arith.constant 0 : i32
    %c0_i32_0 = arith.constant 0 : i32
    %c0_i32_1 = arith.constant 0 : i32
    return %c0_i32, %c0_i32_0 : i32, i32
  }
  func.func @transform_6(%arg0: i32) -> (i32, i32) {
    %c0_i32 = arith.constant 0 : i32
    %c0_i32_0 = arith.constant 0 : i32
    return %arg0, %c0_i32 : i32, i32
  }
}

module attributes {stable_mosaic.version = 11 : i64} {
  func.func @_conv_relu_pool_kernel(%arg0: i32, %arg1: memref<56x256xbf16, #tpu.memory_space<vmem>>, %arg2: memref<56x256xbf16, #tpu.memory_space<vmem>>, %arg3: memref<56x256xbf16, #tpu.memory_space<vmem>>, %arg4: memref<56x256xbf16, #tpu.memory_space<vmem>>, %arg5: memref<256x128xbf16, #tpu.memory_space<vmem>>, %arg6: memref<1x128xf32, #tpu.memory_space<vmem>>, %arg7: memref<56x128xbf16, #tpu.memory_space<vmem>>) attributes {dimension_semantics = [#tpu.dimension_semantics<parallel>], iteration_bounds = array<i64: 1>, scalar_prefetch = 0 : i64, scratch_operands = 0 : i64, tpu.core_type = #tpu.core_type<tc>, window_params = [{transform_indices = @transform_0, window_bounds = array<i64: 56, 256>}, {transform_indices = @transform_1, window_bounds = array<i64: 56, 256>}, {transform_indices = @transform_2, window_bounds = array<i64: 56, 256>}, {transform_indices = @transform_3, window_bounds = array<i64: 56, 256>}, {pipeline_mode = #tpu.pipeline_mode<synchronous>, transform_indices = @transform_4, window_bounds = array<i64: 256, 128>}, {pipeline_mode = #tpu.pipeline_mode<synchronous>, transform_indices = @transform_5, window_bounds = array<i64: 1, 128>}, {transform_indices = @transform_6, window_bounds = array<i64: 56, 128>}]} {
    %c0 = arith.constant 0 : index
    %c0_0 = arith.constant 0 : index
    %0 = vector.load %arg5[%c0, %c0_0] : memref<256x128xbf16, #tpu.memory_space<vmem>>, vector<256x128xbf16>
    %c0_1 = arith.constant 0 : index
    %c0_2 = arith.constant 0 : index
    %1 = vector.load %arg6[%c0_1, %c0_2] : memref<1x128xf32, #tpu.memory_space<vmem>>, vector<1x128xf32>
    %c0_3 = arith.constant 0 : index
    %c0_4 = arith.constant 0 : index
    %2 = vector.load %arg1[%c0_3, %c0_4] : memref<56x256xbf16, #tpu.memory_space<vmem>>, vector<56x256xbf16>
    %cst = arith.constant dense<0.000000e+00> : vector<56x128xf32>
    %3 = tpu.matmul %2, %0, %cst {dimension_numbers = #tpu.dot_dimension_numbers<[1], [0], [0], [1], [0, 0, 1, 1], [], []>} : vector<56x256xbf16>, vector<256x128xbf16>, vector<56x128xf32> -> vector<56x128xf32>
    %4 = vector.broadcast %1 : vector<1x128xf32> to vector<56x128xf32>
    %5 = arith.addf %3, %4 : vector<56x128xf32>
    %cst_5 = arith.constant 0.000000e+00 : f32
    %6 = vector.broadcast %cst_5 : f32 to vector<56x128xf32>
    %7 = arith.maximumf %5, %6 : vector<56x128xf32>
    %c0_6 = arith.constant 0 : index
    %c0_7 = arith.constant 0 : index
    %8 = vector.load %arg2[%c0_6, %c0_7] : memref<56x256xbf16, #tpu.memory_space<vmem>>, vector<56x256xbf16>
    %cst_8 = arith.constant dense<0.000000e+00> : vector<56x128xf32>
    %9 = tpu.matmul %8, %0, %cst_8 {dimension_numbers = #tpu.dot_dimension_numbers<[1], [0], [0], [1], [0, 0, 1, 1], [], []>} : vector<56x256xbf16>, vector<256x128xbf16>, vector<56x128xf32> -> vector<56x128xf32>
    %10 = vector.broadcast %1 : vector<1x128xf32> to vector<56x128xf32>
    %11 = arith.addf %9, %10 : vector<56x128xf32>
    %cst_9 = arith.constant 0.000000e+00 : f32
    %12 = vector.broadcast %cst_9 : f32 to vector<56x128xf32>
    %13 = arith.maximumf %11, %12 : vector<56x128xf32>
    %14 = arith.maximumf %7, %13 : vector<56x128xf32>
    %c0_10 = arith.constant 0 : index
    %c0_11 = arith.constant 0 : index
    %15 = vector.load %arg3[%c0_10, %c0_11] : memref<56x256xbf16, #tpu.memory_space<vmem>>, vector<56x256xbf16>
    %cst_12 = arith.constant dense<0.000000e+00> : vector<56x128xf32>
    %16 = tpu.matmul %15, %0, %cst_12 {dimension_numbers = #tpu.dot_dimension_numbers<[1], [0], [0], [1], [0, 0, 1, 1], [], []>} : vector<56x256xbf16>, vector<256x128xbf16>, vector<56x128xf32> -> vector<56x128xf32>
    %17 = vector.broadcast %1 : vector<1x128xf32> to vector<56x128xf32>
    %18 = arith.addf %16, %17 : vector<56x128xf32>
    %cst_13 = arith.constant 0.000000e+00 : f32
    %19 = vector.broadcast %cst_13 : f32 to vector<56x128xf32>
    %20 = arith.maximumf %18, %19 : vector<56x128xf32>
    %c0_14 = arith.constant 0 : index
    %c0_15 = arith.constant 0 : index
    %21 = vector.load %arg4[%c0_14, %c0_15] : memref<56x256xbf16, #tpu.memory_space<vmem>>, vector<56x256xbf16>
    %cst_16 = arith.constant dense<0.000000e+00> : vector<56x128xf32>
    %22 = tpu.matmul %21, %0, %cst_16 {dimension_numbers = #tpu.dot_dimension_numbers<[1], [0], [0], [1], [0, 0, 1, 1], [], []>} : vector<56x256xbf16>, vector<256x128xbf16>, vector<56x128xf32> -> vector<56x128xf32>
    %23 = vector.broadcast %1 : vector<1x128xf32> to vector<56x128xf32>
    %24 = arith.addf %22, %23 : vector<56x128xf32>
    %cst_17 = arith.constant 0.000000e+00 : f32
    %25 = vector.broadcast %cst_17 : f32 to vector<56x128xf32>
    %26 = arith.maximumf %24, %25 : vector<56x128xf32>
    %27 = arith.maximumf %20, %26 : vector<56x128xf32>
    %28 = arith.maximumf %14, %27 : vector<56x128xf32>
    %29 = arith.truncf %28 : vector<56x128xf32> to vector<56x128xbf16>
    %c0_18 = arith.constant 0 : index
    %c0_19 = arith.constant 0 : index
    %30 = vector.load %arg7[%c0_18, %c0_19] : memref<56x128xbf16, #tpu.memory_space<vmem>>, vector<56x128xbf16>
    tpu.vector_store %arg7[%c0_18, %c0_19], %29 {strides = array<i32>} : memref<56x128xbf16, #tpu.memory_space<vmem>>, vector<56x128xbf16>,
    return
  }
  func.func @transform_0(%arg0: i32) -> (i32, i32) {
    %c0_i32 = arith.constant 0 : i32
    %c0_i32_0 = arith.constant 0 : i32
    return %arg0, %c0_i32 : i32, i32
  }
  func.func @transform_1(%arg0: i32) -> (i32, i32) {
    %c0_i32 = arith.constant 0 : i32
    %c0_i32_0 = arith.constant 0 : i32
    return %arg0, %c0_i32 : i32, i32
  }
  func.func @transform_2(%arg0: i32) -> (i32, i32) {
    %c0_i32 = arith.constant 0 : i32
    %c0_i32_0 = arith.constant 0 : i32
    return %arg0, %c0_i32 : i32, i32
  }
  func.func @transform_3(%arg0: i32) -> (i32, i32) {
    %c0_i32 = arith.constant 0 : i32
    %c0_i32_0 = arith.constant 0 : i32
    return %arg0, %c0_i32 : i32, i32
  }
  func.func @transform_4(%arg0: i32) -> (i32, i32) {
    %c0_i32 = arith.constant 0 : i32
    %c0_i32_0 = arith.constant 0 : i32
    %c0_i32_1 = arith.constant 0 : i32
    return %c0_i32, %c0_i32_0 : i32, i32
  }
  func.func @transform_5(%arg0: i32) -> (i32, i32) {
    %c0_i32 = arith.constant 0 : i32
    %c0_i32_0 = arith.constant 0 : i32
    %c0_i32_1 = arith.constant 0 : i32
    return %c0_i32, %c0_i32_0 : i32, i32
  }
  func.func @transform_6(%arg0: i32) -> (i32, i32) {
    %c0_i32 = arith.constant 0 : i32
    %c0_i32_0 = arith.constant 0 : i32
    return %arg0, %c0_i32 : i32, i32
  }
}

module attributes {stable_mosaic.version = 11 : i64} {
  func.func @_fc_stack_kernel(%arg0: i32, %arg1: memref<8x3200xbf16, #tpu.memory_space<vmem>>, %arg2: memref<3200x128xbf16, #tpu.memory_space<vmem>>, %arg3: memref<1x128xf32, #tpu.memory_space<vmem>>, %arg4: memref<128x128xbf16, #tpu.memory_space<vmem>>, %arg5: memref<1x128xf32, #tpu.memory_space<vmem>>, %arg6: memref<128x128xbf16, #tpu.memory_space<vmem>>, %arg7: memref<1x128xf32, #tpu.memory_space<vmem>>, %arg8: memref<8x128xf32, #tpu.memory_space<vmem>>) attributes {dimension_semantics = [#tpu.dimension_semantics<parallel>], iteration_bounds = array<i64: 1>, scalar_prefetch = 0 : i64, scratch_operands = 0 : i64, tpu.core_type = #tpu.core_type<tc>, window_params = [{transform_indices = @transform_0, window_bounds = array<i64: 8, 3200>}, {pipeline_mode = #tpu.pipeline_mode<synchronous>, transform_indices = @transform_1, window_bounds = array<i64: 3200, 128>}, {pipeline_mode = #tpu.pipeline_mode<synchronous>, transform_indices = @transform_2, window_bounds = array<i64: 1, 128>}, {pipeline_mode = #tpu.pipeline_mode<synchronous>, transform_indices = @transform_3, window_bounds = array<i64: 128, 128>}, {pipeline_mode = #tpu.pipeline_mode<synchronous>, transform_indices = @transform_4, window_bounds = array<i64: 1, 128>}, {pipeline_mode = #tpu.pipeline_mode<synchronous>, transform_indices = @transform_5, window_bounds = array<i64: 128, 128>}, {pipeline_mode = #tpu.pipeline_mode<synchronous>, transform_indices = @transform_6, window_bounds = array<i64: 1, 128>}, {transform_indices = @transform_7, window_bounds = array<i64: 8, 128>}]} {
    %c0 = arith.constant 0 : index
    %c0_0 = arith.constant 0 : index
    %0 = vector.load %arg1[%c0, %c0_0] : memref<8x3200xbf16, #tpu.memory_space<vmem>>, vector<8x3200xbf16>
    %c0_1 = arith.constant 0 : index
    %c0_2 = arith.constant 0 : index
    %1 = vector.load %arg2[%c0_1, %c0_2] : memref<3200x128xbf16, #tpu.memory_space<vmem>>, vector<3200x128xbf16>
    %cst = arith.constant dense<0.000000e+00> : vector<8x128xf32>
    %2 = tpu.matmul %0, %1, %cst {dimension_numbers = #tpu.dot_dimension_numbers<[1], [0], [0], [1], [0, 0, 1, 1], [], []>} : vector<8x3200xbf16>, vector<3200x128xbf16>, vector<8x128xf32> -> vector<8x128xf32>
    %c0_3 = arith.constant 0 : index
    %c0_4 = arith.constant 0 : index
    %3 = vector.load %arg3[%c0_3, %c0_4] : memref<1x128xf32, #tpu.memory_space<vmem>>, vector<1x128xf32>
    %4 = vector.broadcast %3 : vector<1x128xf32> to vector<8x128xf32>
    %5 = arith.addf %2, %4 : vector<8x128xf32>
    %cst_5 = arith.constant 0.000000e+00 : f32
    %6 = vector.broadcast %cst_5 : f32 to vector<8x128xf32>
    %7 = arith.maximumf %5, %6 : vector<8x128xf32>
    %8 = arith.truncf %7 : vector<8x128xf32> to vector<8x128xbf16>
    %c0_6 = arith.constant 0 : index
    %c0_7 = arith.constant 0 : index
    %9 = vector.load %arg4[%c0_6, %c0_7] : memref<128x128xbf16, #tpu.memory_space<vmem>>, vector<128x128xbf16>
    %cst_8 = arith.constant dense<0.000000e+00> : vector<8x128xf32>
    %10 = tpu.matmul %8, %9, %cst_8 {dimension_numbers = #tpu.dot_dimension_numbers<[1], [0], [0], [1], [0, 0, 1, 1], [], []>} : vector<8x128xbf16>, vector<128x128xbf16>, vector<8x128xf32> -> vector<8x128xf32>
    %c0_9 = arith.constant 0 : index
    %c0_10 = arith.constant 0 : index
    %11 = vector.load %arg5[%c0_9, %c0_10] : memref<1x128xf32, #tpu.memory_space<vmem>>, vector<1x128xf32>
    %12 = vector.broadcast %11 : vector<1x128xf32> to vector<8x128xf32>
    %13 = arith.addf %10, %12 : vector<8x128xf32>
    %cst_11 = arith.constant 0.000000e+00 : f32
    %14 = vector.broadcast %cst_11 : f32 to vector<8x128xf32>
    %15 = arith.maximumf %13, %14 : vector<8x128xf32>
    %16 = arith.truncf %15 : vector<8x128xf32> to vector<8x128xbf16>
    %c0_12 = arith.constant 0 : index
    %c0_13 = arith.constant 0 : index
    %17 = vector.load %arg6[%c0_12, %c0_13] : memref<128x128xbf16, #tpu.memory_space<vmem>>, vector<128x128xbf16>
    %cst_14 = arith.constant dense<0.000000e+00> : vector<8x128xf32>
    %18 = tpu.matmul %16, %17, %cst_14 {dimension_numbers = #tpu.dot_dimension_numbers<[1], [0], [0], [1], [0, 0, 1, 1], [], []>} : vector<8x128xbf16>, vector<128x128xbf16>, vector<8x128xf32> -> vector<8x128xf32>
    %c0_15 = arith.constant 0 : index
    %c0_16 = arith.constant 0 : index
    %19 = vector.load %arg7[%c0_15, %c0_16] : memref<1x128xf32, #tpu.memory_space<vmem>>, vector<1x128xf32>
    %20 = vector.broadcast %19 : vector<1x128xf32> to vector<8x128xf32>
    %21 = arith.addf %18, %20 : vector<8x128xf32>
    %c0_17 = arith.constant 0 : index
    %c0_18 = arith.constant 0 : index
    %22 = vector.load %arg8[%c0_17, %c0_18] : memref<8x128xf32, #tpu.memory_space<vmem>>, vector<8x128xf32>
    tpu.vector_store %arg8[%c0_17, %c0_18], %21 {strides = array<i32>} : memref<8x128xf32, #tpu.memory_space<vmem>>, vector<8x128xf32>,
    return
  }
  func.func @transform_0(%arg0: i32) -> (i32, i32) {
    %c0_i32 = arith.constant 0 : i32
    %c0_i32_0 = arith.constant 0 : i32
    return %arg0, %c0_i32 : i32, i32
  }
  func.func @transform_1(%arg0: i32) -> (i32, i32) {
    %c0_i32 = arith.constant 0 : i32
    %c0_i32_0 = arith.constant 0 : i32
    %c0_i32_1 = arith.constant 0 : i32
    return %c0_i32, %c0_i32_0 : i32, i32
  }
  func.func @transform_2(%arg0: i32) -> (i32, i32) {
    %c0_i32 = arith.constant 0 : i32
    %c0_i32_0 = arith.constant 0 : i32
    %c0_i32_1 = arith.constant 0 : i32
    return %c0_i32, %c0_i32_0 : i32, i32
  }
  func.func @transform_3(%arg0: i32) -> (i32, i32) {
    %c0_i32 = arith.constant 0 : i32
    %c0_i32_0 = arith.constant 0 : i32
    %c0_i32_1 = arith.constant 0 : i32
    return %c0_i32, %c0_i32_0 : i32, i32
  }
  func.func @transform_4(%arg0: i32) -> (i32, i32) {
    %c0_i32 = arith.constant 0 : i32
    %c0_i32_0 = arith.constant 0 : i32
    %c0_i32_1 = arith.constant 0 : i32
    return %c0_i32, %c0_i32_0 : i32, i32
  }
  func.func @transform_5(%arg0: i32) -> (i32, i32) {
    %c0_i32 = arith.constant 0 : i32
    %c0_i32_0 = arith.constant 0 : i32
    %c0_i32_1 = arith.constant 0 : i32
    return %c0_i32, %c0_i32_0 : i32, i32
  }
  func.func @transform_6(%arg0: i32) -> (i32, i32) {
    %c0_i32 = arith.constant 0 : i32
    %c0_i32_0 = arith.constant 0 : i32
    %c0_i32_1 = arith.constant 0 : i32
    return %c0_i32, %c0_i32_0 : i32, i32
  }
  func.func @transform_7(%arg0: i32) -> (i32, i32) {
    %c0_i32 = arith.constant 0 : i32
    %c0_i32_0 = arith.constant 0 : i32
    return %arg0, %c0_i32 : i32, i32
  }
}

</mosaic_0001>

<bundles_post_ra>
// kernel: net_forward.3
= control target key start
LH: loop header
LB: loop body
LE: loop exit
PB: predicated region body
PF: predicated region fallthrough
CT: control target
= control target key end

     0   :  { %v3462_v0 = vmov 0.0   ;;  %vm3463_vm0 = vmmov 0   ;;  %s4488_s4 = inlined_call_operand.vmem [shape: bf16[128,128], index: 4, kind: input, shape index: {}]   ;;  %s4489_s0 = inlined_call_operand.vmem [shape: bf16[392,128], index: 0, kind: input, shape index: {}]   ;;  %s4490_s1 = inlined_call_operand.vmem [shape: bf16[392,128], index: 1, kind: input, shape index: {}]   ;;  %s4491_s2 = inlined_call_operand.vmem [shape: bf16[392,128], index: 2, kind: input, shape index: {}]   ;;  %s4492_s3 = inlined_call_operand.vmem [shape: bf16[392,128], index: 3, kind: input, shape index: {}]   ;;  %s4493_s5 = inlined_call_operand.vmem [shape: f32[1,128], index: 5, kind: input, shape index: {}]   ;;  %s4494_s6 = inlined_call_operand.vmem [shape: bf16[392,128], index: 6, kind: output, shape index: {}]  }
   0x1   :  { %2886 = vmatprep.subr.bf16.mxu0 %v3462_v0  ;;  %3002 = vmatprep.subr.bf16.mxu1 %v3462_v0  ;;  %v3352_v1 = vld [vmem:[%s4488_s4] sm:$0xff]   ;;  %v3353_v2 = vld [vmem:[%s4488_s4 + $0x8] sm:$0xff]   ;;  %v3354_v3 = vld [vmem:[%s4488_s4 + $0x10] sm:$0xff]  }
   0x2   :  { %2902 = vmatprep.mubr.msk.bf16.mxu0 %vm3463_vm0, %v3462_v0  ;;  %3018 = vmatprep.mubr.msk.bf16.mxu1 %vm3463_vm0, %v3462_v0  ;;  %v3355_v4 = vld [vmem:[%s4488_s4 + $0x18] sm:$0xff]   ;;  %v3356_v5 = vld [vmem:[%s4488_s4 + $0x20] sm:$0xff]   ;;  %v3357_v6 = vld [vmem:[%s4488_s4 + $0x28] sm:$0xff]  }
   0x3   :  { %2887 = vmatpush3.bf16.msra.mxu0 %v3352_v1  ;;  %3003 = vmatpush3.bf16.msra.mxu1 %v3352_v1  ;;  %v3358_v7 = vld [vmem:[%s4488_s4 + $0x30] sm:$0xff]   ;;  %v3359_v8 = vld [vmem:[%s4488_s4 + $0x38] sm:$0xff]   ;;  %v3360_v9 = vld [vmem:[%s4489_s0] sm:$0xff]  }
   0x4   :  { %2888 = vmatprep.subr.bf16.mxu0 %v3462_v0  ;;  %3004 = vmatprep.subr.bf16.mxu1 %v3462_v0  ;;  %v3361_v10 = vld [vmem:[%s4490_s1] sm:$0xff]   ;;  %v3362_v11 = vld [vmem:[%s4489_s0 + $0x8] sm:$0xff]   ;;  %v3364_v13 = vld [vmem:[%s4489_s0 + $0x10] sm:$0xff]  }
   0x5   :  { %v3363_v12 = vld [vmem:[%s4490_s1 + $0x8] sm:$0xff]   ;;  %v3365_v14 = vld [vmem:[%s4490_s1 + $0x10] sm:$0xff]   ;;  %v3366_v15 = vld [vmem:[%s4489_s0 + $0x18] sm:$0xff]  }
   0x6   :  { %v3367_v16 = vld [vmem:[%s4490_s1 + $0x18] sm:$0xff]   ;;  %v3368_v17 = vld [vmem:[%s4489_s0 + $0x20] sm:$0xff]   ;;  %v3370_v19 = vld [vmem:[%s4489_s0 + $0x28] sm:$0xff]  }
   0x7   :  { %2889 = vmatpush3.bf16.msra.mxu0 %v3353_v2  ;;  %3005 = vmatpush3.bf16.msra.mxu1 %v3353_v2  ;;  %v3369_v18 = vld [vmem:[%s4490_s1 + $0x20] sm:$0xff]   ;;  %v3371_v20 = vld [vmem:[%s4490_s1 + $0x28] sm:$0xff]   ;;  %v3372_v21 = vld [vmem:[%s4489_s0 + $0x30] sm:$0xff]  }
   0x8   :  { %2890 = vmatprep.subr.bf16.mxu0 %v3462_v0  ;;  %3006 = vmatprep.subr.bf16.mxu1 %v3462_v0  ;;  %v3373_v22 = vld [vmem:[%s4490_s1 + $0x30] sm:$0xff]   ;;  %v3374_v23 = vld [vmem:[%s4489_s0 + $0x38] sm:$0xff]   ;;  %v3376_v25 = vld [vmem:[%s4489_s0 + $0x40] sm:$0xff]  }
   0x9   :  { %v3375_v24 = vld [vmem:[%s4490_s1 + $0x38] sm:$0xff]   ;;  %v3377_v26 = vld [vmem:[%s4490_s1 + $0x40] sm:$0xff]   ;;  %v3378_v27 = vld [vmem:[%s4489_s0 + $0x48] sm:$0xff]  }
   0xa   :  { %v3379_v28 = vld [vmem:[%s4490_s1 + $0x48] sm:$0xff]   ;;  %v3380_v29 = vld [vmem:[%s4489_s0 + $0x50] sm:$0xff]   ;;  %v3382_v31 = vld [vmem:[%s4489_s0 + $0x58] sm:$0xff]  }
   0xb   :  { %2891 = vmatpush3.bf16.msra.mxu0 %v3354_v3  ;;  %3007 = vmatpush3.bf16.msra.mxu1 %v3354_v3  ;;  %v3381_v30 = vld [vmem:[%s4490_s1 + $0x50] sm:$0xff]   ;;  %v3383_v32 = vld [vmem:[%s4490_s1 + $0x58] sm:$0xff]   ;;  %v3384_v33 = vld [vmem:[%s4489_s0 + $0x60] sm:$0xff]  }
   0xc   :  { %2892 = vmatprep.subr.bf16.mxu0 %v3462_v0  ;;  %3008 = vmatprep.subr.bf16.mxu1 %v3462_v0  ;;  %v3385_v34 = vld [vmem:[%s4490_s1 + $0x60] sm:$0xff]   ;;  %v3386_v35 = vld [vmem:[%s4489_s0 + $0x68] sm:$0xff]   ;;  %v3388_v37 = vld [vmem:[%s4489_s0 + $0x70] sm:$0xff]  }
   0xd   :  { %v3387_v36 = vld [vmem:[%s4490_s1 + $0x68] sm:$0xff]   ;;  %v3389_v38 = vld [vmem:[%s4490_s1 + $0x70] sm:$0xff]   ;;  %v3390_v39 = vld [vmem:[%s4489_s0 + $0x78] sm:$0xff]  }
   0xe   :  { %v3391_v40 = vld [vmem:[%s4490_s1 + $0x78] sm:$0xff]   ;;  %v3392_v41 = vld [vmem:[%s4489_s0 + $0x80] sm:$0xff]   ;;  %v3394_v43 = vld [vmem:[%s4489_s0 + $0x88] sm:$0xff]  }
   0xf   :  { %2893 = vmatpush3.bf16.msra.mxu0 %v3355_v4  ;;  %3009 = vmatpush3.bf16.msra.mxu1 %v3355_v4  ;;  %v3393_v42 = vld [vmem:[%s4490_s1 + $0x80] sm:$0xff]   ;;  %v3395_v44 = vld [vmem:[%s4490_s1 + $0x88] sm:$0xff]   ;;  %v3396_v45 = vld [vmem:[%s4489_s0 + $0x90] sm:$0xff]  }
  0x10   :  { %2894 = vmatprep.subr.bf16.mxu0 %v3462_v0  ;;  %3010 = vmatprep.subr.bf16.mxu1 %v3462_v0  ;;  %v3397_v46 = vld [vmem:[%s4490_s1 + $0x90] sm:$0xff]   ;;  %v3398_v47 = vld [vmem:[%s4489_s0 + $0x98] sm:$0xff]   ;;  %v3400_v49 = vld [vmem:[%s4489_s0 + $0xa0] sm:$0xff]  }
  0x11   :  { %v3399_v48 = vld [vmem:[%s4490_s1 + $0x98] sm:$0xff]   ;;  %v3401_v50 = vld [vmem:[%s4490_s1 + $0xa0] sm:$0xff]   ;;  %v3402_v51 = vld [vmem:[%s4489_s0 + $0xa8] sm:$0xff]  }
  0x12   :  { %v3403_v52 = vld [vmem:[%s4490_s1 + $0xa8] sm:$0xff]   ;;  %v3404_v53 = vld [vmem:[%s4489_s0 + $0xb0] sm:$0xff]   ;;  %v3406_v55 = vld [vmem:[%s4489_s0 + $0xb8] sm:$0xff]  }
  0x13   :  { %2895 = vmatpush3.bf16.msra.mxu0 %v3356_v5  ;;  %3011 = vmatpush3.bf16.msra.mxu1 %v3356_v5  ;;  %v3405_v54 = vld [vmem:[%s4490_s1 + $0xb0] sm:$0xff]   ;;  %v3407_v56 = vld [vmem:[%s4490_s1 + $0xb8] sm:$0xff]   ;;  %v3408_v57 = vld [vmem:[%s4489_s0 + $0xc0] ss:$0 sps:$4 sm:$0xff]  }
  0x14   :  { %2896 = vmatprep.subr.bf16.mxu0 %v3462_v0  ;;  %3012 = vmatprep.subr.bf16.mxu1 %v3462_v0  ;;  %v3409_v58 = vld [vmem:[%s4490_s1 + $0xc0] ss:$0 sps:$4 sm:$0xff]   ;;  %v3412_v61 = vld [vmem:[%s4491_s2 + $0x8] sm:$0xff]  }
  0x15   :  { %v3410_v59 = vld [vmem:[%s4491_s2] sm:$0xff]   ;;  %v3413_v62 = vld [vmem:[%s4492_s3 + $0x8] sm:$0xff]  }
  0x16   :  { %v3411_v60 = vld [vmem:[%s4492_s3] sm:$0xff]  }
  0x17   :  { %2897 = vmatpush3.bf16.msra.mxu0 %v3357_v6  ;;  %3013 = vmatpush3.bf16.msra.mxu1 %v3357_v6  ;;  %v3828_v63 = vld [vmem:[%s4493_s5] ss:$0 sm:$0xff] }
  0x18   :  { %2898 = vmatprep.subr.bf16.mxu0 %v3462_v0  ;;  %3014 = vmatprep.subr.bf16.mxu1 %v3462_v0 }
  0x1b   :  { %2899 = vmatpush3.bf16.msra.mxu0 %v3358_v7  ;;  %3015 = vmatpush3.bf16.msra.mxu1 %v3358_v7 }
  0x1c   :  { %2900 = vmatprep.subr.bf16.mxu0 %v3462_v0  ;;  %3016 = vmatprep.subr.bf16.mxu1 %v3462_v0 }
  0x1f   :  { %2901 = vmatpush3.bf16.msra.mxu0 %v3359_v8  ;;  %3017 = vmatpush3.bf16.msra.mxu1 %v3359_v8 }
  0x20   :  { %3118 = vmatprep.subr.bf16.mxu0 %v3462_v0  ;;  %3234 = vmatprep.subr.bf16.mxu1 %v3462_v0 }
  0x22   :  { %2903 = vmatmul.mubr.bf16.vlgmr.msra.gmra.mrb[0].mxu0 %v3360_v9  ;;  %3019 = vmatmul.mubr.bf16.vlgmr.msra.gmra.mrb[0].mxu1 %v3361_v10 }
  0x23   :  { %3119 = vmatpush3.bf16.msra.mxu0 %v3352_v1  ;;  %3235 = vmatpush3.bf16.msra.mxu1 %v3352_v1 }
  0x24   :  { %2906 = vmatprep.mubr.msk.bf16.mxu0 %vm3463_vm0, %v3462_v0  ;;  %3022 = vmatprep.mubr.msk.bf16.mxu1 %vm3463_vm0, %v3462_v0 }
  0x25   :  { %3120 = vmatprep.subr.bf16.mxu0 %v3462_v0  ;;  %3236 = vmatprep.subr.bf16.mxu1 %v3462_v0 }
  0x27   :  { %3121 = vmatpush3.bf16.msra.mxu0 %v3353_v2  ;;  %3237 = vmatpush3.bf16.msra.mxu1 %v3353_v2 }
  0x28   :  { %3122 = vmatprep.subr.bf16.mxu0 %v3462_v0  ;;  %3238 = vmatprep.subr.bf16.mxu1 %v3462_v0 }
  0x2a   :  { %2907 = vmatmul.mubr.bf16.gmra.mrb[4].mxu0 %v3362_v11  ;;  %3023 = vmatmul.mubr.bf16.gmra.mrb[4].mxu1 %v3363_v12 }
  0x2b   :  { %2910 = vmatprep.mubr.msk.bf16.mxu0 %vm3463_vm0, %v3462_v0  ;;  %3026 = vmatprep.mubr.msk.bf16.mxu1 %vm3463_vm0, %v3462_v0 }
  0x2c   :  { %3123 = vmatpush3.bf16.msra.mxu0 %v3354_v3  ;;  %3239 = vmatpush3.bf16.msra.mxu1 %v3354_v3 }
  0x2d   :  { %3124 = vmatprep.subr.bf16.mxu0 %v3462_v0  ;;  %3240 = vmatprep.subr.bf16.mxu1 %v3462_v0 }
  0x30   :  { %3125 = vmatpush3.bf16.msra.mxu0 %v3355_v4  ;;  %3241 = vmatpush3.bf16.msra.mxu1 %v3355_v4 }
  0x31   :  { %3126 = vmatprep.subr.bf16.mxu0 %v3462_v0  ;;  %3242 = vmatprep.subr.bf16.mxu1 %v3462_v0 }
  0x32   :  { %2911 = vmatmul.mubr.bf16.gmra.mrb[8].mxu0 %v3364_v13  ;;  %3027 = vmatmul.mubr.bf16.gmra.mrb[8].mxu1 %v3365_v14 }
  0x33   :  { %2914 = vmatprep.mubr.msk.bf16.mxu0 %vm3463_vm0, %v3462_v0  ;;  %3030 = vmatprep.mubr.msk.bf16.mxu1 %vm3463_vm0, %v3462_v0 }
  0x34   :  { %3127 = vmatpush3.bf16.msra.mxu0 %v3356_v5  ;;  %3243 = vmatpush3.bf16.msra.mxu1 %v3356_v5 }
  0x35   :  { %3128 = vmatprep.subr.bf16.mxu0 %v3462_v0  ;;  %3244 = vmatprep.subr.bf16.mxu1 %v3462_v0 }
  0x38   :  { %3129 = vmatpush3.bf16.msra.mxu0 %v3357_v6  ;;  %3245 = vmatpush3.bf16.msra.mxu1 %v3357_v6 }
  0x39   :  { %3130 = vmatprep.subr.bf16.mxu0 %v3462_v0  ;;  %3246 = vmatprep.subr.bf16.mxu1 %v3462_v0 }
  0x3a   :  { %2915 = vmatmul.mubr.bf16.gmra.mrb[12].mxu0 %v3366_v15  ;;  %3031 = vmatmul.mubr.bf16.gmra.mrb[12].mxu1 %v3367_v16 }
  0x3b   :  { %2918 = vmatprep.mubr.msk.bf16.mxu0 %vm3463_vm0, %v3462_v0  ;;  %3034 = vmatprep.mubr.msk.bf16.mxu1 %vm3463_vm0, %v3462_v0 }
  0x3c   :  { %3131 = vmatpush3.bf16.msra.mxu0 %v3358_v7  ;;  %3247 = vmatpush3.bf16.msra.mxu1 %v3358_v7  ;;  %v3414_v7 = vld [vmem:[%s4491_s2 + $0x10] sm:$0xff]  }
  0x3d   :  { %3132 = vmatprep.subr.bf16.mxu0 %v3462_v0  ;;  %3248 = vmatprep.subr.bf16.mxu1 %v3462_v0 }
  0x40   :  { %3133 = vmatpush3.bf16.msra.mxu0 %v3359_v8  ;;  %3249 = vmatpush3.bf16.msra.mxu1 %v3359_v8  ;;  %v3415_v8 = vld [vmem:[%s4492_s3 + $0x10] sm:$0xff]  }
  0x42   :  { %2919 = vmatmul.mubr.bf16.gmra.mrb[16].mxu0 %v3368_v17  ;;  %3035 = vmatmul.mubr.bf16.gmra.mrb[16].mxu1 %v3369_v18 }
  0x43   :  { %2922 = vmatprep.mubr.msk.bf16.mxu0 %vm3463_vm0, %v3462_v0  ;;  %3038 = vmatprep.mubr.msk.bf16.mxu1 %vm3463_vm0, %v3462_v0 }
  0x4a   :  { %2923 = vmatmul.mubr.bf16.gmra.mrb[20].mxu0 %v3370_v19  ;;  %3039 = vmatmul.mubr.bf16.gmra.mrb[20].mxu1 %v3371_v20 }
  0x4b   :  { %2926 = vmatprep.mubr.msk.bf16.mxu0 %vm3463_vm0, %v3462_v0  ;;  %3042 = vmatprep.mubr.msk.bf16.mxu1 %vm3463_vm0, %v3462_v0 }
  0x52   :  { %2927 = vmatmul.mubr.bf16.gmra.mrb[24].mxu0 %v3372_v21  ;;  %3043 = vmatmul.mubr.bf16.gmra.mrb[24].mxu1 %v3373_v22 }
  0x53   :  { %2930 = vmatprep.mubr.msk.bf16.mxu0 %vm3463_vm0, %v3462_v0  ;;  %3046 = vmatprep.mubr.msk.bf16.mxu1 %vm3463_vm0, %v3462_v0 }
  0x5a   :  { %2931 = vmatmul.mubr.bf16.gmra.mrb[28].mxu0 %v3374_v23  ;;  %3047 = vmatmul.mubr.bf16.gmra.mrb[28].mxu1 %v3375_v24 }
  0x5b   :  { %2934 = vmatprep.mubr.msk.bf16.mxu0 %vm3463_vm0, %v3462_v0  ;;  %3050 = vmatprep.mubr.msk.bf16.mxu1 %vm3463_vm0, %v3462_v0 }
  0x62   :  { %2935 = vmatmul.mubr.bf16.gmra.mrb[32].mxu0 %v3376_v25  ;;  %3051 = vmatmul.mubr.bf16.gmra.mrb[32].mxu1 %v3377_v26 }
  0x63   :  { %2938 = vmatprep.mubr.msk.bf16.mxu0 %vm3463_vm0, %v3462_v0  ;;  %3054 = vmatprep.mubr.msk.bf16.mxu1 %vm3463_vm0, %v3462_v0 }
  0x6a   :  { %2939 = vmatmul.mubr.bf16.gmra.mrb[36].mxu0 %v3378_v27  ;;  %3055 = vmatmul.mubr.bf16.gmra.mrb[36].mxu1 %v3379_v28  ;;  %v3416_v27 = vld [vmem:[%s4491_s2 + $0x18] sm:$0xff]  }
  0x6b   :  { %2942 = vmatprep.mubr.msk.bf16.mxu0 %vm3463_vm0, %v3462_v0  ;;  %3058 = vmatprep.mubr.msk.bf16.mxu1 %vm3463_vm0, %v3462_v0  ;;  %v3417_v28 = vld [vmem:[%s4492_s3 + $0x18] sm:$0xff]  }
  0x72   :  { %2943 = vmatmul.mubr.bf16.gmra.mrb[40].mxu0 %v3380_v29  ;;  %3059 = vmatmul.mubr.bf16.gmra.mrb[40].mxu1 %v3381_v30 }
  0x73   :  { %2946 = vmatprep.mubr.msk.bf16.mxu0 %vm3463_vm0, %v3462_v0  ;;  %3062 = vmatprep.mubr.msk.bf16.mxu1 %vm3463_vm0, %v3462_v0 }
  0x7a   :  { %2947 = vmatmul.mubr.bf16.gmra.mrb[44].mxu0 %v3382_v31  ;;  %3063 = vmatmul.mubr.bf16.gmra.mrb[44].mxu1 %v3383_v32 }
  0x7b   :  { %2950 = vmatprep.mubr.msk.bf16.mxu0 %vm3463_vm0, %v3462_v0  ;;  %3066 = vmatprep.mubr.msk.bf16.mxu1 %vm3463_vm0, %v3462_v0 }
  0x82   :  { %2951 = vmatmul.mubr.bf16.gmra.mrb[48].mxu0 %v3384_v33  ;;  %3067 = vmatmul.mubr.bf16.gmra.mrb[48].mxu1 %v3385_v34 }
  0x83   :  { %2954 = vmatprep.mubr.msk.bf16.mxu0 %vm3463_vm0, %v3462_v0  ;;  %3070 = vmatprep.mubr.msk.bf16.mxu1 %vm3463_vm0, %v3462_v0 }
  0x8a   :  { %2955 = vmatmul.mubr.bf16.gmra.mrb[52].mxu0 %v3386_v35  ;;  %3071 = vmatmul.mubr.bf16.gmra.mrb[52].mxu1 %v3387_v36 }
  0x8b   :  { %2958 = vmatprep.mubr.msk.bf16.mxu0 %vm3463_vm0, %v3462_v0  ;;  %3074 = vmatprep.mubr.msk.bf16.mxu1 %vm3463_vm0, %v3462_v0 }
  0x92   :  { %2959 = vmatmul.mubr.bf16.gmra.mrb[56].mxu0 %v3388_v37  ;;  %3075 = vmatmul.mubr.bf16.gmra.mrb[56].mxu1 %v3389_v38 }
  0x93   :  { %2962 = vmatprep.mubr.msk.bf16.mxu0 %vm3463_vm0, %v3462_v0  ;;  %3078 = vmatprep.mubr.msk.bf16.mxu1 %vm3463_vm0, %v3462_v0 }
  0x9a   :  { %2963 = vmatmul.mubr.bf16.gmra.mrb[60].mxu0 %v3390_v39  ;;  %3079 = vmatmul.mubr.bf16.gmra.mrb[60].mxu1 %v3391_v40 }
  0x9b   :  { %2966 = vmatprep.mubr.msk.bf16.mxu0 %vm3463_vm0, %v3462_v0  ;;  %3082 = vmatprep.mubr.msk.bf16.mxu1 %vm3463_vm0, %v3462_v0 }
  0xa2   :  { %2967 = vmatmul.mubr.bf16.gmra.mrb[64].mxu0 %v3392_v41  ;;  %3083 = vmatmul.mubr.bf16.gmra.mrb[64].mxu1 %v3393_v42 }
  0xa3   :  { %2970 = vmatprep.mubr.msk.bf16.mxu0 %vm3463_vm0, %v3462_v0  ;;  %3086 = vmatprep.mubr.msk.bf16.mxu1 %vm3463_vm0, %v3462_v0 }
  0xaa   :  { %2971 = vmatmul.mubr.bf16.gmra.mrb[68].mxu0 %v3394_v43  ;;  %3087 = vmatmul.mubr.bf16.gmra.mrb[68].mxu1 %v3395_v44 }
  0xab   :  { %2974 = vmatprep.mubr.msk.bf16.mxu0 %vm3463_vm0, %v3462_v0  ;;  %3090 = vmatprep.mubr.msk.bf16.mxu1 %vm3463_vm0, %v3462_v0 }
  0xb2   :  { %2975 = vmatmul.mubr.bf16.gmra.mrb[72].mxu0 %v3396_v45  ;;  %3091 = vmatmul.mubr.bf16.gmra.mrb[72].mxu1 %v3397_v46 }
  0xb3   :  { %2978 = vmatprep.mubr.msk.bf16.mxu0 %vm3463_vm0, %v3462_v0  ;;  %3094 = vmatprep.mubr.msk.bf16.mxu1 %vm3463_vm0, %v3462_v0 }
  0xba   :  { %2979 = vmatmul.mubr.bf16.gmra.mrb[76].mxu0 %v3398_v47  ;;  %3095 = vmatmul.mubr.bf16.gmra.mrb[76].mxu1 %v3399_v48  ;;  %v3418_v47 = vld [vmem:[%s4491_s2 + $0x20] sm:$0xff]  }
  0xbb   :  { %2982 = vmatprep.mubr.msk.bf16.mxu0 %vm3463_vm0, %v3462_v0  ;;  %3098 = vmatprep.mubr.msk.bf16.mxu1 %vm3463_vm0, %v3462_v0  ;;  %v3419_v48 = vld [vmem:[%s4492_s3 + $0x20] sm:$0xff]  }
  0xc2   :  { %2983 = vmatmul.mubr.bf16.gmra.mrb[80].mxu0 %v3400_v49  ;;  %3099 = vmatmul.mubr.bf16.gmra.mrb[80].mxu1 %v3401_v50 }
  0xc3   :  { %2986 = vmatprep.mubr.msk.bf16.mxu0 %vm3463_vm0, %v3462_v0  ;;  %3102 = vmatprep.mubr.msk.bf16.mxu1 %vm3463_vm0, %v3462_v0 }
  0xca   :  { %2987 = vmatmul.mubr.bf16.gmra.mrb[84].mxu0 %v3402_v51  ;;  %3103 = vmatmul.mubr.bf16.gmra.mrb[84].mxu1 %v3403_v52 }
  0xcb   :  { %2990 = vmatprep.mubr.msk.bf16.mxu0 %vm3463_vm0, %v3462_v0  ;;  %3106 = vmatprep.mubr.msk.bf16.mxu1 %vm3463_vm0, %v3462_v0 }
  0xd2   :  { %2991 = vmatmul.mubr.bf16.gmra.mrb[88].mxu0 %v3404_v53  ;;  %3107 = vmatmul.mubr.bf16.gmra.mrb[88].mxu1 %v3405_v54 }
  0xd3   :  { %2994 = vmatprep.mubr.msk.bf16.mxu0 %vm3463_vm0, %v3462_v0  ;;  %3110 = vmatprep.mubr.msk.bf16.mxu1 %vm3463_vm0, %v3462_v0 }
  0xda   :  { %2995 = vmatmul.mubr.bf16.gmra.mrb[92].mxu0 %v3406_v55  ;;  %3111 = vmatmul.mubr.bf16.gmra.mrb[92].mxu1 %v3407_v56 }
  0xdb   :  { %2998 = vmatprep.mubr.msk.bf16.mxu0 %vm3463_vm0, %v3462_v0  ;;  %3114 = vmatprep.mubr.msk.bf16.mxu1 %vm3463_vm0, %v3462_v0 }
  0xe2   :  { %2999 = vmatmul.mubr.bf16.gmra.mrb[96].mxu0 %v3408_v57  ;;  %3115 = vmatmul.mubr.bf16.gmra.mrb[96].mxu1 %v3409_v58 }
  0xe3   :  { %3134 = vmatprep.mubr.msk.bf16.mxu0 %vm3463_vm0, %v3462_v0  ;;  %3250 = vmatprep.mubr.msk.bf16.mxu1 %vm3463_vm0, %v3462_v0 }
  0xea   :  { %3135 = vmatmul.mubr.bf16.vlgmr.msra.gmra.mrb[100].mxu0 %v3410_v59  ;;  %3251 = vmatmul.mubr.bf16.vlgmr.msra.gmra.mrb[100].mxu1 %v3411_v60 }
  0xeb   :  { %3138 = vmatprep.mubr.msk.bf16.mxu0 %vm3463_vm0, %v3462_v0  ;;  %3254 = vmatprep.mubr.msk.bf16.mxu1 %vm3463_vm0, %v3462_v0 }
  0xf2   :  { %3139 = vmatmul.mubr.bf16.gmra.mrb[104].mxu0 %v3412_v61  ;;  %3255 = vmatmul.mubr.bf16.gmra.mrb[104].mxu1 %v3413_v62 }
  0xf3   :  { %3142 = vmatprep.mubr.msk.bf16.mxu0 %vm3463_vm0, %v3462_v0  ;;  %3258 = vmatprep.mubr.msk.bf16.mxu1 %vm3463_vm0, %v3462_v0 }
  0xf5   :  { %v326_v1 = vpop.f32.mrb[0].mxu0  ;;  %v804_v2 = vpop.f32.mrb[0].mxu1 }
  0xf6   :  { %v327_v3 = vadd.f32 %v3828_v63, %v326_v1  ;;  %v805_v4 = vadd.f32 %v3828_v63, %v804_v2  ;;  %v2904_v5 = vpop.f32.mrb[1].mxu0  ;;  %v3020_v6 = vpop.f32.mrb[1].mxu1 }
  0xf7   :  { %v329_v9 = vpop.f32.mrb[2].mxu0  ;;  %v807_v10 = vpop.f32.mrb[2].mxu1  ;;  %v3420_v5 = vld [vmem:[%s4491_s2 + $0x28] sm:$0xff]  }
  0xf8   :  { %v524_v11 = vmax.f32 %v327_v3, 0.0  ;;  %v1002_v12 = vmax.f32 %v805_v4, 0.0  ;;  %v330_v13 = vadd.f32 %v3828_v63, %v329_v9  ;;  %v808_v14 = vadd.f32 %v3828_v63, %v807_v10  ;;  %v2905_v15 = vpop.f32.mrb[3].mxu0  ;;  %v3021_v16 = vpop.f32.mrb[3].mxu1  ;;  %v3421_v6 = vld [vmem:[%s4492_s3 + $0x28] sm:$0xff]  }
  0xfa   :  { %v3844_v17 = vmax.f32 %v524_v11, %v1002_v12  ;;  %v525_v18 = vmax.f32 %v330_v13, 0.0  ;;  %v1003_v19 = vmax.f32 %v808_v14, 0.0  ;;  %3143 = vmatmul.mubr.bf16.gmra.mrb[108].mxu0 %v3414_v7  ;;  %3259 = vmatmul.mubr.bf16.gmra.mrb[108].mxu1 %v3415_v8 }
  0xfb   :  { %3146 = vmatprep.mubr.msk.bf16.mxu0 %vm3463_vm0, %v3462_v0  ;;  %3262 = vmatprep.mubr.msk.bf16.mxu1 %vm3463_vm0, %v3462_v0 }
  0xfc   :  { %v3850_v20 = vmax.f32 %v525_v18, %v1003_v19 }
  0xfd   :  { %v334_v21 = vpop.f32.mrb[4].mxu0  ;;  %v812_v22 = vpop.f32.mrb[4].mxu1 }
  0xfe   :  { %v335_v23 = vadd.f32 %v3828_v63, %v334_v21  ;;  %v813_v24 = vadd.f32 %v3828_v63, %v812_v22  ;;  %v2908_v25 = vpop.f32.mrb[5].mxu0  ;;  %v3024_v26 = vpop.f32.mrb[5].mxu1 }
  0xff   :  { %v337_v29 = vpop.f32.mrb[6].mxu0  ;;  %v815_v30 = vpop.f32.mrb[6].mxu1 }
 0x100   :  { %v526_v31 = vmax.f32 %v335_v23, 0.0  ;;  %v1004_v32 = vmax.f32 %v813_v24, 0.0  ;;  %v338_v33 = vadd.f32 %v3828_v63, %v337_v29  ;;  %v816_v34 = vadd.f32 %v3828_v63, %v815_v30  ;;  %v2909_v35 = vpop.f32.mrb[7].mxu0  ;;  %v3025_v36 = vpop.f32.mrb[7].mxu1 }
 0x102   :  { %v3862_v37 = vmax.f32 %v526_v31, %v1004_v32  ;;  %v527_v38 = vmax.f32 %v338_v33, 0.0  ;;  %v1005_v39 = vmax.f32 %v816_v34, 0.0  ;;  %3147 = vmatmul.mubr.bf16.gmra.mrb[112].mxu0 %v3416_v27  ;;  %3263 = vmatmul.mubr.bf16.gmra.mrb[112].mxu1 %v3417_v28  ;;  %v3422_v27 = vld [vmem:[%s4491_s2 + $0x30] sm:$0xff]  }
 0x103   :  { %3150 = vmatprep.mubr.msk.bf16.mxu0 %vm3463_vm0, %v3462_v0  ;;  %3266 = vmatprep.mubr.msk.bf16.mxu1 %vm3463_vm0, %v3462_v0  ;;  %v3423_v28 = vld [vmem:[%s4492_s3 + $0x30] sm:$0xff]  }
 0x104   :  { %v3868_v40 = vmax.f32 %v527_v38, %v1005_v39 }
 0x105   :  { %v342_v41 = vpop.f32.mrb[8].mxu0  ;;  %v820_v42 = vpop.f32.mrb[8].mxu1 }
 0x106   :  { %v343_v43 = vadd.f32 %v3828_v63, %v342_v41  ;;  %v821_v44 = vadd.f32 %v3828_v63, %v820_v42  ;;  %v2912_v45 = vpop.f32.mrb[9].mxu0  ;;  %v3028_v46 = vpop.f32.mrb[9].mxu1 }
 0x107   :  { %v345_v49 = vpop.f32.mrb[10].mxu0  ;;  %v823_v50 = vpop.f32.mrb[10].mxu1 }
 0x108   :  { %v528_v51 = vmax.f32 %v343_v43, 0.0  ;;  %v1006_v52 = vmax.f32 %v821_v44, 0.0  ;;  %v346_v53 = vadd.f32 %v3828_v63, %v345_v49  ;;  %v824_v54 = vadd.f32 %v3828_v63, %v823_v50  ;;  %v2913_v55 = vpop.f32.mrb[11].mxu0  ;;  %v3029_v56 = vpop.f32.mrb[11].mxu1  ;;  %v3424_v49 = vld [vmem:[%s4491_s2 + $0x38] sm:$0xff]  }
 0x109   :  { %v3425_v50 = vld [vmem:[%s4492_s3 + $0x38] sm:$0xff]  }
 0x10a   :  { %v3880_v57 = vmax.f32 %v528_v51, %v1006_v52  ;;  %v529_v58 = vmax.f32 %v346_v53, 0.0  ;;  %v1007_v59 = vmax.f32 %v824_v54, 0.0  ;;  %3151 = vmatmul.mubr.bf16.gmra.mrb[116].mxu0 %v3418_v47  ;;  %3267 = vmatmul.mubr.bf16.gmra.mrb[116].mxu1 %v3419_v48 }
 0x10b   :  { %3154 = vmatprep.mubr.msk.bf16.mxu0 %vm3463_vm0, %v3462_v0  ;;  %3270 = vmatprep.mubr.msk.bf16.mxu1 %vm3463_vm0, %v3462_v0 }
 0x10c   :  { %v3886_v60 = vmax.f32 %v529_v58, %v1007_v59 }
 0x10d   :  { %v350_v61 = vpop.f32.mrb[12].mxu0  ;;  %v828_v62 = vpop.f32.mrb[12].mxu1 }
 0x10e   :  { %v351_v1 = vadd.f32 %v3828_v63, %v350_v61  ;;  %v829_v2 = vadd.f32 %v3828_v63, %v828_v62  ;;  %v2916_v3 = vpop.f32.mrb[13].mxu0  ;;  %v3032_v4 = vpop.f32.mrb[13].mxu1 }
 0x10f   :  { %v353_v7 = vpop.f32.mrb[14].mxu0  ;;  %v831_v8 = vpop.f32.mrb[14].mxu1 }
 0x110   :  { %v530_v9 = vmax.f32 %v351_v1, 0.0  ;;  %v1008_v10 = vmax.f32 %v829_v2, 0.0  ;;  %v354_v11 = vadd.f32 %v3828_v63, %v353_v7  ;;  %v832_v12 = vadd.f32 %v3828_v63, %v831_v8  ;;  %v2917_v13 = vpop.f32.mrb[15].mxu0  ;;  %v3033_v14 = vpop.f32.mrb[15].mxu1 }
 0x112   :  { %v3898_v15 = vmax.f32 %v530_v9, %v1008_v10  ;;  %v531_v16 = vmax.f32 %v354_v11, 0.0  ;;  %v1009_v18 = vmax.f32 %v832_v12, 0.0  ;;  %3155 = vmatmul.mubr.bf16.gmra.mrb[120].mxu0 %v3420_v5  ;;  %3271 = vmatmul.mubr.bf16.gmra.mrb[120].mxu1 %v3421_v6  ;;  %v3426_v9 = vld [vmem:[%s4491_s2 + $0x40] sm:$0xff]  }
 0x113   :  { %3158 = vmatprep.mubr.msk.bf16.mxu0 %vm3463_vm0, %v3462_v0  ;;  %3274 = vmatprep.mubr.msk.bf16.mxu1 %vm3463_vm0, %v3462_v0  ;;  %v3427_v10 = vld [vmem:[%s4492_s3 + $0x40] sm:$0xff]  }
 0x114   :  { %v3904_v19 = vmax.f32 %v531_v16, %v1009_v18 }
 0x115   :  { %v358_v21 = vpop.f32.mrb[16].mxu0  ;;  %v836_v22 = vpop.f32.mrb[16].mxu1 }
 0x116   :  { %v359_v23 = vadd.f32 %v3828_v63, %v358_v21  ;;  %v837_v24 = vadd.f32 %v3828_v63, %v836_v22  ;;  %v2920_v25 = vpop.f32.mrb[17].mxu0  ;;  %v3036_v26 = vpop.f32.mrb[17].mxu1 }
 0x117   :  { %v361_v29 = vpop.f32.mrb[18].mxu0  ;;  %v839_v30 = vpop.f32.mrb[18].mxu1 }
 0x118   :  { %v532_v31 = vmax.f32 %v359_v23, 0.0  ;;  %v1010_v32 = vmax.f32 %v837_v24, 0.0  ;;  %v362_v33 = vadd.f32 %v3828_v63, %v361_v29  ;;  %v840_v34 = vadd.f32 %v3828_v63, %v839_v30  ;;  %v2921_v35 = vpop.f32.mrb[19].mxu0  ;;  %v3037_v36 = vpop.f32.mrb[19].mxu1 }
 0x11a   :  { %v3916_v38 = vmax.f32 %v532_v31, %v1010_v32  ;;  %v533_v39 = vmax.f32 %v362_v33, 0.0  ;;  %v1011_v41 = vmax.f32 %v840_v34, 0.0  ;;  %3159 = vmatmul.mubr.bf16.gmra.mrb[124].mxu0 %v3422_v27  ;;  %3275 = vmatmul.mubr.bf16.gmra.mrb[124].mxu1 %v3423_v28  ;;  %v3428_v33 = vld [vmem:[%s4491_s2 + $0x48] sm:$0xff]  }
 0x11b   :  { %3162 = vmatprep.mubr.msk.bf16.mxu0 %vm3463_vm0, %v3462_v0  ;;  %3278 = vmatprep.mubr.msk.bf16.mxu1 %vm3463_vm0, %v3462_v0  ;;  %v3429_v34 = vld [vmem:[%s4492_s3 + $0x48] sm:$0xff]  }
 0x11c   :  { %v3922_v42 = vmax.f32 %v533_v39, %v1011_v41 }
 0x11d   :  { %v366_v43 = vpop.f32.mrb[20].mxu0  ;;  %v844_v44 = vpop.f32.mrb[20].mxu1 }
 0x11e   :  { %v367_v45 = vadd.f32 %v3828_v63, %v366_v43  ;;  %v845_v46 = vadd.f32 %v3828_v63, %v844_v44  ;;  %v2924_v47 = vpop.f32.mrb[21].mxu0  ;;  %v3040_v48 = vpop.f32.mrb[21].mxu1 }
 0x11f   :  { %v369_v51 = vpop.f32.mrb[22].mxu0  ;;  %v847_v52 = vpop.f32.mrb[22].mxu1 }
 0x120   :  { %v534_v53 = vmax.f32 %v367_v45, 0.0  ;;  %v1012_v54 = vmax.f32 %v845_v46, 0.0  ;;  %v370_v55 = vadd.f32 %v3828_v63, %v369_v51  ;;  %v848_v56 = vadd.f32 %v3828_v63, %v847_v52  ;;  %v2925_v58 = vpop.f32.mrb[23].mxu0  ;;  %v3041_v59 = vpop.f32.mrb[23].mxu1 }
 0x121   :  { %v3430_v58 = vld [vmem:[%s4491_s2 + $0x50] sm:$0xff]  }
 0x122   :  { %v3934_v61 = vmax.f32 %v534_v53, %v1012_v54  ;;  %v535_v62 = vmax.f32 %v370_v55, 0.0  ;;  %v1013_v1 = vmax.f32 %v848_v56, 0.0  ;;  %3163 = vmatmul.mubr.bf16.gmra.mrb[128].mxu0 %v3424_v49  ;;  %3279 = vmatmul.mubr.bf16.gmra.mrb[128].mxu1 %v3425_v50  ;;  %v3431_v59 = vld [vmem:[%s4492_s3 + $0x50] sm:$0xff]  }
 0x123   :  { %3166 = vmatprep.mubr.msk.bf16.mxu0 %vm3463_vm0, %v3462_v0  ;;  %3282 = vmatprep.mubr.msk.bf16.mxu1 %vm3463_vm0, %v3462_v0 }
 0x124   :  { %v3940_v2 = vmax.f32 %v535_v62, %v1013_v1 }
 0x125   :  { %v374_v3 = vpop.f32.mrb[24].mxu0  ;;  %v852_v4 = vpop.f32.mrb[24].mxu1 }
 0x126   :  { %v375_v5 = vadd.f32 %v3828_v63, %v374_v3  ;;  %v853_v6 = vadd.f32 %v3828_v63, %v852_v4  ;;  %v2928_v7 = vpop.f32.mrb[25].mxu0  ;;  %v3044_v8 = vpop.f32.mrb[25].mxu1 }
 0x127   :  { %v377_v11 = vpop.f32.mrb[26].mxu0  ;;  %v855_v12 = vpop.f32.mrb[26].mxu1 }
 0x128   :  { %v536_v13 = vmax.f32 %v375_v5, 0.0  ;;  %v1014_v14 = vmax.f32 %v853_v6, 0.0  ;;  %v378_v16 = vadd.f32 %v3828_v63, %v377_v11  ;;  %v856_v18 = vadd.f32 %v3828_v63, %v855_v12  ;;  %v2929_v21 = vpop.f32.mrb[27].mxu0  ;;  %v3045_v22 = vpop.f32.mrb[27].mxu1 }
 0x12a   :  { %v3952_v23 = vmax.f32 %v536_v13, %v1014_v14  ;;  %v537_v24 = vmax.f32 %v378_v16, 0.0  ;;  %v1015_v25 = vmax.f32 %v856_v18, 0.0  ;;  %3167 = vmatmul.mubr.bf16.gmra.mrb[132].mxu0 %v3426_v9  ;;  %3283 = vmatmul.mubr.bf16.gmra.mrb[132].mxu1 %v3427_v10 }
 0x12b   :  { %3170 = vmatprep.mubr.msk.bf16.mxu0 %vm3463_vm0, %v3462_v0  ;;  %3286 = vmatprep.mubr.msk.bf16.mxu1 %vm3463_vm0, %v3462_v0 }
 0x12c   :  { %v3958_v26 = vmax.f32 %v537_v24, %v1015_v25  ;;  %v3432_v24 = vld [vmem:[%s4491_s2 + $0x58] sm:$0xff]  }
 0x12d   :  { %v382_v27 = vpop.f32.mrb[28].mxu0  ;;  %v860_v28 = vpop.f32.mrb[28].mxu1  ;;  %v3433_v25 = vld [vmem:[%s4492_s3 + $0x58] sm:$0xff]  }
 0x12e   :  { %v383_v29 = vadd.f32 %v3828_v63, %v382_v27  ;;  %v861_v30 = vadd.f32 %v3828_v63, %v860_v28  ;;  %v2932_v31 = vpop.f32.mrb[29].mxu0  ;;  %v3048_v32 = vpop.f32.mrb[29].mxu1 }
 0x12f   :  { %v385_v35 = vpop.f32.mrb[30].mxu0  ;;  %v863_v36 = vpop.f32.mrb[30].mxu1 }
 0x130   :  { %v538_v39 = vmax.f32 %v383_v29, 0.0  ;;  %v1016_v41 = vmax.f32 %v861_v30, 0.0  ;;  %v386_v43 = vadd.f32 %v3828_v63, %v385_v35  ;;  %v864_v44 = vadd.f32 %v3828_v63, %v863_v36  ;;  %v2933_v45 = vpop.f32.mrb[31].mxu0  ;;  %v3049_v46 = vpop.f32.mrb[31].mxu1 }
 0x132   :  { %v3970_v47 = vmax.f32 %v538_v39, %v1016_v41  ;;  %v539_v48 = vmax.f32 %v386_v43, 0.0  ;;  %v1017_v49 = vmax.f32 %v864_v44, 0.0  ;;  %3171 = vmatmul.mubr.bf16.gmra.mrb[136].mxu0 %v3428_v33  ;;  %3287 = vmatmul.mubr.bf16.gmra.mrb[136].mxu1 %v3429_v34 }
 0x133   :  { %3174 = vmatprep.mubr.msk.bf16.mxu0 %vm3463_vm0, %v3462_v0  ;;  %3290 = vmatprep.mubr.msk.bf16.mxu1 %vm3463_vm0, %v3462_v0 }
 0x134   :  { %v3976_v50 = vmax.f32 %v539_v48, %v1017_v49 }
 0x135   :  { %v390_v51 = vpop.f32.mrb[32].mxu0  ;;  %v868_v52 = vpop.f32.mrb[32].mxu1 }
 0x136   :  { %v391_v53 = vadd.f32 %v3828_v63, %v390_v51  ;;  %v869_v54 = vadd.f32 %v3828_v63, %v868_v52  ;;  %v2936_v55 = vpop.f32.mrb[33].mxu0  ;;  %v3052_v56 = vpop.f32.mrb[33].mxu1  ;;  %v3434_v51 = vld [vmem:[%s4491_s2 + $0x60] sm:$0xff]  }
 0x137   :  { %v393_v62 = vpop.f32.mrb[34].mxu0  ;;  %v871_v1 = vpop.f32.mrb[34].mxu1  ;;  %v3435_v52 = vld [vmem:[%s4492_s3 + $0x60] sm:$0xff]  }
 0x138   :  { %v540_v3 = vmax.f32 %v391_v53, 0.0  ;;  %v1018_v4 = vmax.f32 %v869_v54, 0.0  ;;  %v394_v5 = vadd.f32 %v3828_v63, %v393_v62  ;;  %v872_v6 = vadd.f32 %v3828_v63, %v871_v1  ;;  %v2937_v7 = vpop.f32.mrb[35].mxu0  ;;  %v3053_v8 = vpop.f32.mrb[35].mxu1 }
 0x13a   :  { %v3988_v9 = vmax.f32 %v540_v3, %v1018_v4  ;;  %v541_v10 = vmax.f32 %v394_v5, 0.0  ;;  %v1019_v11 = vmax.f32 %v872_v6, 0.0  ;;  %3175 = vmatmul.mubr.bf16.gmra.mrb[140].mxu0 %v3430_v58  ;;  %3291 = vmatmul.mubr.bf16.gmra.mrb[140].mxu1 %v3431_v59 }
 0x13b   :  { %3178 = vmatprep.mubr.msk.bf16.mxu0 %vm3463_vm0, %v3462_v0  ;;  %3294 = vmatprep.mubr.msk.bf16.mxu1 %vm3463_vm0, %v3462_v0 }
 0x13c   :  { %v3994_v12 = vmax.f32 %v541_v10, %v1019_v11 }
 0x13d   :  { %v398_v13 = vpop.f32.mrb[36].mxu0  ;;  %v876_v14 = vpop.f32.mrb[36].mxu1 }
 0x13e   :  { %v399_v16 = vadd.f32 %v3828_v63, %v398_v13  ;;  %v877_v18 = vadd.f32 %v3828_v63, %v876_v14  ;;  %v2940_v21 = vpop.f32.mrb[37].mxu0  ;;  %v3056_v22 = vpop.f32.mrb[37].mxu1 }
 0x13f   :  { %v401_v27 = vpop.f32.mrb[38].mxu0  ;;  %v879_v28 = vpop.f32.mrb[38].mxu1 }
 0x140   :  { %v542_v29 = vmax.f32 %v399_v16, 0.0  ;;  %v1020_v30 = vmax.f32 %v877_v18, 0.0  ;;  %v402_v31 = vadd.f32 %v3828_v63, %v401_v27  ;;  %v880_v32 = vadd.f32 %v3828_v63, %v879_v28  ;;  %v2941_v33 = vpop.f32.mrb[39].mxu0  ;;  %v3057_v34 = vpop.f32.mrb[39].mxu1  ;;  %v3436_v16 = vld [vmem:[%s4491_s2 + $0x68] sm:$0xff]  }
 0x141   :  { %v3437_v18 = vld [vmem:[%s4492_s3 + $0x68] sm:$0xff]  }
 0x142   :  { %v4006_v35 = vmax.f32 %v542_v29, %v1020_v30  ;;  %v543_v36 = vmax.f32 %v402_v31, 0.0  ;;  %v1021_v39 = vmax.f32 %v880_v32, 0.0  ;;  %3179 = vmatmul.mubr.bf16.gmra.mrb[144].mxu0 %v3432_v24  ;;  %3295 = vmatmul.mubr.bf16.gmra.mrb[144].mxu1 %v3433_v25 }
 0x143   :  { %3182 = vmatprep.mubr.msk.bf16.mxu0 %vm3463_vm0, %v3462_v0  ;;  %3298 = vmatprep.mubr.msk.bf16.mxu1 %vm3463_vm0, %v3462_v0 }
 0x144   :  { %v4012_v41 = vmax.f32 %v543_v36, %v1021_v39 }
 0x145   :  { %v406_v43 = vpop.f32.mrb[40].mxu0  ;;  %v884_v44 = vpop.f32.mrb[40].mxu1 }
 0x146   :  { %v407_v45 = vadd.f32 %v3828_v63, %v406_v43  ;;  %v885_v46 = vadd.f32 %v3828_v63, %v884_v44  ;;  %v2944_v48 = vpop.f32.mrb[41].mxu0  ;;  %v3060_v49 = vpop.f32.mrb[41].mxu1 }
 0x147   :  { %v409_v53 = vpop.f32.mrb[42].mxu0  ;;  %v887_v54 = vpop.f32.mrb[42].mxu1  ;;  %v3438_v48 = vld [vmem:[%s4491_s2 + $0x70] sm:$0xff]  }
 0x148   :  { %v544_v55 = vmax.f32 %v407_v45, 0.0  ;;  %v1022_v56 = vmax.f32 %v885_v46, 0.0  ;;  %v410_v58 = vadd.f32 %v3828_v63, %v409_v53  ;;  %v888_v59 = vadd.f32 %v3828_v63, %v887_v54  ;;  %v2945_v62 = vpop.f32.mrb[43].mxu0  ;;  %v3061_v1 = vpop.f32.mrb[43].mxu1  ;;  %v3439_v49 = vld [vmem:[%s4492_s3 + $0x70] sm:$0xff]  }
 0x14a   :  { %v4024_v3 = vmax.f32 %v544_v55, %v1022_v56  ;;  %v545_v4 = vmax.f32 %v410_v58, 0.0  ;;  %v1023_v5 = vmax.f32 %v888_v59, 0.0  ;;  %3183 = vmatmul.mubr.bf16.gmra.mrb[148].mxu0 %v3434_v51  ;;  %3299 = vmatmul.mubr.bf16.gmra.mrb[148].mxu1 %v3435_v52 }
 0x14b   :  { %3186 = vmatprep.mubr.msk.bf16.mxu0 %vm3463_vm0, %v3462_v0  ;;  %3302 = vmatprep.mubr.msk.bf16.mxu1 %vm3463_vm0, %v3462_v0 }
 0x14c   :  { %v4030_v6 = vmax.f32 %v545_v4, %v1023_v5 }
 0x14d   :  { %v414_v7 = vpop.f32.mrb[44].mxu0  ;;  %v892_v8 = vpop.f32.mrb[44].mxu1 }
 0x14e   :  { %v415_v10 = vadd.f32 %v3828_v63, %v414_v7  ;;  %v893_v11 = vadd.f32 %v3828_v63, %v892_v8  ;;  %v2948_v13 = vpop.f32.mrb[45].mxu0  ;;  %v3064_v14 = vpop.f32.mrb[45].mxu1 }
 0x14f   :  { %v417_v21 = vpop.f32.mrb[46].mxu0  ;;  %v895_v22 = vpop.f32.mrb[46].mxu1 }
 0x150   :  { %v546_v24 = vmax.f32 %v415_v10, 0.0  ;;  %v1024_v25 = vmax.f32 %v893_v11, 0.0  ;;  %v418_v27 = vadd.f32 %v3828_v63, %v417_v21  ;;  %v896_v28 = vadd.f32 %v3828_v63, %v895_v22  ;;  %v2949_v29 = vpop.f32.mrb[47].mxu0  ;;  %v3065_v30 = vpop.f32.mrb[47].mxu1 }
 0x152   :  { %v4042_v31 = vmax.f32 %v546_v24, %v1024_v25  ;;  %v547_v32 = vmax.f32 %v418_v27, 0.0  ;;  %v1025_v33 = vmax.f32 %v896_v28, 0.0  ;;  %3187 = vmatmul.mubr.bf16.gmra.mrb[152].mxu0 %v3436_v16  ;;  %3303 = vmatmul.mubr.bf16.gmra.mrb[152].mxu1 %v3437_v18  ;;  %v3440_v16 = vld [vmem:[%s4491_s2 + $0x78] sm:$0xff]  }
 0x153   :  { %3190 = vmatprep.mubr.msk.bf16.mxu0 %vm3463_vm0, %v3462_v0  ;;  %3306 = vmatprep.mubr.msk.bf16.mxu1 %vm3463_vm0, %v3462_v0  ;;  %v3441_v18 = vld [vmem:[%s4492_s3 + $0x78] sm:$0xff]  }
 0x154   :  { %v4048_v34 = vmax.f32 %v547_v32, %v1025_v33 }
 0x155   :  { %v422_v36 = vpop.f32.mrb[48].mxu0  ;;  %v900_v39 = vpop.f32.mrb[48].mxu1 }
 0x156   :  { %v423_v43 = vadd.f32 %v3828_v63, %v422_v36  ;;  %v901_v44 = vadd.f32 %v3828_v63, %v900_v39  ;;  %v2952_v45 = vpop.f32.mrb[49].mxu0  ;;  %v3068_v46 = vpop.f32.mrb[49].mxu1 }
 0x157   :  { %v425_v51 = vpop.f32.mrb[50].mxu0  ;;  %v903_v52 = vpop.f32.mrb[50].mxu1 }
 0x158   :  { %v548_v53 = vmax.f32 %v423_v43, 0.0  ;;  %v1026_v54 = vmax.f32 %v901_v44, 0.0  ;;  %v426_v55 = vadd.f32 %v3828_v63, %v425_v51  ;;  %v904_v56 = vadd.f32 %v3828_v63, %v903_v52  ;;  %v2953_v58 = vpop.f32.mrb[51].mxu0  ;;  %v3069_v59 = vpop.f32.mrb[51].mxu1  ;;  %v3442_v51 = vld [vmem:[%s4491_s2 + $0x80] sm:$0xff]  }
 0x159   :  { %v3443_v52 = vld [vmem:[%s4492_s3 + $0x80] sm:$0xff]  }
 0x15a   :  { %v4060_v62 = vmax.f32 %v548_v53, %v1026_v54  ;;  %v549_v1 = vmax.f32 %v426_v55, 0.0  ;;  %v1027_v4 = vmax.f32 %v904_v56, 0.0  ;;  %3191 = vmatmul.mubr.bf16.gmra.mrb[156].mxu0 %v3438_v48  ;;  %3307 = vmatmul.mubr.bf16.gmra.mrb[156].mxu1 %v3439_v49 }
 0x15b   :  { %3194 = vmatprep.mubr.msk.bf16.mxu0 %vm3463_vm0, %v3462_v0  ;;  %3310 = vmatprep.mubr.msk.bf16.mxu1 %vm3463_vm0, %v3462_v0 }
 0x15c   :  { %v4066_v5 = vmax.f32 %v549_v1, %v1027_v4 }
 0x15d   :  { %v430_v7 = vpop.f32.mrb[52].mxu0  ;;  %v908_v8 = vpop.f32.mrb[52].mxu1 }
 0x15e   :  { %v431_v10 = vadd.f32 %v3828_v63, %v430_v7  ;;  %v909_v11 = vadd.f32 %v3828_v63, %v908_v8  ;;  %v2956_v13 = vpop.f32.mrb[53].mxu0  ;;  %v3072_v14 = vpop.f32.mrb[53].mxu1 }
 0x15f   :  { %v433_v21 = vpop.f32.mrb[54].mxu0  ;;  %v911_v22 = vpop.f32.mrb[54].mxu1 }
 0x160   :  { %v550_v24 = vmax.f32 %v431_v10, 0.0  ;;  %v1028_v25 = vmax.f32 %v909_v11, 0.0  ;;  %v434_v27 = vadd.f32 %v3828_v63, %v433_v21  ;;  %v912_v28 = vadd.f32 %v3828_v63, %v911_v22  ;;  %v2957_v29 = vpop.f32.mrb[55].mxu0  ;;  %v3073_v30 = vpop.f32.mrb[55].mxu1 }
 0x162   :  { %v4078_v32 = vmax.f32 %v550_v24, %v1028_v25  ;;  %v551_v33 = vmax.f32 %v434_v27, 0.0  ;;  %v1029_v36 = vmax.f32 %v912_v28, 0.0  ;;  %3195 = vmatmul.mubr.bf16.gmra.mrb[160].mxu0 %v3440_v16  ;;  %3311 = vmatmul.mubr.bf16.gmra.mrb[160].mxu1 %v3441_v18  ;;  %v3444_v24 = vld [vmem:[%s4491_s2 + $0x88] sm:$0xff]  }
 0x163   :  { %3198 = vmatprep.mubr.msk.bf16.mxu0 %vm3463_vm0, %v3462_v0  ;;  %3314 = vmatprep.mubr.msk.bf16.mxu1 %vm3463_vm0, %v3462_v0  ;;  %v3445_v25 = vld [vmem:[%s4492_s3 + $0x88] sm:$0xff]  }
 0x164   :  { %v4084_v39 = vmax.f32 %v551_v33, %v1029_v36 }
 0x165   :  { %v438_v43 = vpop.f32.mrb[56].mxu0  ;;  %v916_v44 = vpop.f32.mrb[56].mxu1 }
 0x166   :  { %v439_v45 = vadd.f32 %v3828_v63, %v438_v43  ;;  %v917_v46 = vadd.f32 %v3828_v63, %v916_v44  ;;  %v2960_v48 = vpop.f32.mrb[57].mxu0  ;;  %v3076_v49 = vpop.f32.mrb[57].mxu1 }
 0x167   :  { %v441_v53 = vpop.f32.mrb[58].mxu0  ;;  %v919_v54 = vpop.f32.mrb[58].mxu1 }
 0x168   :  { %v552_v55 = vmax.f32 %v439_v45, 0.0  ;;  %v1030_v56 = vmax.f32 %v917_v46, 0.0  ;;  %v442_v58 = vadd.f32 %v3828_v63, %v441_v53  ;;  %v920_v59 = vadd.f32 %v3828_v63, %v919_v54  ;;  %v2961_v1 = vpop.f32.mrb[59].mxu0  ;;  %v3077_v4 = vpop.f32.mrb[59].mxu1 }
 0x16a   :  { %v4096_v7 = vmax.f32 %v552_v55, %v1030_v56  ;;  %v553_v8 = vmax.f32 %v442_v58, 0.0  ;;  %v1031_v10 = vmax.f32 %v920_v59, 0.0  ;;  %3199 = vmatmul.mubr.bf16.gmra.mrb[164].mxu0 %v3442_v51  ;;  %3315 = vmatmul.mubr.bf16.gmra.mrb[164].mxu1 %v3443_v52  ;;  %v3446_v58 = vld [vmem:[%s4491_s2 + $0x90] sm:$0xff]  }
 0x16b   :  { %3202 = vmatprep.mubr.msk.bf16.mxu0 %vm3463_vm0, %v3462_v0  ;;  %3318 = vmatprep.mubr.msk.bf16.mxu1 %vm3463_vm0, %v3462_v0  ;;  %v3447_v59 = vld [vmem:[%s4492_s3 + $0x90] sm:$0xff]  }
 0x16c   :  { %v4102_v11 = vmax.f32 %v553_v8, %v1031_v10 }
 0x16d   :  { %v446_v13 = vpop.f32.mrb[60].mxu0  ;;  %v924_v14 = vpop.f32.mrb[60].mxu1 }
 0x16e   :  { %v447_v16 = vadd.f32 %v3828_v63, %v446_v13  ;;  %v925_v18 = vadd.f32 %v3828_v63, %v924_v14  ;;  %v2964_v21 = vpop.f32.mrb[61].mxu0  ;;  %v3080_v22 = vpop.f32.mrb[61].mxu1 }
 0x16f   :  { %v449_v27 = vpop.f32.mrb[62].mxu0  ;;  %v927_v28 = vpop.f32.mrb[62].mxu1 }
 0x170   :  { %v554_v29 = vmax.f32 %v447_v16, 0.0  ;;  %v1032_v30 = vmax.f32 %v925_v18, 0.0  ;;  %v450_v33 = vadd.f32 %v3828_v63, %v449_v27  ;;  %v928_v36 = vadd.f32 %v3828_v63, %v927_v28  ;;  %v2965_v43 = vpop.f32.mrb[63].mxu0  ;;  %v3081_v44 = vpop.f32.mrb[63].mxu1 }
 0x171   :  { %v3448_v43 = vld [vmem:[%s4491_s2 + $0x98] sm:$0xff]  }
 0x172   :  { %v4114_v45 = vmax.f32 %v554_v29, %v1032_v30  ;;  %v555_v46 = vmax.f32 %v450_v33, 0.0  ;;  %v1033_v48 = vmax.f32 %v928_v36, 0.0  ;;  %3203 = vmatmul.mubr.bf16.gmra.mrb[168].mxu0 %v3444_v24  ;;  %3319 = vmatmul.mubr.bf16.gmra.mrb[168].mxu1 %v3445_v25  ;;  %v3449_v44 = vld [vmem:[%s4492_s3 + $0x98] sm:$0xff]  }
 0x173   :  { %3206 = vmatprep.mubr.msk.bf16.mxu0 %vm3463_vm0, %v3462_v0  ;;  %3322 = vmatprep.mubr.msk.bf16.mxu1 %vm3463_vm0, %v3462_v0 }
 0x174   :  { %v4120_v49 = vmax.f32 %v555_v46, %v1033_v48 }
 0x175   :  { %v454_v51 = vpop.f32.mrb[64].mxu0  ;;  %v932_v52 = vpop.f32.mrb[64].mxu1 }
 0x176   :  { %v455_v53 = vadd.f32 %v3828_v63, %v454_v51  ;;  %v933_v54 = vadd.f32 %v3828_v63, %v932_v52  ;;  %v2968_v55 = vpop.f32.mrb[65].mxu0  ;;  %v3084_v56 = vpop.f32.mrb[65].mxu1 }
 0x177   :  { %v457_v1 = vpop.f32.mrb[66].mxu0  ;;  %v935_v4 = vpop.f32.mrb[66].mxu1 }
 0x178   :  { %v556_v8 = vmax.f32 %v455_v53, 0.0  ;;  %v1034_v10 = vmax.f32 %v933_v54, 0.0  ;;  %v458_v13 = vadd.f32 %v3828_v63, %v457_v1  ;;  %v936_v14 = vadd.f32 %v3828_v63, %v935_v4  ;;  %v2969_v16 = vpop.f32.mrb[67].mxu0  ;;  %v3085_v18 = vpop.f32.mrb[67].mxu1 }
 0x17a   :  { %v4132_v21 = vmax.f32 %v556_v8, %v1034_v10  ;;  %v557_v22 = vmax.f32 %v458_v13, 0.0  ;;  %v1035_v24 = vmax.f32 %v936_v14, 0.0  ;;  %3207 = vmatmul.mubr.bf16.gmra.mrb[172].mxu0 %v3446_v58  ;;  %3323 = vmatmul.mubr.bf16.gmra.mrb[172].mxu1 %v3447_v59 }
 0x17b   :  { %3210 = vmatprep.mubr.msk.bf16.mxu0 %vm3463_vm0, %v3462_v0  ;;  %3326 = vmatprep.mubr.msk.bf16.mxu1 %vm3463_vm0, %v3462_v0 }
 0x17c   :  { %v4138_v25 = vmax.f32 %v557_v22, %v1035_v24  ;;  %v3450_v22 = vld [vmem:[%s4491_s2 + $0xa0] sm:$0xff]  }
 0x17d   :  { %v462_v27 = vpop.f32.mrb[68].mxu0  ;;  %v940_v28 = vpop.f32.mrb[68].mxu1  ;;  %v3451_v24 = vld [vmem:[%s4492_s3 + $0xa0] sm:$0xff]  }
 0x17e   :  { %v463_v29 = vadd.f32 %v3828_v63, %v462_v27  ;;  %v941_v30 = vadd.f32 %v3828_v63, %v940_v28  ;;  %v2972_v33 = vpop.f32.mrb[69].mxu0  ;;  %v3088_v36 = vpop.f32.mrb[69].mxu1 }
 0x17f   :  { %v465_v46 = vpop.f32.mrb[70].mxu0  ;;  %v943_v48 = vpop.f32.mrb[70].mxu1 }
 0x180   :  { %v558_v51 = vmax.f32 %v463_v29, 0.0  ;;  %v1036_v52 = vmax.f32 %v941_v30, 0.0  ;;  %v466_v53 = vadd.f32 %v3828_v63, %v465_v46  ;;  %v944_v54 = vadd.f32 %v3828_v63, %v943_v48  ;;  %v2973_v55 = vpop.f32.mrb[71].mxu0  ;;  %v3089_v56 = vpop.f32.mrb[71].mxu1 }
 0x182   :  { %v4150_v58 = vmax.f32 %v558_v51, %v1036_v52  ;;  %v559_v59 = vmax.f32 %v466_v53, 0.0  ;;  %v1037_v1 = vmax.f32 %v944_v54, 0.0  ;;  %3211 = vmatmul.mubr.bf16.gmra.mrb[176].mxu0 %v3448_v43  ;;  %3327 = vmatmul.mubr.bf16.gmra.mrb[176].mxu1 %v3449_v44 }
 0x183   :  { %3214 = vmatprep.mubr.msk.bf16.mxu0 %vm3463_vm0, %v3462_v0  ;;  %3330 = vmatprep.mubr.msk.bf16.mxu1 %vm3463_vm0, %v3462_v0 }
 0x184   :  { %v4156_v4 = vmax.f32 %v559_v59, %v1037_v1 }
 0x185   :  { %v470_v8 = vpop.f32.mrb[72].mxu0  ;;  %v948_v10 = vpop.f32.mrb[72].mxu1 }
 0x186   :  { %v471_v13 = vadd.f32 %v3828_v63, %v470_v8  ;;  %v949_v14 = vadd.f32 %v3828_v63, %v948_v10  ;;  %v2976_v16 = vpop.f32.mrb[73].mxu0  ;;  %v3092_v18 = vpop.f32.mrb[73].mxu1  ;;  %v3452_v8 = vld [vmem:[%s4491_s2 + $0xa8] sm:$0xff]  }
 0x187   :  { %v473_v27 = vpop.f32.mrb[74].mxu0  ;;  %v951_v28 = vpop.f32.mrb[74].mxu1  ;;  %v3453_v10 = vld [vmem:[%s4492_s3 + $0xa8] sm:$0xff]  }
 0x188   :  { %v560_v29 = vmax.f32 %v471_v13, 0.0  ;;  %v1038_v30 = vmax.f32 %v949_v14, 0.0  ;;  %v474_v33 = vadd.f32 %v3828_v63, %v473_v27  ;;  %v952_v36 = vadd.f32 %v3828_v63, %v951_v28  ;;  %v2977_v43 = vpop.f32.mrb[75].mxu0  ;;  %v3093_v44 = vpop.f32.mrb[75].mxu1 }
 0x18a   :  { %v4168_v46 = vmax.f32 %v560_v29, %v1038_v30  ;;  %v561_v48 = vmax.f32 %v474_v33, 0.0  ;;  %v1039_v51 = vmax.f32 %v952_v36, 0.0  ;;  %3215 = vmatmul.mubr.bf16.gmra.mrb[180].mxu0 %v3450_v22  ;;  %3331 = vmatmul.mubr.bf16.gmra.mrb[180].mxu1 %v3451_v24 }
 0x18b   :  { %3218 = vmatprep.mubr.msk.bf16.mxu0 %vm3463_vm0, %v3462_v0  ;;  %3334 = vmatprep.mubr.msk.bf16.mxu1 %vm3463_vm0, %v3462_v0 }
 0x18c   :  { %v4174_v52 = vmax.f32 %v561_v48, %v1039_v51 }
 0x18d   :  { %v478_v53 = vpop.f32.mrb[76].mxu0  ;;  %v956_v54 = vpop.f32.mrb[76].mxu1 }
 0x18e   :  { %v479_v55 = vadd.f32 %v3828_v63, %v478_v53  ;;  %v957_v56 = vadd.f32 %v3828_v63, %v956_v54  ;;  %v2980_v59 = vpop.f32.mrb[77].mxu0  ;;  %v3096_v1 = vpop.f32.mrb[77].mxu1 }
 0x18f   :  { %v481_v13 = vpop.f32.mrb[78].mxu0  ;;  %v959_v14 = vpop.f32.mrb[78].mxu1 }
 0x190   :  { %v562_v16 = vmax.f32 %v479_v55, 0.0  ;;  %v1040_v18 = vmax.f32 %v957_v56, 0.0  ;;  %v482_v22 = vadd.f32 %v3828_v63, %v481_v13  ;;  %v960_v24 = vadd.f32 %v3828_v63, %v959_v14  ;;  %v2981_v27 = vpop.f32.mrb[79].mxu0  ;;  %v3097_v28 = vpop.f32.mrb[79].mxu1  ;;  %v3454_v55 = vld [vmem:[%s4491_s2 + $0xb0] sm:$0xff]  }
 0x191   :  { %v3455_v56 = vld [vmem:[%s4492_s3 + $0xb0] sm:$0xff]  }
 0x192   :  { %v4186_v29 = vmax.f32 %v562_v16, %v1040_v18  ;;  %v563_v30 = vmax.f32 %v482_v22, 0.0  ;;  %v1041_v33 = vmax.f32 %v960_v24, 0.0  ;;  %3219 = vmatmul.mubr.bf16.gmra.mrb[184].mxu0 %v3452_v8  ;;  %3335 = vmatmul.mubr.bf16.gmra.mrb[184].mxu1 %v3453_v10 }
 0x193   :  { %3222 = vmatprep.mubr.msk.bf16.mxu0 %vm3463_vm0, %v3462_v0  ;;  %3338 = vmatprep.mubr.msk.bf16.mxu1 %vm3463_vm0, %v3462_v0 }
 0x194   :  { %v4192_v36 = vmax.f32 %v563_v30, %v1041_v33 }
 0x195   :  { %v486_v43 = vpop.f32.mrb[80].mxu0  ;;  %v964_v44 = vpop.f32.mrb[80].mxu1 }
 0x196   :  { %v487_v48 = vadd.f32 %v3828_v63, %v486_v43  ;;  %v965_v51 = vadd.f32 %v3828_v63, %v964_v44  ;;  %v2984_v53 = vpop.f32.mrb[81].mxu0  ;;  %v3100_v54 = vpop.f32.mrb[81].mxu1 }
 0x197   :  { %v489_v59 = vpop.f32.mrb[82].mxu0  ;;  %v967_v1 = vpop.f32.mrb[82].mxu1  ;;  %v3456_v53 = vld [vmem:[%s4491_s2 + $0xb8] sm:$0xff]  }
 0x198   :  { %v564_v8 = vmax.f32 %v487_v48, 0.0  ;;  %v1042_v10 = vmax.f32 %v965_v51, 0.0  ;;  %v490_v13 = vadd.f32 %v3828_v63, %v489_v59  ;;  %v968_v14 = vadd.f32 %v3828_v63, %v967_v1  ;;  %v2985_v16 = vpop.f32.mrb[83].mxu0  ;;  %v3101_v18 = vpop.f32.mrb[83].mxu1  ;;  %v3457_v54 = vld [vmem:[%s4492_s3 + $0xb8] sm:$0xff]  }
 0x19a   :  { %v4204_v22 = vmax.f32 %v564_v8, %v1042_v10  ;;  %v565_v24 = vmax.f32 %v490_v13, 0.0  ;;  %v1043_v27 = vmax.f32 %v968_v14, 0.0  ;;  %3223 = vmatmul.mubr.bf16.gmra.mrb[188].mxu0 %v3454_v55  ;;  %3339 = vmatmul.mubr.bf16.gmra.mrb[188].mxu1 %v3455_v56  ;;  %v4223_v8 = vld [vmem:[%s4493_s5] ss:$0 sm:$0xff] }
 0x19b   :  { %3226 = vmatprep.mubr.msk.bf16.mxu0 %vm3463_vm0, %v3462_v0  ;;  %3342 = vmatprep.mubr.msk.bf16.mxu1 %vm3463_vm0, %v3462_v0 }
 0x19c   :  { %v4210_v28 = vmax.f32 %v565_v24, %v1043_v27 }
 0x19d   :  { %v494_v30 = vpop.f32.mrb[84].mxu0  ;;  %v972_v33 = vpop.f32.mrb[84].mxu1 }
 0x19e   :  { %v495_v43 = vadd.f32 %v3828_v63, %v494_v30  ;;  %v973_v44 = vadd.f32 %v3828_v63, %v972_v33  ;;  %v2988_v48 = vpop.f32.mrb[85].mxu0  ;;  %v3104_v51 = vpop.f32.mrb[85].mxu1 }
 0x19f   :  { %v497_v55 = vpop.f32.mrb[86].mxu0  ;;  %v975_v56 = vpop.f32.mrb[86].mxu1 }
 0x1a0   :  { %v566_v59 = vmax.f32 %v495_v43, 0.0  ;;  %v1044_v1 = vmax.f32 %v973_v44, 0.0  ;;  %v498_v63 = vadd.f32 %v4223_v8, %v497_v55  ;;  %v976_v10 = vadd.f32 %v4223_v8, %v975_v56  ;;  %v2989_v13 = vpop.f32.mrb[87].mxu0  ;;  %v3105_v14 = vpop.f32.mrb[87].mxu1 }
 0x1a2   :  { %v4227_v16 = vmax.f32 %v566_v59, %v1044_v1  ;;  %v567_v18 = vmax.f32 %v498_v63, 0.0  ;;  %v1045_v24 = vmax.f32 %v976_v10, 0.0  ;;  %3227 = vmatmul.mubr.bf16.gmra.mrb[192].mxu0 %v3456_v53  ;;  %3343 = vmatmul.mubr.bf16.gmra.mrb[192].mxu1 %v3457_v54  ;;  %v3458_v53 = vld [vmem:[%s4491_s2 + $0xc0] ss:$0 sps:$4 sm:$0xff]  }
 0x1a3   :  { %3230 = vmatprep.mubr.msk.bf16.mxu0 %vm3463_vm0, %v3462_v0  ;;  %3346 = vmatprep.mubr.msk.bf16.mxu1 %vm3463_vm0, %v3462_v0  ;;  %v3459_v54 = vld [vmem:[%s4492_s3 + $0xc0] ss:$0 sps:$4 sm:$0xff]  }
 0x1a4   :  { %v4233_v27 = vmax.f32 %v567_v18, %v1045_v24 }
 0x1a5   :  { %v502_v30 = vpop.f32.mrb[88].mxu0  ;;  %v980_v33 = vpop.f32.mrb[88].mxu1 }
 0x1a6   :  { %4495 = vst [vmem:[#allocation2_spill] sm:$0xff] %v4233_v27  ;;  %v503_v43 = vadd.f32 %v4223_v8, %v502_v30  ;;  %v981_v44 = vadd.f32 %v4223_v8, %v980_v33  ;;  %v2992_v48 = vpop.f32.mrb[89].mxu0  ;;  %v3108_v51 = vpop.f32.mrb[89].mxu1 }
 0x1a7   :  { %v505_v55 = vpop.f32.mrb[90].mxu0  ;;  %v983_v0 = vpop.f32.mrb[90].mxu1 }
 0x1a8   :  { %v568_v56 = vmax.f32 %v503_v43, 0.0  ;;  %v1046_v59 = vmax.f32 %v981_v44, 0.0  ;;  %v506_v1 = vadd.f32 %v4223_v8, %v505_v55  ;;  %v984_v63 = vadd.f32 %v4223_v8, %v983_v0  ;;  %v2993_v10 = vpop.f32.mrb[91].mxu0  ;;  %v3109_v13 = vpop.f32.mrb[91].mxu1 }
 0x1aa   :  { %v4245_v14 = vmax.f32 %v568_v56, %v1046_v59  ;;  %v569_v18 = vmax.f32 %v506_v1, 0.0  ;;  %v1047_v24 = vmax.f32 %v984_v63, 0.0  ;;  %3231 = vmatmul.mubr.bf16.gmra.mrb[196].mxu0 %v3458_v53  ;;  %3347 = vmatmul.mubr.bf16.gmra.mrb[196].mxu1 %v3459_v54 }
 0x1ac   :  { %4496 = vst [vmem:[#allocation3_spill] sm:$0xff] %v4245_v14  ;;  %v4247_v30 = vmax.f32 %v569_v18, %v1047_v24 }
 0x1ad   :  { %v510_v33 = vpop.f32.mrb[92].mxu0  ;;  %v988_v48 = vpop.f32.mrb[92].mxu1 }
 0x1ae   :  { %4497 = vst [vmem:[#allocation4_spill] sm:$0xff] %v4247_v30  ;;  %v511_v51 = vadd.f32 %v4223_v8, %v510_v33  ;;  %v989_v43 = vadd.f32 %v4223_v8, %v988_v48  ;;  %v2996_v44 = vpop.f32.mrb[93].mxu0  ;;  %v3112_v55 = vpop.f32.mrb[93].mxu1 }
 0x1af   :  { %v513_v27 = vpop.f32.mrb[94].mxu0  ;;  %v991_v0 = vpop.f32.mrb[94].mxu1 }
 0x1b0   :  { %v570_v10 = vmax.f32 %v511_v51, 0.0  ;;  %v1048_v13 = vmax.f32 %v989_v43, 0.0  ;;  %v514_v56 = vadd.f32 %v4223_v8, %v513_v27  ;;  %v992_v59 = vadd.f32 %v4223_v8, %v991_v0  ;;  %v2997_v53 = vpop.f32.mrb[95].mxu0  ;;  %v3113_v54 = vpop.f32.mrb[95].mxu1 }
 0x1b2   :  { %v4253_v1 = vmax.f32 %v570_v10, %v1048_v13  ;;  %v571_v63 = vmax.f32 %v514_v56, 0.0  ;;  %v1049_v18 = vmax.f32 %v992_v59, 0.0 }
 0x1b4   :  { %4498 = vst [vmem:[#allocation5_spill] sm:$0xff] %v4253_v1  ;;  %v4255_v24 = vmax.f32 %v571_v63, %v1049_v18 }
 0x1b5   :  { %v518_v33 = vpop.f32.mrb[96].mxu0  ;;  %v996_v48 = vpop.f32.mrb[96].mxu1 }
 0x1b6   :  { %4499 = vst [vmem:[#allocation6_spill] sm:$0xff] %v4255_v24  ;;  %v519_v44 = vadd.f32 %v4223_v8, %v518_v33  ;;  %v997_v55 = vadd.f32 %v4223_v8, %v996_v48  ;;  %v3000_v51 = vpop.f32.mrb[97].mxu0  ;;  %v3116_v43 = vpop.f32.mrb[97].mxu1 }
 0x1b7   :  { %v521_v30 = vpop.f32.mrb[98].mxu0  ;;  %v999_v27 = vpop.f32.mrb[98].mxu1 }
 0x1b8   :  { %v572_v14 = vmax.f32 %v519_v44, 0.0  ;;  %v1050_v0 = vmax.f32 %v997_v55, 0.0  ;;  %v3001_v53 = vpop.f32.mrb[99].mxu0  ;;  %v3117_v54 = vpop.f32.mrb[99].mxu1 }
 0x1ba   :  { %v4259_v10 = vmax.f32 %v572_v14, %v1050_v0 }
 0x1bc   :  { %4500 = vst [vmem:[#allocation7_spill] sm:$0xff] %v4259_v10 }
 0x1bd   :  { %v1331_v13 = vpop.f32.mrb[100].mxu0  ;;  %v1809_v56 = vpop.f32.mrb[100].mxu1 }
 0x1be   :  { %v1332_v59 = vadd.f32 %v4223_v8, %v1331_v13  ;;  %v1810_v63 = vadd.f32 %v4223_v8, %v1809_v56  ;;  %v3136_v18 = vpop.f32.mrb[101].mxu0  ;;  %v3252_v33 = vpop.f32.mrb[101].mxu1 }
 0x1bf   :  { %v1334_v24 = vpop.f32.mrb[102].mxu0  ;;  %v1812_v48 = vpop.f32.mrb[102].mxu1 }
 0x1c0   :  { %v1529_v51 = vmax.f32 %v1332_v59, 0.0  ;;  %v2007_v43 = vmax.f32 %v1810_v63, 0.0  ;;  %v1335_v30 = vadd.f32 %v4223_v8, %v1334_v24  ;;  %v1813_v44 = vadd.f32 %v4223_v8, %v1812_v48  ;;  %v3137_v55 = vpop.f32.mrb[103].mxu0  ;;  %v3253_v27 = vpop.f32.mrb[103].mxu1 }
 0x1c2   :  { %v2056_v14 = vmax.f32 %v1529_v51, %v2007_v43  ;;  %v1530_v0 = vmax.f32 %v1335_v30, 0.0  ;;  %v2008_v53 = vmax.f32 %v1813_v44, 0.0 }
 0x1c4   :  { %v2105_v54 = vmax.f32 %v3844_v17, %v2056_v14  ;;  %v2057_v13 = vmax.f32 %v1530_v0, %v2008_v53 }
 0x1c5   :  { %v1339_v10 = vpop.f32.mrb[104].mxu0  ;;  %v1817_v56 = vpop.f32.mrb[104].mxu1 }
 0x1c6   :  { %v2106_v18 = vmax.f32 %v3850_v20, %v2057_v13  ;;  %v1340_v33 = vadd.f32 %v4223_v8, %v1339_v10  ;;  %v1818_v59 = vadd.f32 %v4223_v8, %v1817_v56  ;;  %v3140_v63 = vpop.f32.mrb[105].mxu0  ;;  %v3256_v24 = vpop.f32.mrb[105].mxu1 }
 0x1c7   :  { %v1342_v1 = vpop.f32.mrb[106].mxu0  ;;  %v1820_v48 = vpop.f32.mrb[106].mxu1 }
 0x1c8   :  { %v2614_v55 = vpack.c.bf16 %v2106_v18, %v2105_v54  ;;  %v1531_v27 = vmax.f32 %v1340_v33, 0.0  ;;  %v2009_v51 = vmax.f32 %v1818_v59, 0.0  ;;  %v1343_v43 = vadd.f32 %v4223_v8, %v1342_v1  ;;  %v3141_v30 = vpop.f32.mrb[107].mxu0  ;;  %v3257_v17 = vpop.f32.mrb[107].mxu1 }
 0x1c9   :  { %v1821_v44 = vadd.f32 %v4223_v8, %v1820_v48 }
 0x1ca   :  { %2615 = vst [vmem:[%s4494_s6] sm:$0xff] %v2614_v55   ;;  %v2058_v20 = vmax.f32 %v1531_v27, %v2009_v51  ;;  %v1532_v10 = vmax.f32 %v1343_v43, 0.0 }
 0x1cb   :  { %v2010_v14 = vmax.f32 %v1821_v44, 0.0 }
 0x1cc   :  { %v2107_v0 = vmax.f32 %v3862_v37, %v2058_v20 }
 0x1cd   :  { %v2059_v53 = vmax.f32 %v1532_v10, %v2010_v14  ;;  %v1347_v13 = vpop.f32.mrb[108].mxu0  ;;  %v1825_v54 = vpop.f32.mrb[108].mxu1 }
 0x1ce   :  { %v1348_v56 = vadd.f32 %v4223_v8, %v1347_v13  ;;  %v1826_v1 = vadd.f32 %v4223_v8, %v1825_v54  ;;  %v3144_v18 = vpop.f32.mrb[109].mxu0  ;;  %v3260_v33 = vpop.f32.mrb[109].mxu1 }
 0x1cf   :  { %v2108_v59 = vmax.f32 %v3868_v40, %v2059_v53  ;;  %v1350_v63 = vpop.f32.mrb[110].mxu0  ;;  %v1828_v24 = vpop.f32.mrb[110].mxu1 }
 0x1d0   :  { %v1533_v48 = vmax.f32 %v1348_v56, 0.0  ;;  %v2011_v55 = vmax.f32 %v1826_v1, 0.0  ;;  %v1351_v27 = vadd.f32 %v4223_v8, %v1350_v63  ;;  %v1829_v51 = vadd.f32 %v4223_v8, %v1828_v24  ;;  %v3145_v37 = vpop.f32.mrb[111].mxu0  ;;  %v3261_v43 = vpop.f32.mrb[111].mxu1 }
 0x1d1   :  { %v2619_v30 = vpack.c.bf16 %v2108_v59, %v2107_v0 }
 0x1d2   :  { %v2060_v17 = vmax.f32 %v1533_v48, %v2011_v55  ;;  %v1534_v44 = vmax.f32 %v1351_v27, 0.0  ;;  %v2012_v20 = vmax.f32 %v1829_v51, 0.0 }
 0x1d3   :  { %2731 = vst [vmem:[%s4494_s6 + $0x8] sm:$0xff] %v2619_v30  }
 0x1d4   :  { %v2109_v40 = vmax.f32 %v3880_v57, %v2060_v17  ;;  %v2061_v10 = vmax.f32 %v1534_v44, %v2012_v20 }
 0x1d5   :  { %v1355_v14 = vpop.f32.mrb[112].mxu0  ;;  %v1833_v53 = vpop.f32.mrb[112].mxu1 }
 0x1d6   :  { %v2110_v13 = vmax.f32 %v3886_v60, %v2061_v10  ;;  %v1356_v54 = vadd.f32 %v4223_v8, %v1355_v14  ;;  %v1834_v56 = vadd.f32 %v4223_v8, %v1833_v53  ;;  %v3148_v1 = vpop.f32.mrb[113].mxu0  ;;  %v3264_v0 = vpop.f32.mrb[113].mxu1 }
 0x1d7   :  { %v1358_v18 = vpop.f32.mrb[114].mxu0  ;;  %v1836_v33 = vpop.f32.mrb[114].mxu1 }
 0x1d8   :  { %v2624_v59 = vpack.c.bf16 %v2110_v13, %v2109_v40  ;;  %v1535_v63 = vmax.f32 %v1356_v54, 0.0  ;;  %v2013_v24 = vmax.f32 %v1834_v56, 0.0  ;;  %v1359_v48 = vadd.f32 %v4223_v8, %v1358_v18  ;;  %v3149_v55 = vpop.f32.mrb[115].mxu0  ;;  %v3265_v57 = vpop.f32.mrb[115].mxu1 }
 0x1d9   :  { %v1837_v27 = vadd.f32 %v4223_v8, %v1836_v33 }
 0x1da   :  { %2732 = vst [vmem:[%s4494_s6 + $0x10] sm:$0xff] %v2624_v59   ;;  %v2062_v60 = vmax.f32 %v1535_v63, %v2013_v24  ;;  %v1536_v51 = vmax.f32 %v1359_v48, 0.0 }
 0x1db   :  { %v2014_v37 = vmax.f32 %v1837_v27, 0.0 }
 0x1dc   :  { %v2111_v43 = vmax.f32 %v3898_v15, %v2062_v60 }
 0x1dd   :  { %v2063_v30 = vmax.f32 %v1536_v51, %v2014_v37  ;;  %v1363_v17 = vpop.f32.mrb[116].mxu0  ;;  %v1841_v44 = vpop.f32.mrb[116].mxu1 }
 0x1de   :  { %v1364_v20 = vadd.f32 %v4223_v8, %v1363_v17  ;;  %v1842_v40 = vadd.f32 %v4223_v8, %v1841_v44  ;;  %v3152_v10 = vpop.f32.mrb[117].mxu0  ;;  %v3268_v14 = vpop.f32.mrb[117].mxu1 }
 0x1df   :  { %v2112_v53 = vmax.f32 %v3904_v19, %v2063_v30  ;;  %v1366_v13 = vpop.f32.mrb[118].mxu0  ;;  %v1844_v54 = vpop.f32.mrb[118].mxu1 }
 0x1e0   :  { %v1537_v56 = vmax.f32 %v1364_v20, 0.0  ;;  %v2015_v1 = vmax.f32 %v1842_v40, 0.0  ;;  %v1367_v0 = vadd.f32 %v4223_v8, %v1366_v13  ;;  %v1845_v18 = vadd.f32 %v4223_v8, %v1844_v54  ;;  %v3153_v15 = vpop.f32.mrb[119].mxu0  ;;  %v3269_v33 = vpop.f32.mrb[119].mxu1 }
 0x1e1   :  { %v2629_v59 = vpack.c.bf16 %v2112_v53, %v2111_v43 }
 0x1e2   :  { %v2064_v63 = vmax.f32 %v1537_v56, %v2015_v1  ;;  %v1538_v24 = vmax.f32 %v1367_v0, 0.0  ;;  %v2016_v48 = vmax.f32 %v1845_v18, 0.0 }
 0x1e3   :  { %2733 = vst [vmem:[%s4494_s6 + $0x18] sm:$0xff] %v2629_v59  }
 0x1e4   :  { %v2113_v19 = vmax.f32 %v3916_v38, %v2064_v63  ;;  %v2065_v55 = vmax.f32 %v1538_v24, %v2016_v48 }
 0x1e5   :  { %v1371_v57 = vpop.f32.mrb[120].mxu0  ;;  %v1849_v27 = vpop.f32.mrb[120].mxu1 }
 0x1e6   :  { %v2114_v60 = vmax.f32 %v3922_v42, %v2065_v55  ;;  %v1372_v51 = vadd.f32 %v4223_v8, %v1371_v57  ;;  %v1850_v37 = vadd.f32 %v4223_v8, %v1849_v27  ;;  %v3156_v30 = vpop.f32.mrb[121].mxu0  ;;  %v3272_v43 = vpop.f32.mrb[121].mxu1 }
 0x1e7   :  { %v1374_v17 = vpop.f32.mrb[122].mxu0  ;;  %v1852_v44 = vpop.f32.mrb[122].mxu1 }
 0x1e8   :  { %v2634_v20 = vpack.c.bf16 %v2114_v60, %v2113_v19  ;;  %v1539_v40 = vmax.f32 %v1372_v51, 0.0  ;;  %v2017_v10 = vmax.f32 %v1850_v37, 0.0  ;;  %v1375_v14 = vadd.f32 %v4223_v8, %v1374_v17  ;;  %v3157_v53 = vpop.f32.mrb[123].mxu0  ;;  %v3273_v38 = vpop.f32.mrb[123].mxu1 }
 0x1e9   :  { %v1853_v13 = vadd.f32 %v4223_v8, %v1852_v44 }
 0x1ea   :  { %2734 = vst [vmem:[%s4494_s6 + $0x20] sm:$0xff] %v2634_v20   ;;  %v2066_v42 = vmax.f32 %v1539_v40, %v2017_v10  ;;  %v1540_v54 = vmax.f32 %v1375_v14, 0.0 }
 0x1eb   :  { %v2018_v56 = vmax.f32 %v1853_v13, 0.0 }
 0x1ec   :  { %v2115_v1 = vmax.f32 %v3934_v61, %v2066_v42 }
 0x1ed   :  { %v2067_v0 = vmax.f32 %v1540_v54, %v2018_v56  ;;  %v1379_v18 = vpop.f32.mrb[124].mxu0  ;;  %v1857_v15 = vpop.f32.mrb[124].mxu1 }
 0x1ee   :  { %v1380_v33 = vadd.f32 %v4223_v8, %v1379_v18  ;;  %v1858_v59 = vadd.f32 %v4223_v8, %v1857_v15  ;;  %v3160_v63 = vpop.f32.mrb[125].mxu0  ;;  %v3276_v24 = vpop.f32.mrb[125].mxu1 }
 0x1ef   :  { %v2116_v48 = vmax.f32 %v3940_v2, %v2067_v0  ;;  %v1382_v19 = vpop.f32.mrb[126].mxu0  ;;  %v1860_v55 = vpop.f32.mrb[126].mxu1 }
 0x1f0   :  { %v1541_v57 = vmax.f32 %v1380_v33, 0.0  ;;  %v2019_v27 = vmax.f32 %v1858_v59, 0.0  ;;  %v1383_v60 = vadd.f32 %v4223_v8, %v1382_v19  ;;  %v1861_v51 = vadd.f32 %v4223_v8, %v1860_v55  ;;  %v3161_v61 = vpop.f32.mrb[127].mxu0  ;;  %v3277_v37 = vpop.f32.mrb[127].mxu1 }
 0x1f1   :  { %v2639_v30 = vpack.c.bf16 %v2116_v48, %v2115_v1 }
 0x1f2   :  { %v2068_v43 = vmax.f32 %v1541_v57, %v2019_v27  ;;  %v1542_v17 = vmax.f32 %v1383_v60, 0.0  ;;  %v2020_v44 = vmax.f32 %v1861_v51, 0.0 }
 0x1f3   :  { %2735 = vst [vmem:[%s4494_s6 + $0x28] sm:$0xff] %v2639_v30  }
 0x1f4   :  { %v2117_v2 = vmax.f32 %v3952_v23, %v2068_v43  ;;  %v2069_v20 = vmax.f32 %v1542_v17, %v2020_v44 }
 0x1f5   :  { %v1387_v40 = vpop.f32.mrb[128].mxu0  ;;  %v1865_v10 = vpop.f32.mrb[128].mxu1 }
 0x1f6   :  { %v2118_v14 = vmax.f32 %v3958_v26, %v2069_v20  ;;  %v1388_v53 = vadd.f32 %v4223_v8, %v1387_v40  ;;  %v1866_v38 = vadd.f32 %v4223_v8, %v1865_v10  ;;  %v3164_v13 = vpop.f32.mrb[129].mxu0  ;;  %v3280_v42 = vpop.f32.mrb[129].mxu1 }
 0x1f7   :  { %v1390_v54 = vpop.f32.mrb[130].mxu0  ;;  %v1868_v56 = vpop.f32.mrb[130].mxu1 }
 0x1f8   :  { %v2644_v1 = vpack.c.bf16 %v2118_v14, %v2117_v2  ;;  %v1543_v0 = vmax.f32 %v1388_v53, 0.0  ;;  %v2021_v18 = vmax.f32 %v1866_v38, 0.0  ;;  %v1391_v15 = vadd.f32 %v4223_v8, %v1390_v54  ;;  %v3165_v33 = vpop.f32.mrb[131].mxu0  ;;  %v3281_v23 = vpop.f32.mrb[131].mxu1 }
 0x1f9   :  { %v1869_v59 = vadd.f32 %v4223_v8, %v1868_v56 }
 0x1fa   :  { %2736 = vst [vmem:[%s4494_s6 + $0x30] sm:$0xff] %v2644_v1   ;;  %v2070_v26 = vmax.f32 %v1543_v0, %v2021_v18  ;;  %v1544_v63 = vmax.f32 %v1391_v15, 0.0 }
 0x1fb   :  { %v2022_v24 = vmax.f32 %v1869_v59, 0.0 }
 0x1fc   :  { %v2119_v48 = vmax.f32 %v3970_v47, %v2070_v26 }
 0x1fd   :  { %v2071_v19 = vmax.f32 %v1544_v63, %v2022_v24  ;;  %v1395_v55 = vpop.f32.mrb[132].mxu0  ;;  %v1873_v57 = vpop.f32.mrb[132].mxu1 }
 0x1fe   :  { %v1396_v27 = vadd.f32 %v4223_v8, %v1395_v55  ;;  %v1874_v60 = vadd.f32 %v4223_v8, %v1873_v57  ;;  %v3168_v51 = vpop.f32.mrb[133].mxu0  ;;  %v3284_v61 = vpop.f32.mrb[133].mxu1 }
 0x1ff   :  { %v2120_v37 = vmax.f32 %v3976_v50, %v2071_v19  ;;  %v1398_v30 = vpop.f32.mrb[134].mxu0  ;;  %v1876_v43 = vpop.f32.mrb[134].mxu1 }
 0x200   :  { %v1545_v17 = vmax.f32 %v1396_v27, 0.0  ;;  %v2023_v44 = vmax.f32 %v1874_v60, 0.0  ;;  %v1399_v2 = vadd.f32 %v4223_v8, %v1398_v30  ;;  %v1877_v20 = vadd.f32 %v4223_v8, %v1876_v43  ;;  %v3169_v47 = vpop.f32.mrb[135].mxu0  ;;  %v3285_v40 = vpop.f32.mrb[135].mxu1 }
 0x201   :  { %v2649_v10 = vpack.c.bf16 %v2120_v37, %v2119_v48 }
 0x202   :  { %v2072_v14 = vmax.f32 %v1545_v17, %v2023_v44  ;;  %v1546_v53 = vmax.f32 %v1399_v2, 0.0  ;;  %v2024_v38 = vmax.f32 %v1877_v20, 0.0 }
 0x203   :  { %2737 = vst [vmem:[%s4494_s6 + $0x38] sm:$0xff] %v2649_v10  }
 0x204   :  { %v2121_v50 = vmax.f32 %v3988_v9, %v2072_v14  ;;  %v2073_v13 = vmax.f32 %v1546_v53, %v2024_v38 }
 0x205   :  { %v1403_v42 = vpop.f32.mrb[136].mxu0  ;;  %v1881_v54 = vpop.f32.mrb[136].mxu1 }
 0x206   :  { %v2122_v56 = vmax.f32 %v3994_v12, %v2073_v13  ;;  %v1404_v1 = vadd.f32 %v4223_v8, %v1403_v42  ;;  %v1882_v0 = vadd.f32 %v4223_v8, %v1881_v54  ;;  %v3172_v18 = vpop.f32.mrb[137].mxu0  ;;  %v3288_v15 = vpop.f32.mrb[137].mxu1 }
 0x207   :  { %v1406_v33 = vpop.f32.mrb[138].mxu0  ;;  %v1884_v23 = vpop.f32.mrb[138].mxu1 }
 0x208   :  { %v2654_v59 = vpack.c.bf16 %v2122_v56, %v2121_v50  ;;  %v1547_v26 = vmax.f32 %v1404_v1, 0.0  ;;  %v2025_v63 = vmax.f32 %v1882_v0, 0.0  ;;  %v1407_v24 = vadd.f32 %v4223_v8, %v1406_v33  ;;  %v3173_v48 = vpop.f32.mrb[139].mxu0  ;;  %v3289_v9 = vpop.f32.mrb[139].mxu1 }
 0x209   :  { %v1885_v19 = vadd.f32 %v4223_v8, %v1884_v23 }
 0x20a   :  { %2738 = vst [vmem:[%s4494_s6 + $0x40] sm:$0xff] %v2654_v59   ;;  %v2074_v12 = vmax.f32 %v1547_v26, %v2025_v63  ;;  %v1548_v55 = vmax.f32 %v1407_v24, 0.0 }
 0x20b   :  { %v2026_v57 = vmax.f32 %v1885_v19, 0.0 }
 0x20c   :  { %v2123_v27 = vmax.f32 %v4006_v35, %v2074_v12 }
 0x20d   :  { %v2075_v60 = vmax.f32 %v1548_v55, %v2026_v57  ;;  %v1411_v51 = vpop.f32.mrb[140].mxu0  ;;  %v1889_v61 = vpop.f32.mrb[140].mxu1 }
 0x20e   :  { %v1412_v37 = vadd.f32 %v4223_v8, %v1411_v51  ;;  %v1890_v30 = vadd.f32 %v4223_v8, %v1889_v61  ;;  %v3176_v43 = vpop.f32.mrb[141].mxu0  ;;  %v3292_v17 = vpop.f32.mrb[141].mxu1 }
 0x20f   :  { %v2124_v44 = vmax.f32 %v4012_v41, %v2075_v60  ;;  %v1414_v2 = vpop.f32.mrb[142].mxu0  ;;  %v1892_v20 = vpop.f32.mrb[142].mxu1 }
 0x210   :  { %v1549_v47 = vmax.f32 %v1412_v37, 0.0  ;;  %v2027_v40 = vmax.f32 %v1890_v30, 0.0  ;;  %v1415_v10 = vadd.f32 %v4223_v8, %v1414_v2  ;;  %v1893_v14 = vadd.f32 %v4223_v8, %v1892_v20  ;;  %v3177_v35 = vpop.f32.mrb[143].mxu0  ;;  %v3293_v53 = vpop.f32.mrb[143].mxu1 }
 0x211   :  { %v2659_v38 = vpack.c.bf16 %v2124_v44, %v2123_v27 }
 0x212   :  { %v2076_v50 = vmax.f32 %v1549_v47, %v2027_v40  ;;  %v1550_v13 = vmax.f32 %v1415_v10, 0.0  ;;  %v2028_v42 = vmax.f32 %v1893_v14, 0.0 }
 0x213   :  { %2739 = vst [vmem:[%s4494_s6 + $0x48] sm:$0xff] %v2659_v38  }
 0x214   :  { %v2125_v41 = vmax.f32 %v4024_v3, %v2076_v50  ;;  %v2077_v54 = vmax.f32 %v1550_v13, %v2028_v42 }
 0x215   :  { %v1419_v56 = vpop.f32.mrb[144].mxu0  ;;  %v1897_v1 = vpop.f32.mrb[144].mxu1 }
 0x216   :  { %v2126_v0 = vmax.f32 %v4030_v6, %v2077_v54  ;;  %v1420_v18 = vadd.f32 %v4223_v8, %v1419_v56  ;;  %v1898_v15 = vadd.f32 %v4223_v8, %v1897_v1  ;;  %v3180_v33 = vpop.f32.mrb[145].mxu0  ;;  %v3296_v23 = vpop.f32.mrb[145].mxu1 }
 0x217   :  { %v1422_v59 = vpop.f32.mrb[146].mxu0  ;;  %v1900_v26 = vpop.f32.mrb[146].mxu1 }
 0x218   :  { %v2664_v63 = vpack.c.bf16 %v2126_v0, %v2125_v41  ;;  %v1551_v24 = vmax.f32 %v1420_v18, 0.0  ;;  %v2029_v48 = vmax.f32 %v1898_v15, 0.0  ;;  %v1423_v9 = vadd.f32 %v4223_v8, %v1422_v59  ;;  %v3181_v19 = vpop.f32.mrb[147].mxu0  ;;  %v3297_v3 = vpop.f32.mrb[147].mxu1 }
 0x219   :  { %v1901_v12 = vadd.f32 %v4223_v8, %v1900_v26 }
 0x21a   :  { %2740 = vst [vmem:[%s4494_s6 + $0x50] sm:$0xff] %v2664_v63   ;;  %v2078_v6 = vmax.f32 %v1551_v24, %v2029_v48  ;;  %v1552_v55 = vmax.f32 %v1423_v9, 0.0 }
 0x21b   :  { %v2030_v57 = vmax.f32 %v1901_v12, 0.0 }
 0x21c   :  { %v2127_v27 = vmax.f32 %v4042_v31, %v2078_v6 }
 0x21d   :  { %v2079_v60 = vmax.f32 %v1552_v55, %v2030_v57  ;;  %v1427_v51 = vpop.f32.mrb[148].mxu0  ;;  %v1905_v61 = vpop.f32.mrb[148].mxu1 }
 0x21e   :  { %v1428_v37 = vadd.f32 %v4223_v8, %v1427_v51  ;;  %v1906_v30 = vadd.f32 %v4223_v8, %v1905_v61  ;;  %v3184_v43 = vpop.f32.mrb[149].mxu0  ;;  %v3300_v17 = vpop.f32.mrb[149].mxu1 }
 0x21f   :  { %v2128_v44 = vmax.f32 %v4048_v34, %v2079_v60  ;;  %v1430_v2 = vpop.f32.mrb[150].mxu0  ;;  %v1908_v20 = vpop.f32.mrb[150].mxu1 }
 0x220   :  { %v1553_v47 = vmax.f32 %v1428_v37, 0.0  ;;  %v2031_v40 = vmax.f32 %v1906_v30, 0.0  ;;  %v1431_v10 = vadd.f32 %v4223_v8, %v1430_v2  ;;  %v1909_v14 = vadd.f32 %v4223_v8, %v1908_v20  ;;  %v3185_v31 = vpop.f32.mrb[151].mxu0  ;;  %v3301_v35 = vpop.f32.mrb[151].mxu1 }
 0x221   :  { %v2669_v53 = vpack.c.bf16 %v2128_v44, %v2127_v27 }
 0x222   :  { %v2080_v38 = vmax.f32 %v1553_v47, %v2031_v40  ;;  %v1554_v50 = vmax.f32 %v1431_v10, 0.0  ;;  %v2032_v13 = vmax.f32 %v1909_v14, 0.0 }
 0x223   :  { %2741 = vst [vmem:[%s4494_s6 + $0x58] sm:$0xff] %v2669_v53  }
 0x224   :  { %v2129_v34 = vmax.f32 %v4060_v62, %v2080_v38  ;;  %v2081_v42 = vmax.f32 %v1554_v50, %v2032_v13 }
 0x225   :  { %v1435_v41 = vpop.f32.mrb[152].mxu0  ;;  %v1913_v54 = vpop.f32.mrb[152].mxu1 }
 0x226   :  { %v2130_v56 = vmax.f32 %v4066_v5, %v2081_v42  ;;  %v1436_v1 = vadd.f32 %v4223_v8, %v1435_v41  ;;  %v1914_v0 = vadd.f32 %v4223_v8, %v1913_v54  ;;  %v3188_v18 = vpop.f32.mrb[153].mxu0  ;;  %v3304_v15 = vpop.f32.mrb[153].mxu1 }
 0x227   :  { %v1438_v33 = vpop.f32.mrb[154].mxu0  ;;  %v1916_v23 = vpop.f32.mrb[154].mxu1 }
 0x228   :  { %v2674_v59 = vpack.c.bf16 %v2130_v56, %v2129_v34  ;;  %v1555_v26 = vmax.f32 %v1436_v1, 0.0  ;;  %v2033_v63 = vmax.f32 %v1914_v0, 0.0  ;;  %v1439_v24 = vadd.f32 %v4223_v8, %v1438_v33  ;;  %v3189_v48 = vpop.f32.mrb[155].mxu0  ;;  %v3305_v62 = vpop.f32.mrb[155].mxu1 }
 0x229   :  { %v1917_v9 = vadd.f32 %v4223_v8, %v1916_v23 }
 0x22a   :  { %2742 = vst [vmem:[%s4494_s6 + $0x60] sm:$0xff] %v2674_v59   ;;  %v2082_v5 = vmax.f32 %v1555_v26, %v2033_v63  ;;  %v1556_v19 = vmax.f32 %v1439_v24, 0.0 }
 0x22b   :  { %v2034_v3 = vmax.f32 %v1917_v9, 0.0 }
 0x22c   :  { %v2131_v12 = vmax.f32 %v4078_v32, %v2082_v5 }
 0x22d   :  { %v2083_v6 = vmax.f32 %v1556_v19, %v2034_v3  ;;  %v1443_v55 = vpop.f32.mrb[156].mxu0  ;;  %v1921_v57 = vpop.f32.mrb[156].mxu1 }
 0x22e   :  { %v1444_v27 = vadd.f32 %v4223_v8, %v1443_v55  ;;  %v1922_v60 = vadd.f32 %v4223_v8, %v1921_v57  ;;  %v3192_v51 = vpop.f32.mrb[157].mxu0  ;;  %v3308_v61 = vpop.f32.mrb[157].mxu1 }
 0x22f   :  { %v2132_v37 = vmax.f32 %v4084_v39, %v2083_v6  ;;  %v1446_v30 = vpop.f32.mrb[158].mxu0  ;;  %v1924_v43 = vpop.f32.mrb[158].mxu1 }
 0x230   :  { %v1557_v17 = vmax.f32 %v1444_v27, 0.0  ;;  %v2035_v44 = vmax.f32 %v1922_v60, 0.0  ;;  %v1447_v2 = vadd.f32 %v4223_v8, %v1446_v30  ;;  %v1925_v20 = vadd.f32 %v4223_v8, %v1924_v43  ;;  %v3193_v32 = vpop.f32.mrb[159].mxu0  ;;  %v3309_v47 = vpop.f32.mrb[159].mxu1 }
 0x231   :  { %v2679_v40 = vpack.c.bf16 %v2132_v37, %v2131_v12 }
 0x232   :  { %v2084_v10 = vmax.f32 %v1557_v17, %v2035_v44  ;;  %v1558_v14 = vmax.f32 %v1447_v2, 0.0  ;;  %v2036_v31 = vmax.f32 %v1925_v20, 0.0 }
 0x233   :  { %2743 = vst [vmem:[%s4494_s6 + $0x68] sm:$0xff] %v2679_v40  }
 0x234   :  { %v2133_v39 = vmax.f32 %v4096_v7, %v2084_v10  ;;  %v2085_v35 = vmax.f32 %v1558_v14, %v2036_v31 }
 0x235   :  { %v1451_v53 = vpop.f32.mrb[160].mxu0  ;;  %v1929_v38 = vpop.f32.mrb[160].mxu1 }
 0x236   :  { %v2134_v50 = vmax.f32 %v4102_v11, %v2085_v35  ;;  %v1452_v13 = vadd.f32 %v4223_v8, %v1451_v53  ;;  %v1930_v34 = vadd.f32 %v4223_v8, %v1929_v38  ;;  %v3196_v42 = vpop.f32.mrb[161].mxu0  ;;  %v3312_v41 = vpop.f32.mrb[161].mxu1 }
 0x237   :  { %v1454_v54 = vpop.f32.mrb[162].mxu0  ;;  %v1932_v56 = vpop.f32.mrb[162].mxu1 }
 0x238   :  { %v2684_v1 = vpack.c.bf16 %v2134_v50, %v2133_v39  ;;  %v1559_v0 = vmax.f32 %v1452_v13, 0.0  ;;  %v2037_v18 = vmax.f32 %v1930_v34, 0.0  ;;  %v1455_v15 = vadd.f32 %v4223_v8, %v1454_v54  ;;  %v3197_v33 = vpop.f32.mrb[163].mxu0  ;;  %v3313_v7 = vpop.f32.mrb[163].mxu1 }
 0x239   :  { %v1933_v23 = vadd.f32 %v4223_v8, %v1932_v56 }
 0x23a   :  { %2744 = vst [vmem:[%s4494_s6 + $0x70] sm:$0xff] %v2684_v1   ;;  %v2086_v11 = vmax.f32 %v1559_v0, %v2037_v18  ;;  %v1560_v59 = vmax.f32 %v1455_v15, 0.0 }
 0x23b   :  { %v2038_v26 = vmax.f32 %v1933_v23, 0.0 }
 0x23c   :  { %v2135_v63 = vmax.f32 %v4114_v45, %v2086_v11 }
 0x23d   :  { %v2087_v24 = vmax.f32 %v1560_v59, %v2038_v26  ;;  %v1459_v48 = vpop.f32.mrb[164].mxu0  ;;  %v1937_v62 = vpop.f32.mrb[164].mxu1 }
 0x23e   :  { %v1460_v9 = vadd.f32 %v4223_v8, %v1459_v48  ;;  %v1938_v5 = vadd.f32 %v4223_v8, %v1937_v62  ;;  %v3200_v19 = vpop.f32.mrb[165].mxu0  ;;  %v3316_v3 = vpop.f32.mrb[165].mxu1 }
 0x23f   :  { %v2136_v12 = vmax.f32 %v4120_v49, %v2087_v24  ;;  %v1462_v6 = vpop.f32.mrb[166].mxu0  ;;  %v1940_v55 = vpop.f32.mrb[166].mxu1 }
 0x240   :  { %v1561_v57 = vmax.f32 %v1460_v9, 0.0  ;;  %v2039_v27 = vmax.f32 %v1938_v5, 0.0  ;;  %v1463_v60 = vadd.f32 %v4223_v8, %v1462_v6  ;;  %v1941_v51 = vadd.f32 %v4223_v8, %v1940_v55  ;;  %v3201_v45 = vpop.f32.mrb[167].mxu0  ;;  %v3317_v61 = vpop.f32.mrb[167].mxu1 }
 0x241   :  { %v2689_v37 = vpack.c.bf16 %v2136_v12, %v2135_v63 }
 0x242   :  { %v2088_v30 = vmax.f32 %v1561_v57, %v2039_v27  ;;  %v1562_v43 = vmax.f32 %v1463_v60, 0.0  ;;  %v2040_v17 = vmax.f32 %v1941_v51, 0.0 }
 0x243   :  { %2745 = vst [vmem:[%s4494_s6 + $0x78] sm:$0xff] %v2689_v37  }
 0x244   :  { %v2137_v49 = vmax.f32 %v4132_v21, %v2088_v30  ;;  %v2089_v44 = vmax.f32 %v1562_v43, %v2040_v17 }
 0x245   :  { %v1467_v2 = vpop.f32.mrb[168].mxu0  ;;  %v1945_v20 = vpop.f32.mrb[168].mxu1 }
 0x246   :  { %v2138_v32 = vmax.f32 %v4138_v25, %v2089_v44  ;;  %v1468_v47 = vadd.f32 %v4223_v8, %v1467_v2  ;;  %v1946_v40 = vadd.f32 %v4223_v8, %v1945_v20  ;;  %v3204_v10 = vpop.f32.mrb[169].mxu0  ;;  %v3320_v14 = vpop.f32.mrb[169].mxu1 }
 0x247   :  { %v1470_v31 = vpop.f32.mrb[170].mxu0  ;;  %v1948_v39 = vpop.f32.mrb[170].mxu1 }
 0x248   :  { %v2694_v35 = vpack.c.bf16 %v2138_v32, %v2137_v49  ;;  %v1563_v53 = vmax.f32 %v1468_v47, 0.0  ;;  %v2041_v38 = vmax.f32 %v1946_v40, 0.0  ;;  %v1471_v50 = vadd.f32 %v4223_v8, %v1470_v31  ;;  %v3205_v13 = vpop.f32.mrb[171].mxu0  ;;  %v3321_v21 = vpop.f32.mrb[171].mxu1 }
 0x249   :  { %v1949_v34 = vadd.f32 %v4223_v8, %v1948_v39 }
 0x24a   :  { %2746 = vst [vmem:[%s4494_s6 + $0x80] sm:$0xff] %v2694_v35   ;;  %v2090_v25 = vmax.f32 %v1563_v53, %v2041_v38  ;;  %v1564_v42 = vmax.f32 %v1471_v50, 0.0 }
 0x24b   :  { %v2042_v41 = vmax.f32 %v1949_v34, 0.0 }
 0x24c   :  { %v2139_v54 = vmax.f32 %v4150_v58, %v2090_v25  ;;  %v4443_v25 = vld [vmem:[%s4493_s5] ss:$0 sm:$0xff] }
 0x24d   :  { %v2091_v56 = vmax.f32 %v1564_v42, %v2042_v41  ;;  %v1475_v1 = vpop.f32.mrb[172].mxu0  ;;  %v1953_v0 = vpop.f32.mrb[172].mxu1 }
 0x24e   :  { %v1476_v18 = vadd.f32 %v4223_v8, %v1475_v1  ;;  %v1954_v15 = vadd.f32 %v4223_v8, %v1953_v0  ;;  %v3208_v33 = vpop.f32.mrb[173].mxu0  ;;  %v3324_v7 = vpop.f32.mrb[173].mxu1 }
 0x24f   :  { %v2140_v23 = vmax.f32 %v4156_v4, %v2091_v56  ;;  %v1478_v11 = vpop.f32.mrb[174].mxu0  ;;  %v1956_v59 = vpop.f32.mrb[174].mxu1 }
 0x250   :  { %v1565_v26 = vmax.f32 %v1476_v18, 0.0  ;;  %v2043_v63 = vmax.f32 %v1954_v15, 0.0  ;;  %v1479_v24 = vadd.f32 %v4223_v8, %v1478_v11  ;;  %v1957_v48 = vadd.f32 %v4223_v8, %v1956_v59  ;;  %v3209_v58 = vpop.f32.mrb[175].mxu0  ;;  %v3325_v62 = vpop.f32.mrb[175].mxu1 }
 0x251   :  { %v2699_v9 = vpack.c.bf16 %v2140_v23, %v2139_v54 }
 0x252   :  { %v2092_v5 = vmax.f32 %v1565_v26, %v2043_v63  ;;  %v1566_v19 = vmax.f32 %v1479_v24, 0.0  ;;  %v2044_v3 = vmax.f32 %v1957_v48, 0.0 }
 0x253   :  { %2747 = vst [vmem:[%s4494_s6 + $0x88] sm:$0xff] %v2699_v9  }
 0x254   :  { %v2141_v4 = vmax.f32 %v4168_v46, %v2092_v5  ;;  %v2093_v12 = vmax.f32 %v1566_v19, %v2044_v3 }
 0x255   :  { %v1483_v6 = vpop.f32.mrb[176].mxu0  ;;  %v1961_v55 = vpop.f32.mrb[176].mxu1 }
 0x256   :  { %v2142_v57 = vmax.f32 %v4174_v52, %v2093_v12  ;;  %v1484_v27 = vadd.f32 %v4223_v8, %v1483_v6  ;;  %v1962_v60 = vadd.f32 %v4223_v8, %v1961_v55  ;;  %v3212_v51 = vpop.f32.mrb[177].mxu0  ;;  %v3328_v45 = vpop.f32.mrb[177].mxu1 }
 0x257   :  { %v1486_v61 = vpop.f32.mrb[178].mxu0  ;;  %v1964_v37 = vpop.f32.mrb[178].mxu1 }
 0x258   :  { %v2704_v30 = vpack.c.bf16 %v2142_v57, %v2141_v4  ;;  %v1567_v43 = vmax.f32 %v1484_v27, 0.0  ;;  %v2045_v17 = vmax.f32 %v1962_v60, 0.0  ;;  %v1487_v49 = vadd.f32 %v4223_v8, %v1486_v61  ;;  %v3213_v44 = vpop.f32.mrb[179].mxu0  ;;  %v3329_v46 = vpop.f32.mrb[179].mxu1  ;;  %v4501_v61 = vld [vmem:[#allocation2_spill] sm:$0xff] }
 0x259   :  { %v1965_v2 = vadd.f32 %v4223_v8, %v1964_v37 }
 0x25a   :  { %2748 = vst [vmem:[%s4494_s6 + $0x90] sm:$0xff] %v2704_v30   ;;  %v2094_v52 = vmax.f32 %v1567_v43, %v2045_v17  ;;  %v1568_v20 = vmax.f32 %v1487_v49, 0.0 }
 0x25b   :  { %v2046_v32 = vmax.f32 %v1965_v2, 0.0 }
 0x25c   :  { %v2143_v47 = vmax.f32 %v4186_v29, %v2094_v52 }
 0x25d   :  { %v2095_v40 = vmax.f32 %v1568_v20, %v2046_v32  ;;  %v1491_v10 = vpop.f32.mrb[180].mxu0  ;;  %v1969_v14 = vpop.f32.mrb[180].mxu1 }
 0x25e   :  { %v1492_v31 = vadd.f32 %v4223_v8, %v1491_v10  ;;  %v1970_v39 = vadd.f32 %v4223_v8, %v1969_v14  ;;  %v3216_v35 = vpop.f32.mrb[181].mxu0  ;;  %v3332_v53 = vpop.f32.mrb[181].mxu1 }
 0x25f   :  { %v2144_v38 = vmax.f32 %v4192_v36, %v2095_v40  ;;  %v1494_v50 = vpop.f32.mrb[182].mxu0  ;;  %v1972_v13 = vpop.f32.mrb[182].mxu1  ;;  %v4502_v40 = vld [vmem:[#allocation3_spill] sm:$0xff]  ;;  %v4503_v35 = vld [vmem:[#allocation4_spill] sm:$0xff] }
 0x260   :  { %v1569_v21 = vmax.f32 %v1492_v31, 0.0  ;;  %v2047_v34 = vmax.f32 %v1970_v39, 0.0  ;;  %v1495_v29 = vadd.f32 %v4443_v25, %v1494_v50  ;;  %v1973_v42 = vadd.f32 %v4443_v25, %v1972_v13  ;;  %v3217_v41 = vpop.f32.mrb[183].mxu0  ;;  %v3333_v54 = vpop.f32.mrb[183].mxu1 }
 0x261   :  { %v2709_v8 = vpack.c.bf16 %v2144_v38, %v2143_v47 }
 0x262   :  { %v2096_v56 = vmax.f32 %v1569_v21, %v2047_v34  ;;  %v1570_v1 = vmax.f32 %v1495_v29, 0.0  ;;  %v2048_v0 = vmax.f32 %v1973_v42, 0.0 }
 0x263   :  { %2749 = vst [vmem:[%s4494_s6 + $0x98] sm:$0xff] %v2709_v8  }
 0x264   :  { %v2145_v36 = vmax.f32 %v4204_v22, %v2096_v56  ;;  %v2097_v18 = vmax.f32 %v1570_v1, %v2048_v0 }
 0x265   :  { %v1499_v15 = vpop.f32.mrb[184].mxu0  ;;  %v1977_v33 = vpop.f32.mrb[184].mxu1 }
 0x266   :  { %v2146_v7 = vmax.f32 %v4210_v28, %v2097_v18  ;;  %v1500_v23 = vadd.f32 %v4443_v25, %v1499_v15  ;;  %v1978_v11 = vadd.f32 %v4443_v25, %v1977_v33  ;;  %v3220_v59 = vpop.f32.mrb[185].mxu0  ;;  %v3336_v26 = vpop.f32.mrb[185].mxu1  ;;  %v4504_v33 = vld [vmem:[#allocation5_spill] sm:$0xff] }
 0x267   :  { %v1502_v63 = vpop.f32.mrb[186].mxu0  ;;  %v1980_v24 = vpop.f32.mrb[186].mxu1 }
 0x268   :  { %v2714_v48 = vpack.c.bf16 %v2146_v7, %v2145_v36  ;;  %v1571_v58 = vmax.f32 %v1500_v23, 0.0  ;;  %v2049_v62 = vmax.f32 %v1978_v11, 0.0  ;;  %v1503_v9 = vadd.f32 %v4443_v25, %v1502_v63  ;;  %v3221_v5 = vpop.f32.mrb[187].mxu0  ;;  %v3337_v22 = vpop.f32.mrb[187].mxu1 }
 0x269   :  { %v1981_v19 = vadd.f32 %v4443_v25, %v1980_v24 }
 0x26a   :  { %2750 = vst [vmem:[%s4494_s6 + $0xa0] sm:$0xff] %v2714_v48   ;;  %v2098_v28 = vmax.f32 %v1571_v58, %v2049_v62  ;;  %v1572_v3 = vmax.f32 %v1503_v9, 0.0  ;;  %v4505_v58 = vld [vmem:[#allocation6_spill] sm:$0xff] }
 0x26b   :  { %v2050_v4 = vmax.f32 %v1981_v19, 0.0 }
 0x26c   :  { %v2147_v12 = vmax.f32 %v4227_v16, %v2098_v28 }
 0x26d   :  { %v2099_v6 = vmax.f32 %v1572_v3, %v2050_v4  ;;  %v1507_v55 = vpop.f32.mrb[188].mxu0  ;;  %v1985_v57 = vpop.f32.mrb[188].mxu1 }
 0x26e   :  { %v1508_v27 = vadd.f32 %v4443_v25, %v1507_v55  ;;  %v1986_v60 = vadd.f32 %v4443_v25, %v1985_v57  ;;  %v3224_v51 = vpop.f32.mrb[189].mxu0  ;;  %v3340_v45 = vpop.f32.mrb[189].mxu1 }
 0x26f   :  { %v2148_v37 = vmax.f32 %v4501_v61, %v2099_v6  ;;  %v1510_v30 = vpop.f32.mrb[190].mxu0  ;;  %v1988_v43 = vpop.f32.mrb[190].mxu1  ;;  %v4506_v6 = vld [vmem:[#allocation7_spill] sm:$0xff] }
 0x270   :  { %v1573_v17 = vmax.f32 %v1508_v27, 0.0  ;;  %v2051_v49 = vmax.f32 %v1986_v60, 0.0  ;;  %v1511_v44 = vadd.f32 %v4443_v25, %v1510_v30  ;;  %v1989_v46 = vadd.f32 %v4443_v25, %v1988_v43  ;;  %v3225_v16 = vpop.f32.mrb[191].mxu0  ;;  %v3341_v2 = vpop.f32.mrb[191].mxu1 }
 0x271   :  { %v2719_v52 = vpack.c.bf16 %v2148_v37, %v2147_v12 }
 0x272   :  { %v2100_v20 = vmax.f32 %v1573_v17, %v2051_v49  ;;  %v1574_v32 = vmax.f32 %v1511_v44, 0.0  ;;  %v2052_v47 = vmax.f32 %v1989_v46, 0.0 }
 0x273   :  { %2751 = vst [vmem:[%s4494_s6 + $0xa8] sm:$0xff] %v2719_v52  }
 0x274   :  { %v2149_v10 = vmax.f32 %v4502_v40, %v2100_v20  ;;  %v2101_v14 = vmax.f32 %v1574_v32, %v2052_v47 }
 0x275   :  { %v1515_v31 = vpop.f32.mrb[192].mxu0  ;;  %v1993_v39 = vpop.f32.mrb[192].mxu1 }
 0x276   :  { %v2150_v53 = vmax.f32 %v4503_v35, %v2101_v14  ;;  %v1516_v38 = vadd.f32 %v4443_v25, %v1515_v31  ;;  %v1994_v50 = vadd.f32 %v4443_v25, %v1993_v39  ;;  %v3228_v13 = vpop.f32.mrb[193].mxu0  ;;  %v3344_v21 = vpop.f32.mrb[193].mxu1 }
 0x277   :  { %v1518_v34 = vpop.f32.mrb[194].mxu0  ;;  %v1996_v29 = vpop.f32.mrb[194].mxu1 }
 0x278   :  { %v2724_v42 = vpack.c.bf16 %v2150_v53, %v2149_v10  ;;  %v1575_v41 = vmax.f32 %v1516_v38, 0.0  ;;  %v2053_v54 = vmax.f32 %v1994_v50, 0.0  ;;  %v1519_v8 = vadd.f32 %v4443_v25, %v1518_v34  ;;  %v3229_v56 = vpop.f32.mrb[195].mxu0  ;;  %v3345_v1 = vpop.f32.mrb[195].mxu1 }
 0x279   :  { %v1997_v0 = vadd.f32 %v4443_v25, %v1996_v29 }
 0x27a   :  { %2752 = vst [vmem:[%s4494_s6 + $0xb0] sm:$0xff] %v2724_v42   ;;  %v2102_v36 = vmax.f32 %v1575_v41, %v2053_v54  ;;  %v1576_v18 = vmax.f32 %v1519_v8, 0.0 }
 0x27b   :  { %v2054_v15 = vmax.f32 %v1997_v0, 0.0 }
 0x27c   :  { %v2151_v7 = vmax.f32 %v4504_v33, %v2102_v36 }
 0x27d   :  { %v2103_v23 = vmax.f32 %v1576_v18, %v2054_v15  ;;  %v1523_v11 = vpop.f32.mrb[196].mxu0  ;;  %v2001_v59 = vpop.f32.mrb[196].mxu1 }
 0x27e   :  { %v1524_v26 = vadd.f32 %v4443_v25, %v1523_v11  ;;  %v2002_v63 = vadd.f32 %v4443_v25, %v2001_v59  ;;  %v3232_v24 = vpop.f32.mrb[197].mxu0  ;;  %v3348_v48 = vpop.f32.mrb[197].mxu1 }
 0x27f   :  { %v2152_v62 = vmax.f32 %v4505_v58, %v2103_v23  ;;  %v1526_v9 = vpop.f32.mrb[198].mxu0  ;;  %v2004_v5 = vpop.f32.mrb[198].mxu1 }
 0x280   :  { %v1577_v22 = vmax.f32 %v1524_v26, 0.0  ;;  %v2055_v19 = vmax.f32 %v2002_v63, 0.0  ;;  %v3233_v28 = vpop.f32.mrb[199].mxu0  ;;  %v3349_v3 = vpop.f32.mrb[199].mxu1 }
 0x281   :  { %v2729_v4 = vpack.c.bf16 %v2152_v62, %v2151_v7 }
 0x282   :  { %v2104_v12 = vmax.f32 %v1577_v22, %v2055_v19 }
 0x283   :  { %2753 = vst [vmem:[%s4494_s6 + $0xb8] sm:$0xff] %v2729_v4  }
 0x284   :  { %v2153_v55 = vmax.f32 %v4506_v6, %v2104_v12 }
 0x286   :  { %v2610_v57 = vpack.c.bf16 %v2153_v55, %v2153_v55 }
 0x288   :  { %2399 = vst [vmem:[%s4494_s6 + $0xc0] sm:$0xf] %v2610_v57 }

// kernel: net_forward.4
= control target key start
LH: loop header
LB: loop body
LE: loop exit
PB: predicated region body
PF: predicated region fallthrough
CT: control target
= control target key end

     0   :  { %s1297_s4 = inlined_call_operand.vmem [shape: bf16[256,128], index: 4, kind: input, shape index: {}]   ;;  %s1298_s0 = inlined_call_operand.vmem [shape: bf16[56,256], index: 0, kind: input, shape index: {}]   ;;  %s1299_s1 = inlined_call_operand.vmem [shape: bf16[56,256], index: 1, kind: input, shape index: {}]   ;;  %s1300_s2 = inlined_call_operand.vmem [shape: bf16[56,256], index: 2, kind: input, shape index: {}]   ;;  %s1301_s3 = inlined_call_operand.vmem [shape: bf16[56,256], index: 3, kind: input, shape index: {}]   ;;  %s1302_s5 = inlined_call_operand.vmem [shape: f32[1,128], index: 5, kind: input, shape index: {}]   ;;  %s1303_s6 = inlined_call_operand.vmem [shape: bf16[56,128], index: 6, kind: output, shape index: {}]  }
   0x1   :  { %v920_v0 = vld [vmem:[%s1297_s4 + $0x40] sm:$0xff]   ;;  %v922_v2 = vld [vmem:[%s1297_s4 + $0x48] sm:$0xff]   ;;  %v1036_v4 = vld [vmem:[%s1297_s4 + $0x50] sm:$0xff]  }
   0x2   :  { %v1021_v1 = vld [vmem:[%s1297_s4] sm:$0xff]   ;;  %760 = vmatprep.subr.bf16.mxu0 %v920_v0  ;;  %800 = vmatprep.subr.bf16.mxu1 %v920_v0  ;;  %v1031_v3 = vld [vmem:[%s1297_s4 + $0x8] sm:$0xff]   ;;  %v1043_v5 = vld [vmem:[%s1297_s4 + $0x10] sm:$0xff]  }
   0x3   :  { %761 = vmatpush3.bf16.msra.mxu0 %v1021_v1  ;;  %801 = vmatpush3.bf16.msra.mxu1 %v1021_v1  ;;  %v1050_v6 = vld [vmem:[%s1297_s4 + $0x58] sm:$0xff]   ;;  %v1064_v8 = vld [vmem:[%s1297_s4 + $0x60] sm:$0xff]   ;;  %v1078_v10 = vld [vmem:[%s1297_s4 + $0x68] sm:$0xff]  }
   0x4   :  { %762 = vmatprep.subr.bf16.mxu0 %v922_v2  ;;  %802 = vmatprep.subr.bf16.mxu1 %v922_v2  ;;  %v1057_v7 = vld [vmem:[%s1297_s4 + $0x18] sm:$0xff]   ;;  %v1071_v9 = vld [vmem:[%s1297_s4 + $0x20] sm:$0xff]   ;;  %v1091_v13 = vld [vmem:[%s1297_s4 + $0x28] sm:$0xff]  }
   0x5   :  { %v938_v11 = vld [vmem:[%s1298_s0 + $0x4] ss:$8 sps:$4 sm:$0xff]   ;;  %v1098_v14 = vld [vmem:[%s1297_s4 + $0x70] sm:$0xff]   ;;  %v1112_v16 = vld [vmem:[%s1297_s4 + $0x78] sm:$0xff]  }
   0x6   :  { %v941_v12 = vld [vmem:[%s1299_s1 + $0x4] ss:$8 sps:$4 sm:$0xff]   ;;  %235 = vmatprep.mubr.bf16.mxu0 %v938_v11  ;;  %v1105_v15 = vld [vmem:[%s1297_s4 + $0x30] sm:$0xff]   ;;  %v1119_v17 = vld [vmem:[%s1297_s4 + $0x38] sm:$0xff]  }
   0x7   :  { %763 = vmatpush3.bf16.msra.mxu0 %v1031_v3  ;;  %803 = vmatpush3.bf16.msra.mxu1 %v1031_v3  ;;  %v936_v18 = vld [vmem:[%s1298_s0] ss:$8 sps:$4 sm:$0xff]   ;;  %v942_v20 = vld [vmem:[%s1298_s0 + $0x14] ss:$8 sps:$4 sm:$0xff]   ;;  %v946_v22 = vld [vmem:[%s1298_s0 + $0x10] ss:$8 sps:$4 sm:$0xff]  }
   0x8   :  { %764 = vmatprep.subr.bf16.mxu0 %v1036_v4  ;;  %804 = vmatprep.subr.bf16.mxu1 %v1036_v4  ;;  %v939_v19 = vld [vmem:[%s1299_s1] ss:$8 sps:$4 sm:$0xff]   ;;  %v944_v21 = vld [vmem:[%s1299_s1 + $0x14] ss:$8 sps:$4 sm:$0xff]   ;;  %v947_v23 = vld [vmem:[%s1299_s1 + $0x10] ss:$8 sps:$4 sm:$0xff]  }
   0x9   :  { %350 = vmatprep.mubr.bf16.mxu1 %v941_v12  ;;  %v948_v24 = vld [vmem:[%s1298_s0 + $0x24] ss:$8 sps:$4 sm:$0xff]   ;;  %v952_v26 = vld [vmem:[%s1298_s0 + $0x20] ss:$8 sps:$4 sm:$0xff]   ;;  %v63_v28 = vld [vmem:[%s1298_s0 + $0x30] sm:$0xff] }
   0xa   :  { %v950_v25 = vld [vmem:[%s1299_s1 + $0x24] ss:$8 sps:$4 sm:$0xff]   ;;  %v953_v27 = vld [vmem:[%s1299_s1 + $0x20] ss:$8 sps:$4 sm:$0xff]   ;;  %v280_v29 = vld [vmem:[%s1299_s1 + $0x30] sm:$0xff]  ;;  %v688_v30 = vcombine.high %v63_v28, %v63_v28  ;;  %v687_v32 = vcombine.low %v63_v28, %v63_v28 }
   0xb   :  { %765 = vmatpush3.bf16.msra.mxu0 %v1043_v5  ;;  %805 = vmatpush3.bf16.msra.mxu1 %v1043_v5  ;;  %v712_v31 = vcombine.high %v280_v29, %v280_v29  ;;  %v711_v33 = vcombine.low %v280_v29, %v280_v29  ;;  %v960_v34 = vld [vmem:[%s1300_s2 + $0x4] ss:$8 sps:$4 sm:$0xff]   ;;  %v958_v36 = vld [vmem:[%s1300_s2] ss:$8 sps:$4 sm:$0xff]   ;;  %v964_v38 = vld [vmem:[%s1300_s2 + $0x14] ss:$8 sps:$4 sm:$0xff]  }
   0xc   :  { %766 = vmatprep.subr.bf16.mxu0 %v1050_v6  ;;  %806 = vmatprep.subr.bf16.mxu1 %v1050_v6  ;;  %v963_v35 = vld [vmem:[%s1301_s3 + $0x4] ss:$8 sps:$4 sm:$0xff]   ;;  %v961_v37 = vld [vmem:[%s1301_s3] ss:$8 sps:$4 sm:$0xff]   ;;  %v966_v39 = vld [vmem:[%s1301_s3 + $0x14] ss:$8 sps:$4 sm:$0xff]  }
   0xd   :  { %v968_v40 = vld [vmem:[%s1300_s2 + $0x10] ss:$8 sps:$4 sm:$0xff]   ;;  %v970_v42 = vld [vmem:[%s1300_s2 + $0x24] ss:$8 sps:$4 sm:$0xff]   ;;  %v974_v46 = vld [vmem:[%s1300_s2 + $0x20] ss:$8 sps:$4 sm:$0xff]  }
   0xe   :  { %v969_v41 = vld [vmem:[%s1301_s3 + $0x10] ss:$8 sps:$4 sm:$0xff]   ;;  %v972_v43 = vld [vmem:[%s1301_s3 + $0x24] ss:$8 sps:$4 sm:$0xff]   ;;  %v975_v47 = vld [vmem:[%s1301_s3 + $0x20] ss:$8 sps:$4 sm:$0xff]  }
   0xf   :  { %767 = vmatpush3.bf16.msra.mxu0 %v1057_v7  ;;  %807 = vmatpush3.bf16.msra.mxu1 %v1057_v7  ;;  %v402_v44 = vld [vmem:[%s1300_s2 + $0x30] sm:$0xff]  ;;  %v1234_v54 = vld [vmem:[%s1302_s5] ss:$0 sm:$0xff] }
  0x10   :  { %768 = vmatprep.subr.bf16.mxu0 %v1064_v8  ;;  %808 = vmatprep.subr.bf16.mxu1 %v1064_v8  ;;  %v517_v45 = vld [vmem:[%s1301_s3 + $0x30] sm:$0xff]  ;;  %v720_v48 = vcombine.high %v402_v44, %v402_v44  ;;  %v719_v50 = vcombine.low %v402_v44, %v402_v44 }
  0x11   :  { %v728_v49 = vcombine.high %v517_v45, %v517_v45  ;;  %v727_v51 = vcombine.low %v517_v45, %v517_v45 }
  0x13   :  { %769 = vmatpush3.bf16.msra.mxu0 %v1071_v9  ;;  %809 = vmatpush3.bf16.msra.mxu1 %v1071_v9 }
  0x14   :  { %770 = vmatprep.subr.bf16.mxu0 %v1078_v10  ;;  %810 = vmatprep.subr.bf16.mxu1 %v1078_v10 }
  0x17   :  { %771 = vmatpush3.bf16.msra.mxu0 %v1091_v13  ;;  %811 = vmatpush3.bf16.msra.mxu1 %v1091_v13 }
  0x18   :  { %772 = vmatprep.subr.bf16.mxu0 %v1098_v14  ;;  %812 = vmatprep.subr.bf16.mxu1 %v1098_v14 }
  0x1b   :  { %773 = vmatpush3.bf16.msra.mxu0 %v1105_v15  ;;  %813 = vmatpush3.bf16.msra.mxu1 %v1105_v15 }
  0x1c   :  { %774 = vmatprep.subr.bf16.mxu0 %v1112_v16  ;;  %814 = vmatprep.subr.bf16.mxu1 %v1112_v16 }
  0x1f   :  { %775 = vmatpush3.bf16.msra.mxu0 %v1119_v17  ;;  %815 = vmatpush3.bf16.msra.mxu1 %v1119_v17 }
  0x20   :  { %840 = vmatprep.subr.bf16.mxu0 %v920_v0  ;;  %880 = vmatprep.subr.bf16.mxu1 %v920_v0 }
  0x22   :  { %236 = vmatmul.mubr.bf16.vlgmr.msra.gmra.mrb[0].mxu0 %v936_v18  ;;  %351 = vmatmul.mubr.bf16.vlgmr.msra.gmra.mrb[0].mxu1 %v939_v19 }
  0x23   :  { %841 = vmatpush3.bf16.msra.mxu0 %v1021_v1  ;;  %881 = vmatpush3.bf16.msra.mxu1 %v1021_v1 }
  0x24   :  { %842 = vmatprep.subr.bf16.mxu0 %v922_v2  ;;  %882 = vmatprep.subr.bf16.mxu1 %v922_v2 }
  0x25   :  { %243 = vmatprep.mubr.bf16.mxu0 %v942_v20  ;;  %358 = vmatprep.mubr.bf16.mxu1 %v944_v21 }
  0x27   :  { %843 = vmatpush3.bf16.msra.mxu0 %v1031_v3  ;;  %883 = vmatpush3.bf16.msra.mxu1 %v1031_v3 }
  0x28   :  { %844 = vmatprep.subr.bf16.mxu0 %v1036_v4  ;;  %884 = vmatprep.subr.bf16.mxu1 %v1036_v4 }
  0x2a   :  { %244 = vmatmul.mubr.bf16.gmra.mrb[4].mxu0 %v946_v22  ;;  %359 = vmatmul.mubr.bf16.gmra.mrb[4].mxu1 %v947_v23 }
  0x2b   :  { %845 = vmatpush3.bf16.msra.mxu0 %v1043_v5  ;;  %885 = vmatpush3.bf16.msra.mxu1 %v1043_v5 }
  0x2c   :  { %846 = vmatprep.subr.bf16.mxu0 %v1050_v6  ;;  %886 = vmatprep.subr.bf16.mxu1 %v1050_v6 }
  0x2d   :  { %251 = vmatprep.mubr.bf16.mxu0 %v948_v24  ;;  %366 = vmatprep.mubr.bf16.mxu1 %v950_v25 }
  0x2f   :  { %847 = vmatpush3.bf16.msra.mxu0 %v1057_v7  ;;  %887 = vmatpush3.bf16.msra.mxu1 %v1057_v7 }
  0x30   :  { %848 = vmatprep.subr.bf16.mxu0 %v1064_v8  ;;  %888 = vmatprep.subr.bf16.mxu1 %v1064_v8 }
  0x32   :  { %252 = vmatmul.mubr.bf16.gmra.mrb[8].mxu0 %v952_v26  ;;  %367 = vmatmul.mubr.bf16.gmra.mrb[8].mxu1 %v953_v27 }
  0x33   :  { %849 = vmatpush3.bf16.msra.mxu0 %v1071_v9  ;;  %889 = vmatpush3.bf16.msra.mxu1 %v1071_v9 }
  0x34   :  { %850 = vmatprep.subr.bf16.mxu0 %v1078_v10  ;;  %890 = vmatprep.subr.bf16.mxu1 %v1078_v10 }
  0x35   :  { %259 = vmatprep.mubr.bf16.mxu0 %v688_v30  ;;  %374 = vmatprep.mubr.bf16.mxu1 %v712_v31 }
  0x37   :  { %851 = vmatpush3.bf16.msra.mxu0 %v1091_v13  ;;  %891 = vmatpush3.bf16.msra.mxu1 %v1091_v13 }
  0x38   :  { %852 = vmatprep.subr.bf16.mxu0 %v1098_v14  ;;  %892 = vmatprep.subr.bf16.mxu1 %v1098_v14 }
  0x3a   :  { %260 = vmatmul.mubr.bf16.gmra.mrb[12].mxu0 %v687_v32  ;;  %375 = vmatmul.mubr.bf16.gmra.mrb[12].mxu1 %v711_v33 }
  0x3b   :  { %853 = vmatpush3.bf16.msra.mxu0 %v1105_v15  ;;  %893 = vmatpush3.bf16.msra.mxu1 %v1105_v15 }
  0x3c   :  { %854 = vmatprep.subr.bf16.mxu0 %v1112_v16  ;;  %894 = vmatprep.subr.bf16.mxu1 %v1112_v16 }
  0x3d   :  { %472 = vmatprep.mubr.bf16.mxu0 %v960_v34  ;;  %587 = vmatprep.mubr.bf16.mxu1 %v963_v35 }
  0x3f   :  { %855 = vmatpush3.bf16.msra.mxu0 %v1119_v17  ;;  %895 = vmatpush3.bf16.msra.mxu1 %v1119_v17 }
  0x42   :  { %473 = vmatmul.mubr.bf16.vlgmr.msra.gmra.mrb[16].mxu0 %v958_v36  ;;  %588 = vmatmul.mubr.bf16.vlgmr.msra.gmra.mrb[16].mxu1 %v961_v37 }
  0x43   :  { %480 = vmatprep.mubr.bf16.mxu0 %v964_v38  ;;  %595 = vmatprep.mubr.bf16.mxu1 %v966_v39 }
  0x4a   :  { %481 = vmatmul.mubr.bf16.gmra.mrb[20].mxu0 %v968_v40  ;;  %596 = vmatmul.mubr.bf16.gmra.mrb[20].mxu1 %v969_v41 }
  0x4b   :  { %488 = vmatprep.mubr.bf16.mxu0 %v970_v42  ;;  %603 = vmatprep.mubr.bf16.mxu1 %v972_v43 }
  0x52   :  { %489 = vmatmul.mubr.bf16.gmra.mrb[24].mxu0 %v974_v46  ;;  %604 = vmatmul.mubr.bf16.gmra.mrb[24].mxu1 %v975_v47 }
  0x53   :  { %496 = vmatprep.mubr.bf16.mxu0 %v720_v48  ;;  %611 = vmatprep.mubr.bf16.mxu1 %v728_v49 }
  0x5a   :  { %497 = vmatmul.mubr.bf16.gmra.mrb[28].mxu0 %v719_v50  ;;  %612 = vmatmul.mubr.bf16.gmra.mrb[28].mxu1 %v727_v51 }
  0xf5   :  { %v776_v52 = vpop.f32.mrb[0].mxu0  ;;  %v816_v53 = vpop.f32.mrb[0].mxu1 }
  0xf6   :  { %v777_v55 = vpop.f32.mrb[1].mxu0  ;;  %v817_v56 = vpop.f32.mrb[1].mxu1 }
  0xf7   :  { %v778_v57 = vadd.f32 %v777_v55, %v776_v52  ;;  %v818_v58 = vadd.f32 %v817_v56, %v816_v53  ;;  %v779_v59 = vpop.f32.mrb[2].mxu0  ;;  %v819_v60 = vpop.f32.mrb[2].mxu1 }
  0xf8   :  { %v780_v61 = vpop.f32.mrb[3].mxu0  ;;  %v820_v62 = vpop.f32.mrb[3].mxu1 }
  0xf9   :  { %v238_v63 = vadd.f32 %v778_v57, %v1234_v54  ;;  %v353_v0 = vadd.f32 %v818_v58, %v1234_v54  ;;  %v781_v1 = vadd.f32 %v780_v61, %v779_v59  ;;  %v821_v2 = vadd.f32 %v820_v62, %v819_v60 }
  0xfb   :  { %v267_v3 = vmax.f32 %v238_v63, 0.0  ;;  %v382_v4 = vmax.f32 %v353_v0, 0.0  ;;  %v241_v5 = vadd.f32 %v781_v1, %v1234_v54  ;;  %v356_v6 = vadd.f32 %v821_v2, %v1234_v54 }
  0xfd   :  { %v1240_v7 = vmax.f32 %v267_v3, %v382_v4  ;;  %v268_v8 = vmax.f32 %v241_v5, 0.0  ;;  %v383_v9 = vmax.f32 %v356_v6, 0.0  ;;  %v782_v10 = vpop.f32.mrb[4].mxu0  ;;  %v822_v11 = vpop.f32.mrb[4].mxu1 }
  0xfe   :  { %v783_v12 = vpop.f32.mrb[5].mxu0  ;;  %v823_v13 = vpop.f32.mrb[5].mxu1 }
  0xff   :  { %v1242_v14 = vmax.f32 %v268_v8, %v383_v9  ;;  %v784_v15 = vadd.f32 %v783_v12, %v782_v10  ;;  %v824_v16 = vadd.f32 %v823_v13, %v822_v11  ;;  %v785_v17 = vpop.f32.mrb[6].mxu0  ;;  %v825_v18 = vpop.f32.mrb[6].mxu1 }
 0x100   :  { %v786_v19 = vpop.f32.mrb[7].mxu0  ;;  %v826_v20 = vpop.f32.mrb[7].mxu1 }
 0x101   :  { %v246_v21 = vadd.f32 %v784_v15, %v1234_v54  ;;  %v361_v22 = vadd.f32 %v824_v16, %v1234_v54  ;;  %v787_v23 = vadd.f32 %v786_v19, %v785_v17  ;;  %v827_v24 = vadd.f32 %v826_v20, %v825_v18 }
 0x103   :  { %v269_v25 = vmax.f32 %v246_v21, 0.0  ;;  %v384_v26 = vmax.f32 %v361_v22, 0.0  ;;  %v249_v27 = vadd.f32 %v787_v23, %v1234_v54  ;;  %v364_v28 = vadd.f32 %v827_v24, %v1234_v54 }
 0x105   :  { %v1248_v29 = vmax.f32 %v269_v25, %v384_v26  ;;  %v270_v30 = vmax.f32 %v249_v27, 0.0  ;;  %v385_v31 = vmax.f32 %v364_v28, 0.0  ;;  %v788_v32 = vpop.f32.mrb[8].mxu0  ;;  %v828_v33 = vpop.f32.mrb[8].mxu1 }
 0x106   :  { %v789_v34 = vpop.f32.mrb[9].mxu0  ;;  %v829_v35 = vpop.f32.mrb[9].mxu1 }
 0x107   :  { %v1250_v36 = vmax.f32 %v270_v30, %v385_v31  ;;  %v790_v37 = vadd.f32 %v789_v34, %v788_v32  ;;  %v830_v38 = vadd.f32 %v829_v35, %v828_v33  ;;  %v791_v39 = vpop.f32.mrb[10].mxu0  ;;  %v831_v40 = vpop.f32.mrb[10].mxu1 }
 0x108   :  { %v792_v41 = vpop.f32.mrb[11].mxu0  ;;  %v832_v42 = vpop.f32.mrb[11].mxu1 }
 0x109   :  { %v254_v43 = vadd.f32 %v790_v37, %v1234_v54  ;;  %v369_v44 = vadd.f32 %v830_v38, %v1234_v54  ;;  %v793_v45 = vadd.f32 %v792_v41, %v791_v39  ;;  %v833_v46 = vadd.f32 %v832_v42, %v831_v40 }
 0x10b   :  { %v271_v47 = vmax.f32 %v254_v43, 0.0  ;;  %v386_v48 = vmax.f32 %v369_v44, 0.0  ;;  %v257_v49 = vadd.f32 %v793_v45, %v1234_v54  ;;  %v372_v50 = vadd.f32 %v833_v46, %v1234_v54 }
 0x10d   :  { %v1256_v51 = vmax.f32 %v271_v47, %v386_v48  ;;  %v272_v52 = vmax.f32 %v257_v49, 0.0  ;;  %v387_v53 = vmax.f32 %v372_v50, 0.0  ;;  %v794_v55 = vpop.f32.mrb[12].mxu0  ;;  %v834_v56 = vpop.f32.mrb[12].mxu1 }
 0x10e   :  { %v795_v57 = vpop.f32.mrb[13].mxu0  ;;  %v835_v58 = vpop.f32.mrb[13].mxu1 }
 0x10f   :  { %v1258_v59 = vmax.f32 %v272_v52, %v387_v53  ;;  %v796_v60 = vadd.f32 %v795_v57, %v794_v55  ;;  %v836_v61 = vadd.f32 %v835_v58, %v834_v56  ;;  %v797_v62 = vpop.f32.mrb[14].mxu0  ;;  %v837_v63 = vpop.f32.mrb[14].mxu1 }
 0x110   :  { %v798_v0 = vpop.f32.mrb[15].mxu0  ;;  %v838_v1 = vpop.f32.mrb[15].mxu1 }
 0x111   :  { %v262_v2 = vadd.f32 %v796_v60, %v1234_v54  ;;  %v377_v3 = vadd.f32 %v836_v61, %v1234_v54 }
 0x113   :  { %v273_v4 = vmax.f32 %v262_v2, 0.0  ;;  %v388_v5 = vmax.f32 %v377_v3, 0.0 }
 0x115   :  { %v1262_v6 = vmax.f32 %v273_v4, %v388_v5  ;;  %v856_v8 = vpop.f32.mrb[16].mxu0  ;;  %v896_v9 = vpop.f32.mrb[16].mxu1 }
 0x116   :  { %v857_v10 = vpop.f32.mrb[17].mxu0  ;;  %v897_v11 = vpop.f32.mrb[17].mxu1 }
 0x117   :  { %v858_v12 = vadd.f32 %v857_v10, %v856_v8  ;;  %v898_v13 = vadd.f32 %v897_v11, %v896_v9  ;;  %v859_v15 = vpop.f32.mrb[18].mxu0  ;;  %v899_v16 = vpop.f32.mrb[18].mxu1 }
 0x118   :  { %v860_v17 = vpop.f32.mrb[19].mxu0  ;;  %v900_v18 = vpop.f32.mrb[19].mxu1 }
 0x119   :  { %v475_v19 = vadd.f32 %v858_v12, %v1234_v54  ;;  %v590_v20 = vadd.f32 %v898_v13, %v1234_v54  ;;  %v861_v21 = vadd.f32 %v860_v17, %v859_v15  ;;  %v901_v22 = vadd.f32 %v900_v18, %v899_v16 }
 0x11b   :  { %v504_v23 = vmax.f32 %v475_v19, 0.0  ;;  %v619_v24 = vmax.f32 %v590_v20, 0.0  ;;  %v478_v25 = vadd.f32 %v861_v21, %v1234_v54  ;;  %v593_v26 = vadd.f32 %v901_v22, %v1234_v54 }
 0x11d   :  { %v626_v27 = vmax.f32 %v504_v23, %v619_v24  ;;  %v505_v28 = vmax.f32 %v478_v25, 0.0  ;;  %v620_v30 = vmax.f32 %v593_v26, 0.0  ;;  %v862_v31 = vpop.f32.mrb[20].mxu0  ;;  %v902_v32 = vpop.f32.mrb[20].mxu1 }
 0x11e   :  { %v863_v33 = vpop.f32.mrb[21].mxu0  ;;  %v903_v34 = vpop.f32.mrb[21].mxu1 }
 0x11f   :  { %v633_v35 = vmax.f32 %v1240_v7, %v626_v27  ;;  %v627_v37 = vmax.f32 %v505_v28, %v620_v30  ;;  %v864_v38 = vadd.f32 %v863_v33, %v862_v31  ;;  %v904_v39 = vadd.f32 %v903_v34, %v902_v32  ;;  %v865_v40 = vpop.f32.mrb[22].mxu0  ;;  %v905_v41 = vpop.f32.mrb[22].mxu1 }
 0x120   :  { %v866_v42 = vpop.f32.mrb[23].mxu0  ;;  %v906_v43 = vpop.f32.mrb[23].mxu1 }
 0x121   :  { %v634_v44 = vmax.f32 %v1242_v14, %v627_v37  ;;  %v483_v45 = vadd.f32 %v864_v38, %v1234_v54  ;;  %v598_v46 = vadd.f32 %v904_v39, %v1234_v54  ;;  %v867_v47 = vadd.f32 %v866_v42, %v865_v40 }
 0x122   :  { %v907_v48 = vadd.f32 %v906_v43, %v905_v41 }
 0x123   :  { %v746_v49 = vpack.c.bf16 %v634_v44, %v633_v35  ;;  %v506_v50 = vmax.f32 %v483_v45, 0.0  ;;  %v621_v52 = vmax.f32 %v598_v46, 0.0  ;;  %v486_v7 = vadd.f32 %v867_v47, %v1234_v54 }
 0x124   :  { %v601_v53 = vadd.f32 %v907_v48, %v1234_v54 }
 0x125   :  { %747 = vst [vmem:[%s1303_s6] sm:$0xff] %v746_v49   ;;  %v628_v55 = vmax.f32 %v506_v50, %v621_v52  ;;  %v507_v56 = vmax.f32 %v486_v7, 0.0  ;;  %v868_v14 = vpop.f32.mrb[24].mxu0  ;;  %v908_v57 = vpop.f32.mrb[24].mxu1 }
 0x126   :  { %v622_v58 = vmax.f32 %v601_v53, 0.0  ;;  %v869_v60 = vpop.f32.mrb[25].mxu0  ;;  %v909_v61 = vpop.f32.mrb[25].mxu1 }
 0x127   :  { %v635_v62 = vmax.f32 %v1248_v29, %v628_v55  ;;  %v870_v63 = vadd.f32 %v869_v60, %v868_v14  ;;  %v910_v0 = vadd.f32 %v909_v61, %v908_v57  ;;  %v871_v1 = vpop.f32.mrb[26].mxu0  ;;  %v911_v2 = vpop.f32.mrb[26].mxu1 }
 0x128   :  { %v629_v3 = vmax.f32 %v507_v56, %v622_v58  ;;  %v872_v4 = vpop.f32.mrb[27].mxu0  ;;  %v912_v5 = vpop.f32.mrb[27].mxu1 }
 0x129   :  { %v491_v8 = vadd.f32 %v870_v63, %v1234_v54  ;;  %v606_v9 = vadd.f32 %v910_v0, %v1234_v54  ;;  %v873_v10 = vadd.f32 %v872_v4, %v871_v1  ;;  %v913_v11 = vadd.f32 %v912_v5, %v911_v2 }
 0x12a   :  { %v636_v12 = vmax.f32 %v1250_v36, %v629_v3 }
 0x12b   :  { %v508_v13 = vmax.f32 %v491_v8, 0.0  ;;  %v623_v15 = vmax.f32 %v606_v9, 0.0  ;;  %v494_v16 = vadd.f32 %v873_v10, %v1234_v54  ;;  %v609_v29 = vadd.f32 %v913_v11, %v1234_v54 }
 0x12c   :  { %v751_v17 = vpack.c.bf16 %v636_v12, %v635_v62 }
 0x12d   :  { %v630_v18 = vmax.f32 %v508_v13, %v623_v15  ;;  %v509_v19 = vmax.f32 %v494_v16, 0.0  ;;  %v624_v20 = vmax.f32 %v609_v29, 0.0  ;;  %v874_v21 = vpop.f32.mrb[28].mxu0  ;;  %v914_v22 = vpop.f32.mrb[28].mxu1 }
 0x12e   :  { %758 = vst [vmem:[%s1303_s6 + $0x8] sm:$0xff] %v751_v17   ;;  %v875_v23 = vpop.f32.mrb[29].mxu0  ;;  %v915_v24 = vpop.f32.mrb[29].mxu1 }
 0x12f   :  { %v637_v36 = vmax.f32 %v1256_v51, %v630_v18  ;;  %v631_v25 = vmax.f32 %v509_v19, %v624_v20  ;;  %v876_v26 = vadd.f32 %v875_v23, %v874_v21  ;;  %v916_v27 = vadd.f32 %v915_v24, %v914_v22  ;;  %v877_v28 = vpop.f32.mrb[30].mxu0  ;;  %v917_v30 = vpop.f32.mrb[30].mxu1 }
 0x130   :  { %v878_v31 = vpop.f32.mrb[31].mxu0  ;;  %v918_v32 = vpop.f32.mrb[31].mxu1 }
 0x131   :  { %v638_v33 = vmax.f32 %v1258_v59, %v631_v25  ;;  %v499_v34 = vadd.f32 %v876_v26, %v1234_v54  ;;  %v614_v35 = vadd.f32 %v916_v27, %v1234_v54 }
 0x133   :  { %v756_v37 = vpack.c.bf16 %v638_v33, %v637_v36  ;;  %v510_v38 = vmax.f32 %v499_v34, 0.0  ;;  %v625_v39 = vmax.f32 %v614_v35, 0.0 }
 0x135   :  { %759 = vst [vmem:[%s1303_s6 + $0x10] sm:$0xff] %v756_v37   ;;  %v632_v51 = vmax.f32 %v510_v38, %v625_v39 }
 0x137   :  { %v639_v40 = vmax.f32 %v1262_v6, %v632_v51 }
 0x139   :  { %v742_v41 = vpack.c.bf16 %v639_v40, %v639_v40 }
 0x13b   :  { %675 = vst [vmem:[%s1303_s6 + $0x18] sm:$0xf] %v742_v41 }

// kernel: net_forward.5
= control target key start
LH: loop header
LB: loop body
LE: loop exit
PB: predicated region body
PF: predicated region fallthrough
CT: control target
= control target key end

     0   :  { %vm3325_vm0 = vmmov 0   ;;  %s4095_s1 = inlined_call_operand.vmem [shape: bf16[3200,128], index: 1, kind: input, shape index: {}]   ;;  %s4096_s0 = inlined_call_operand.vmem [shape: bf16[8,3200], index: 0, kind: input, shape index: {}]   ;;  %s4097_s2 = inlined_call_operand.vmem [shape: f32[1,128], index: 2, kind: input, shape index: {}]   ;;  %s4098_s3 = inlined_call_operand.vmem [shape: bf16[128,128], index: 3, kind: input, shape index: {}]   ;;  %s4099_s5 = inlined_call_operand.vmem [shape: bf16[128,128], index: 5, kind: input, shape index: {}]   ;;  %s4100_s4 = inlined_call_operand.vmem [shape: f32[1,128], index: 4, kind: input, shape index: {}]   ;;  %s4101_s6 = inlined_call_operand.vmem [shape: f32[1,128], index: 6, kind: input, shape index: {}]   ;;  %s4102_s7 = inlined_call_operand.vmem [shape: f32[8,128], index: 7, kind: output, shape index: {}]  }
   0x1   :  { %v3083_v0 = vld [vmem:[%s4095_s1 + $0x40] sm:$0xff]   ;;  %v3087_v4 = vld [vmem:[%s4095_s1 + $0x48] sm:$0xff]   ;;  %v3091_v8 = vld [vmem:[%s4095_s1 + $0x50] sm:$0xff]  }
   0x2   :  { %v3084_v1 = vld [vmem:[%s4095_s1] sm:$0xff]   ;;  %2730 = vmatprep.subr.bf16.mxu0 %v3083_v0  ;;  %v3088_v5 = vld [vmem:[%s4095_s1 + $0x8] sm:$0xff]   ;;  %v3092_v9 = vld [vmem:[%s4095_s1 + $0x10] sm:$0xff]  }
   0x3   :  { %v3085_v2 = vld [vmem:[%s4095_s1 + $0xc0] sm:$0xff]   ;;  %2731 = vmatpush3.bf16.msra.mxu0 %v3084_v1  ;;  %v3089_v6 = vld [vmem:[%s4095_s1 + $0xc8] sm:$0xff]   ;;  %v3093_v10 = vld [vmem:[%s4095_s1 + $0xd0] sm:$0xff]  }
   0x4   :  { %v3086_v3 = vld [vmem:[%s4095_s1 + $0x80] sm:$0xff]   ;;  %2752 = vmatprep.subr.bf16.mxu1 %v3085_v2  ;;  %2732 = vmatprep.subr.bf16.mxu0 %v3087_v4  ;;  %v3090_v7 = vld [vmem:[%s4095_s1 + $0x88] sm:$0xff]   ;;  %v3094_v11 = vld [vmem:[%s4095_s1 + $0x90] sm:$0xff]  }
   0x5   :  { %2753 = vmatpush3.bf16.msra.mxu1 %v3086_v3  ;;  %v3095_v12 = vld [vmem:[%s4095_s1 + $0x58] sm:$0xff]   ;;  %v3099_v16 = vld [vmem:[%s4095_s1 + $0x60] sm:$0xff]   ;;  %v3103_v20 = vld [vmem:[%s4095_s1 + $0x68] sm:$0xff]  }
   0x6   :  { %2754 = vmatprep.subr.bf16.mxu1 %v3089_v6  ;;  %v3096_v13 = vld [vmem:[%s4095_s1 + $0x18] sm:$0xff]   ;;  %v3100_v17 = vld [vmem:[%s4095_s1 + $0x20] sm:$0xff]   ;;  %v3104_v21 = vld [vmem:[%s4095_s1 + $0x28] sm:$0xff]  }
   0x7   :  { %2733 = vmatpush3.bf16.msra.mxu0 %v3088_v5  ;;  %v3097_v14 = vld [vmem:[%s4095_s1 + $0xd8] sm:$0xff]   ;;  %v3101_v18 = vld [vmem:[%s4095_s1 + $0xe0] sm:$0xff]   ;;  %v3105_v22 = vld [vmem:[%s4095_s1 + $0xe8] sm:$0xff]  }
   0x8   :  { %2734 = vmatprep.subr.bf16.mxu0 %v3091_v8  ;;  %v3098_v15 = vld [vmem:[%s4095_s1 + $0x98] sm:$0xff]   ;;  %v3102_v19 = vld [vmem:[%s4095_s1 + $0xa0] sm:$0xff]   ;;  %v3106_v23 = vld [vmem:[%s4095_s1 + $0xa8] sm:$0xff]  }
   0x9   :  { %2755 = vmatpush3.bf16.msra.mxu1 %v3090_v7  ;;  %v3107_v24 = vld [vmem:[%s4095_s1 + $0x70] sm:$0xff]   ;;  %v3111_v28 = vld [vmem:[%s4095_s1 + $0x78] sm:$0xff]   ;;  %v27_v31 = vld [vmem:[%s4096_s0] sm:$0xff] }
   0xa   :  { %2756 = vmatprep.subr.bf16.mxu1 %v3093_v10  ;;  %v3108_v25 = vld [vmem:[%s4095_s1 + $0x30] sm:$0xff]   ;;  %v3112_v29 = vld [vmem:[%s4095_s1 + $0x38] sm:$0xff]   ;;  %v2487_v32 = vcombine.low %v27_v31, %v27_v31  ;;  %v2488_v33 = vcombine.high %v27_v31, %v27_v31  ;;  %v3117_v35 = vld [vmem:[%s4095_s1 + $0x140] sm:$0xff]  }
   0xb   :  { %2735 = vmatpush3.bf16.msra.mxu0 %v3092_v9  ;;  %v3109_v26 = vld [vmem:[%s4095_s1 + $0xf0] sm:$0xff]   ;;  %v3113_v30 = vld [vmem:[%s4095_s1 + $0xf8] sm:$0xff]   ;;  %v28_v36 = vld [vmem:[%s4096_s0 + $0x8] sm:$0xff] }
   0xc   :  { %2736 = vmatprep.subr.bf16.mxu0 %v3095_v12  ;;  %v3110_v27 = vld [vmem:[%s4095_s1 + $0xb0] sm:$0xff]   ;;  %v3116_v34 = vld [vmem:[%s4095_s1 + $0xb8] sm:$0xff]   ;;  %1767 = vmatprep.mubr.bf16.mxu0 %v2488_v33  ;;  %v2489_v37 = vcombine.low %v28_v36, %v28_v36  ;;  %v2490_v38 = vcombine.high %v28_v36, %v28_v36  ;;  %v3120_v39 = vld [vmem:[%s4095_s1 + $0x100] sm:$0xff]  }
   0xd   :  { %2757 = vmatpush3.bf16.msra.mxu1 %v3094_v11  ;;  %v3121_v40 = vld [vmem:[%s4095_s1 + $0x1c0] sm:$0xff]   ;;  %v3123_v42 = vld [vmem:[%s4095_s1 + $0x148] sm:$0xff]   ;;  %v3127_v46 = vld [vmem:[%s4095_s1 + $0x150] sm:$0xff]  }
   0xe   :  { %2758 = vmatprep.subr.bf16.mxu1 %v3097_v14  ;;  %1807 = vmatprep.mubr.bf16.mxu1 %v2490_v38  ;;  %v3122_v41 = vld [vmem:[%s4095_s1 + $0x180] sm:$0xff]   ;;  %v3124_v43 = vld [vmem:[%s4095_s1 + $0x108] sm:$0xff]   ;;  %v3128_v47 = vld [vmem:[%s4095_s1 + $0x110] sm:$0xff]  }
   0xf   :  { %2737 = vmatpush3.bf16.msra.mxu0 %v3096_v13  ;;  %v3125_v44 = vld [vmem:[%s4095_s1 + $0x1c8] sm:$0xff]   ;;  %v3129_v48 = vld [vmem:[%s4095_s1 + $0x1d0] sm:$0xff]   ;;  %v3131_v50 = vld [vmem:[%s4095_s1 + $0x158] sm:$0xff]  }
  0x10   :  { %2738 = vmatprep.subr.bf16.mxu0 %v3099_v16  ;;  %v3126_v45 = vld [vmem:[%s4095_s1 + $0x188] sm:$0xff]   ;;  %v3130_v49 = vld [vmem:[%s4095_s1 + $0x190] sm:$0xff]   ;;  %v3132_v51 = vld [vmem:[%s4095_s1 + $0x118] sm:$0xff]  }
  0x11   :  { %2759 = vmatpush3.bf16.msra.mxu1 %v3098_v15  ;;  %v3133_v52 = vld [vmem:[%s4095_s1 + $0x1d8] sm:$0xff]   ;;  %v3135_v54 = vld [vmem:[%s4095_s1 + $0x160] sm:$0xff]   ;;  %v3139_v58 = vld [vmem:[%s4095_s1 + $0x168] sm:$0xff]  }
  0x12   :  { %2760 = vmatprep.subr.bf16.mxu1 %v3101_v18  ;;  %v3134_v53 = vld [vmem:[%s4095_s1 + $0x198] sm:$0xff]   ;;  %v3136_v55 = vld [vmem:[%s4095_s1 + $0x120] sm:$0xff]   ;;  %v3140_v59 = vld [vmem:[%s4095_s1 + $0x128] sm:$0xff]  }
  0x13   :  { %2739 = vmatpush3.bf16.msra.mxu0 %v3100_v17  ;;  %v3137_v56 = vld [vmem:[%s4095_s1 + $0x1e0] sm:$0xff]   ;;  %v3141_v60 = vld [vmem:[%s4095_s1 + $0x1e8] sm:$0xff]   ;;  %v3143_v62 = vld [vmem:[%s4095_s1 + $0x170] sm:$0xff]  }
  0x14   :  { %2740 = vmatprep.subr.bf16.mxu0 %v3103_v20  ;;  %v3138_v57 = vld [vmem:[%s4095_s1 + $0x1a0] sm:$0xff]   ;;  %v3142_v61 = vld [vmem:[%s4095_s1 + $0x1a8] sm:$0xff]   ;;  %v3144_v63 = vld [vmem:[%s4095_s1 + $0x130] sm:$0xff]  }
  0x15   :  { %2761 = vmatpush3.bf16.msra.mxu1 %v3102_v19  ;;  %v3145_v0 = vld [vmem:[%s4095_s1 + $0x1f0] sm:$0xff]   ;;  %v3147_v2 = vld [vmem:[%s4095_s1 + $0x178] sm:$0xff]   ;;  %v3153_v9 = vld [vmem:[%s4095_s1 + $0x240] sm:$0xff]  }
  0x16   :  { %2762 = vmatprep.subr.bf16.mxu1 %v3105_v22  ;;  %v3146_v1 = vld [vmem:[%s4095_s1 + $0x1b0] sm:$0xff]   ;;  %v3148_v3 = vld [vmem:[%s4095_s1 + $0x138] sm:$0xff]   ;;  %v3156_v13 = vld [vmem:[%s4095_s1 + $0x200] sm:$0xff]  }
  0x17   :  { %2741 = vmatpush3.bf16.msra.mxu0 %v3104_v21  ;;  %v3149_v4 = vld [vmem:[%s4095_s1 + $0x1f8] sm:$0xff]   ;;  %v29_v5 = vld [vmem:[%s4096_s0 + $0x10] sm:$0xff]  ;;  %v3157_v14 = vld [vmem:[%s4095_s1 + $0x2c0] sm:$0xff]  }
  0x18   :  { %2742 = vmatprep.subr.bf16.mxu0 %v3107_v24  ;;  %v2491_v6 = vcombine.low %v29_v5, %v29_v5  ;;  %v2492_v7 = vcombine.high %v29_v5, %v29_v5  ;;  %v3152_v8 = vld [vmem:[%s4095_s1 + $0x1b8] sm:$0xff]   ;;  %v3158_v15 = vld [vmem:[%s4095_s1 + $0x280] sm:$0xff]   ;;  %v3159_v16 = vld [vmem:[%s4095_s1 + $0x248] sm:$0xff]  }
  0x19   :  { %2763 = vmatpush3.bf16.msra.mxu1 %v3106_v23  ;;  %v30_v10 = vld [vmem:[%s4096_s0 + $0x18] sm:$0xff]  ;;  %v3160_v17 = vld [vmem:[%s4095_s1 + $0x208] sm:$0xff]   ;;  %v3163_v20 = vld [vmem:[%s4095_s1 + $0x250] sm:$0xff]  }
  0x1a   :  { %2764 = vmatprep.subr.bf16.mxu1 %v3109_v26  ;;  %v2493_v11 = vcombine.low %v30_v10, %v30_v10  ;;  %v2494_v12 = vcombine.high %v30_v10, %v30_v10  ;;  %v3161_v18 = vld [vmem:[%s4095_s1 + $0x2c8] sm:$0xff]   ;;  %v3164_v21 = vld [vmem:[%s4095_s1 + $0x210] sm:$0xff]   ;;  %v3167_v24 = vld [vmem:[%s4095_s1 + $0x258] sm:$0xff]  }
  0x1b   :  { %2743 = vmatpush3.bf16.msra.mxu0 %v3108_v25  ;;  %v3162_v19 = vld [vmem:[%s4095_s1 + $0x288] sm:$0xff]   ;;  %v3165_v22 = vld [vmem:[%s4095_s1 + $0x2d0] sm:$0xff]   ;;  %v3168_v25 = vld [vmem:[%s4095_s1 + $0x218] sm:$0xff]  }
  0x1c   :  { %2744 = vmatprep.subr.bf16.mxu0 %v3111_v28  ;;  %v3166_v23 = vld [vmem:[%s4095_s1 + $0x290] sm:$0xff]   ;;  %v3169_v26 = vld [vmem:[%s4095_s1 + $0x2d8] sm:$0xff]   ;;  %v3171_v28 = vld [vmem:[%s4095_s1 + $0x260] sm:$0xff]  }
  0x1d   :  { %2765 = vmatpush3.bf16.msra.mxu1 %v3110_v27  ;;  %v3170_v27 = vld [vmem:[%s4095_s1 + $0x298] sm:$0xff]   ;;  %v3174_v31 = vld [vmem:[%s4095_s1 + $0x2a0] sm:$0xff]   ;;  %v3176_v33 = vld [vmem:[%s4095_s1 + $0x228] sm:$0xff]  }
  0x1e   :  { %2766 = vmatprep.subr.bf16.mxu1 %v3113_v30  ;;  %v3173_v30 = vld [vmem:[%s4095_s1 + $0x2e0] sm:$0xff]   ;;  %v3179_v36 = vld [vmem:[%s4095_s1 + $0x270] sm:$0xff]  }
  0x1f   :  { %2745 = vmatpush3.bf16.msra.mxu0 %v3112_v29  ;;  %v3172_v29 = vld [vmem:[%s4095_s1 + $0x220] sm:$0xff]   ;;  %v3181_v38 = vld [vmem:[%s4095_s1 + $0x2f0] sm:$0xff]  }
  0x20   :  { %2774 = vmatprep.subr.bf16.mxu0 %v3117_v35  ;;  %v3178_v35 = vld [vmem:[%s4095_s1 + $0x2a8] sm:$0xff]   ;;  %v3210_v5 = vld [vmem:[%s4095_s1 + $0x3a0] sm:$0xff]   ;;  %v3215_v10 = vld [vmem:[%s4095_s1 + $0x370] sm:$0xff]  }
  0x21   :  { %2767 = vmatpush3.bf16.msra.mxu1 %v3116_v34  ;;  %v3177_v34 = vld [vmem:[%s4095_s1 + $0x2e8] sm:$0xff]  }
  0x22   :  { %1768 = vmatmul.mubr.bf16.vlgmr.msra.gmra.mrb[0].mxu0 %v2487_v32  ;;  %2796 = vmatprep.subr.bf16.mxu1 %v3121_v40  ;;  %v3175_v32 = vld [vmem:[%s4095_s1 + $0x268] sm:$0xff]   ;;  %v3183_v40 = vld [vmem:[%s4095_s1 + $0x278] sm:$0xff]  }
  0x23   :  { %2775 = vmatpush3.bf16.msra.mxu0 %v3120_v39  ;;  %1847 = vmatprep.mubr.bf16.mxu0 %v2492_v7  ;;  %v3182_v39 = vld [vmem:[%s4095_s1 + $0x2b0] sm:$0xff]   ;;  %v3212_v7 = vld [vmem:[%s4095_s1 + $0x328] sm:$0xff]  }
  0x24   :  { %1808 = vmatmul.mubr.bf16.vlgmr.msra.gmra.mrb[0].mxu1 %v2489_v37  ;;  %2776 = vmatprep.subr.bf16.mxu0 %v3123_v42  ;;  %v3180_v37 = vld [vmem:[%s4095_s1 + $0x230] sm:$0xff]   ;;  %v3185_v42 = vld [vmem:[%s4095_s1 + $0x2f8] sm:$0xff]  }
  0x25   :  { %2797 = vmatpush3.bf16.msra.mxu1 %v3122_v41  ;;  %1887 = vmatprep.mubr.bf16.mxu1 %v2494_v12  ;;  %v3184_v41 = vld [vmem:[%s4095_s1 + $0x238] sm:$0xff]   ;;  %v3217_v12 = vld [vmem:[%s4095_s1 + $0x3f0] sm:$0xff]  }
  0x26   :  { %2798 = vmatprep.subr.bf16.mxu1 %v3125_v44 }
  0x27   :  { %2777 = vmatpush3.bf16.msra.mxu0 %v3124_v43  ;;  %v31_v43 = vld [vmem:[%s4096_s0 + $0x20] sm:$0xff] }
  0x28   :  { %2778 = vmatprep.subr.bf16.mxu0 %v3127_v46  ;;  %v2495_v44 = vcombine.low %v31_v43, %v31_v43  ;;  %v3188_v46 = vld [vmem:[%s4095_s1 + $0x2b8] sm:$0xff]  }
  0x29   :  { %2799 = vmatpush3.bf16.msra.mxu1 %v3126_v45  ;;  %v2496_v45 = vcombine.high %v31_v43, %v31_v43  ;;  %v3246_v43 = vld [vmem:[%s4095_s1 + $0x4a0] sm:$0xff]  }
  0x2a   :  { %2800 = vmatprep.subr.bf16.mxu1 %v3129_v48  ;;  %v32_v48 = vld [vmem:[%s4096_s0 + $0x28] sm:$0xff] }
  0x2b   :  { %2779 = vmatpush3.bf16.msra.mxu0 %v3128_v47  ;;  %v3189_v47 = vld [vmem:[%s4095_s1 + $0x340] sm:$0xff]  }
  0x2c   :  { %2780 = vmatprep.subr.bf16.mxu0 %v3131_v50  ;;  %v2498_v50 = vcombine.high %v32_v48, %v32_v48 }
  0x2d   :  { %2801 = vmatpush3.bf16.msra.mxu1 %v3130_v49  ;;  %v2497_v49 = vcombine.low %v32_v48, %v32_v48  ;;  %v3251_v48 = vld [vmem:[%s4095_s1 + $0x470] sm:$0xff]  }
  0x2e   :  { %2802 = vmatprep.subr.bf16.mxu1 %v3133_v52  ;;  %v3193_v52 = vld [vmem:[%s4095_s1 + $0x3c0] sm:$0xff]  }
  0x2f   :  { %2781 = vmatpush3.bf16.msra.mxu0 %v3132_v51  ;;  %v3192_v51 = vld [vmem:[%s4095_s1 + $0x300] sm:$0xff]  }
  0x30   :  { %2782 = vmatprep.subr.bf16.mxu0 %v3135_v54  ;;  %v3195_v54 = vld [vmem:[%s4095_s1 + $0x348] sm:$0xff]  }
  0x31   :  { %2803 = vmatpush3.bf16.msra.mxu1 %v3134_v53  ;;  %v3194_v53 = vld [vmem:[%s4095_s1 + $0x380] sm:$0xff]  }
  0x32   :  { %2804 = vmatprep.subr.bf16.mxu1 %v3137_v56  ;;  %v3197_v56 = vld [vmem:[%s4095_s1 + $0x3c8] sm:$0xff]  }
  0x33   :  { %2783 = vmatpush3.bf16.msra.mxu0 %v3136_v55  ;;  %v3196_v55 = vld [vmem:[%s4095_s1 + $0x308] sm:$0xff]  }
  0x34   :  { %2784 = vmatprep.subr.bf16.mxu0 %v3139_v58  ;;  %v3199_v58 = vld [vmem:[%s4095_s1 + $0x350] sm:$0xff]  }
  0x35   :  { %2805 = vmatpush3.bf16.msra.mxu1 %v3138_v57  ;;  %v3198_v57 = vld [vmem:[%s4095_s1 + $0x388] sm:$0xff]  }
  0x36   :  { %2806 = vmatprep.subr.bf16.mxu1 %v3141_v60  ;;  %v3201_v60 = vld [vmem:[%s4095_s1 + $0x3d0] sm:$0xff]  }
  0x37   :  { %2785 = vmatpush3.bf16.msra.mxu0 %v3140_v59  ;;  %v3200_v59 = vld [vmem:[%s4095_s1 + $0x310] sm:$0xff]  }
  0x38   :  { %2786 = vmatprep.subr.bf16.mxu0 %v3143_v62  ;;  %v3203_v62 = vld [vmem:[%s4095_s1 + $0x358] sm:$0xff]  }
  0x39   :  { %2807 = vmatpush3.bf16.msra.mxu1 %v3142_v61  ;;  %v3202_v61 = vld [vmem:[%s4095_s1 + $0x390] sm:$0xff]  }
  0x3a   :  { %2808 = vmatprep.subr.bf16.mxu1 %v3145_v0  ;;  %v3205_v0 = vld [vmem:[%s4095_s1 + $0x3d8] sm:$0xff]  }
  0x3b   :  { %2787 = vmatpush3.bf16.msra.mxu0 %v3144_v63  ;;  %v3204_v63 = vld [vmem:[%s4095_s1 + $0x318] sm:$0xff]  }
  0x3c   :  { %2788 = vmatprep.subr.bf16.mxu0 %v3147_v2  ;;  %v3207_v2 = vld [vmem:[%s4095_s1 + $0x360] sm:$0xff]  }
  0x3d   :  { %2809 = vmatpush3.bf16.msra.mxu1 %v3146_v1  ;;  %v3206_v1 = vld [vmem:[%s4095_s1 + $0x398] sm:$0xff]  }
  0x3e   :  { %2810 = vmatprep.subr.bf16.mxu1 %v3149_v4  ;;  %v3209_v4 = vld [vmem:[%s4095_s1 + $0x3e0] sm:$0xff]  }
  0x3f   :  { %2789 = vmatpush3.bf16.msra.mxu0 %v3148_v3  ;;  %v3208_v3 = vld [vmem:[%s4095_s1 + $0x320] sm:$0xff]  }
  0x40   :  { %2818 = vmatprep.subr.bf16.mxu0 %v3153_v9  ;;  %v3214_v9 = vld [vmem:[%s4095_s1 + $0x3a8] sm:$0xff]  }
  0x41   :  { %2811 = vmatpush3.bf16.msra.mxu1 %v3152_v8  ;;  %v3213_v8 = vld [vmem:[%s4095_s1 + $0x3e8] sm:$0xff]  }
  0x42   :  { %1848 = vmatmul.mubr.bf16.vlgmr.msra.gmra.mrb[4].mxu0 %v2491_v6  ;;  %2840 = vmatprep.subr.bf16.mxu1 %v3157_v14  ;;  %v3211_v6 = vld [vmem:[%s4095_s1 + $0x368] sm:$0xff]   ;;  %v3219_v14 = vld [vmem:[%s4095_s1 + $0x378] sm:$0xff]  }
  0x43   :  { %2819 = vmatpush3.bf16.msra.mxu0 %v3156_v13  ;;  %1927 = vmatprep.mubr.bf16.mxu0 %v2496_v45  ;;  %v3218_v13 = vld [vmem:[%s4095_s1 + $0x3b0] sm:$0xff]   ;;  %v3248_v45 = vld [vmem:[%s4095_s1 + $0x428] sm:$0xff]  }
  0x44   :  { %1888 = vmatmul.mubr.bf16.vlgmr.msra.gmra.mrb[4].mxu1 %v2493_v11  ;;  %2820 = vmatprep.subr.bf16.mxu0 %v3159_v16  ;;  %v3216_v11 = vld [vmem:[%s4095_s1 + $0x330] sm:$0xff]   ;;  %v3221_v16 = vld [vmem:[%s4095_s1 + $0x3f8] sm:$0xff]  }
  0x45   :  { %2841 = vmatpush3.bf16.msra.mxu1 %v3158_v15  ;;  %1967 = vmatprep.mubr.bf16.mxu1 %v2498_v50  ;;  %v3220_v15 = vld [vmem:[%s4095_s1 + $0x338] sm:$0xff]   ;;  %v3253_v50 = vld [vmem:[%s4095_s1 + $0x4f0] sm:$0xff]  }
  0x46   :  { %2842 = vmatprep.subr.bf16.mxu1 %v3161_v18 }
  0x47   :  { %2821 = vmatpush3.bf16.msra.mxu0 %v3160_v17  ;;  %v33_v17 = vld [vmem:[%s4096_s0 + $0x30] sm:$0xff] }
  0x48   :  { %2822 = vmatprep.subr.bf16.mxu0 %v3163_v20  ;;  %v2499_v18 = vcombine.low %v33_v17, %v33_v17  ;;  %v3224_v20 = vld [vmem:[%s4095_s1 + $0x3b8] sm:$0xff]  }
  0x49   :  { %2843 = vmatpush3.bf16.msra.mxu1 %v3162_v19  ;;  %v2500_v19 = vcombine.high %v33_v17, %v33_v17  ;;  %v3282_v17 = vld [vmem:[%s4095_s1 + $0x5a0] sm:$0xff]  }
  0x4a   :  { %2844 = vmatprep.subr.bf16.mxu1 %v3165_v22  ;;  %v34_v22 = vld [vmem:[%s4096_s0 + $0x38] sm:$0xff] }
  0x4b   :  { %2823 = vmatpush3.bf16.msra.mxu0 %v3164_v21  ;;  %v3225_v21 = vld [vmem:[%s4095_s1 + $0x440] sm:$0xff]  }
  0x4c   :  { %2824 = vmatprep.subr.bf16.mxu0 %v3167_v24  ;;  %v2502_v24 = vcombine.high %v34_v22, %v34_v22 }
  0x4d   :  { %2845 = vmatpush3.bf16.msra.mxu1 %v3166_v23  ;;  %v2501_v23 = vcombine.low %v34_v22, %v34_v22  ;;  %v3287_v22 = vld [vmem:[%s4095_s1 + $0x570] sm:$0xff]  }
  0x4e   :  { %2846 = vmatprep.subr.bf16.mxu1 %v3169_v26  ;;  %v3229_v26 = vld [vmem:[%s4095_s1 + $0x4c0] sm:$0xff]  }
  0x4f   :  { %2825 = vmatpush3.bf16.msra.mxu0 %v3168_v25  ;;  %v3228_v25 = vld [vmem:[%s4095_s1 + $0x400] sm:$0xff]  }
  0x50   :  { %2826 = vmatprep.subr.bf16.mxu0 %v3171_v28  ;;  %v3231_v28 = vld [vmem:[%s4095_s1 + $0x448] sm:$0xff]  }
  0x51   :  { %2847 = vmatpush3.bf16.msra.mxu1 %v3170_v27  ;;  %v3230_v27 = vld [vmem:[%s4095_s1 + $0x480] sm:$0xff]  }
  0x52   :  { %2848 = vmatprep.subr.bf16.mxu1 %v3173_v30  ;;  %v3233_v30 = vld [vmem:[%s4095_s1 + $0x4c8] sm:$0xff]  }
  0x53   :  { %2827 = vmatpush3.bf16.msra.mxu0 %v3172_v29  ;;  %v3232_v29 = vld [vmem:[%s4095_s1 + $0x408] sm:$0xff]  }
  0x54   :  { %2828 = vmatprep.subr.bf16.mxu0 %v3175_v32  ;;  %v3235_v32 = vld [vmem:[%s4095_s1 + $0x450] sm:$0xff]  }
  0x55   :  { %2849 = vmatpush3.bf16.msra.mxu1 %v3174_v31  ;;  %v3234_v31 = vld [vmem:[%s4095_s1 + $0x488] sm:$0xff]  }
  0x56   :  { %2850 = vmatprep.subr.bf16.mxu1 %v3177_v34  ;;  %v3237_v34 = vld [vmem:[%s4095_s1 + $0x4d0] sm:$0xff]  }
  0x57   :  { %2829 = vmatpush3.bf16.msra.mxu0 %v3176_v33  ;;  %v3236_v33 = vld [vmem:[%s4095_s1 + $0x410] sm:$0xff]  }
  0x58   :  { %2830 = vmatprep.subr.bf16.mxu0 %v3179_v36  ;;  %v3239_v36 = vld [vmem:[%s4095_s1 + $0x458] sm:$0xff]  }
  0x59   :  { %2851 = vmatpush3.bf16.msra.mxu1 %v3178_v35  ;;  %v3238_v35 = vld [vmem:[%s4095_s1 + $0x490] sm:$0xff]  }
  0x5a   :  { %2852 = vmatprep.subr.bf16.mxu1 %v3181_v38  ;;  %v3241_v38 = vld [vmem:[%s4095_s1 + $0x4d8] sm:$0xff]  }
  0x5b   :  { %2831 = vmatpush3.bf16.msra.mxu0 %v3180_v37  ;;  %v3240_v37 = vld [vmem:[%s4095_s1 + $0x418] sm:$0xff]  }
  0x5c   :  { %2832 = vmatprep.subr.bf16.mxu0 %v3183_v40  ;;  %v3243_v40 = vld [vmem:[%s4095_s1 + $0x460] sm:$0xff]  }
  0x5d   :  { %2853 = vmatpush3.bf16.msra.mxu1 %v3182_v39  ;;  %v3242_v39 = vld [vmem:[%s4095_s1 + $0x498] sm:$0xff]  }
  0x5e   :  { %2854 = vmatprep.subr.bf16.mxu1 %v3185_v42  ;;  %v3245_v42 = vld [vmem:[%s4095_s1 + $0x4e0] sm:$0xff]  }
  0x5f   :  { %2833 = vmatpush3.bf16.msra.mxu0 %v3184_v41  ;;  %v3244_v41 = vld [vmem:[%s4095_s1 + $0x420] sm:$0xff]  }
  0x60   :  { %2862 = vmatprep.subr.bf16.mxu0 %v3189_v47  ;;  %v3250_v47 = vld [vmem:[%s4095_s1 + $0x4a8] sm:$0xff]  }
  0x61   :  { %2855 = vmatpush3.bf16.msra.mxu1 %v3188_v46  ;;  %v3249_v46 = vld [vmem:[%s4095_s1 + $0x4e8] sm:$0xff]  }
  0x62   :  { %1928 = vmatmul.mubr.bf16.vlgmr.msra.gmra.mrb[8].mxu0 %v2495_v44  ;;  %2884 = vmatprep.subr.bf16.mxu1 %v3193_v52  ;;  %v3247_v44 = vld [vmem:[%s4095_s1 + $0x468] sm:$0xff]   ;;  %v3255_v52 = vld [vmem:[%s4095_s1 + $0x478] sm:$0xff]  }
  0x63   :  { %2863 = vmatpush3.bf16.msra.mxu0 %v3192_v51  ;;  %2007 = vmatprep.mubr.bf16.mxu0 %v2500_v19  ;;  %v3254_v51 = vld [vmem:[%s4095_s1 + $0x4b0] sm:$0xff]   ;;  %v3284_v19 = vld [vmem:[%s4095_s1 + $0x528] sm:$0xff]  }
  0x64   :  { %1968 = vmatmul.mubr.bf16.vlgmr.msra.gmra.mrb[8].mxu1 %v2497_v49  ;;  %2864 = vmatprep.subr.bf16.mxu0 %v3195_v54  ;;  %v3252_v49 = vld [vmem:[%s4095_s1 + $0x430] sm:$0xff]   ;;  %v3257_v54 = vld [vmem:[%s4095_s1 + $0x4f8] sm:$0xff]  }
  0x65   :  { %2885 = vmatpush3.bf16.msra.mxu1 %v3194_v53  ;;  %2047 = vmatprep.mubr.bf16.mxu1 %v2502_v24  ;;  %v3256_v53 = vld [vmem:[%s4095_s1 + $0x438] sm:$0xff]   ;;  %v3289_v24 = vld [vmem:[%s4095_s1 + $0x5f0] sm:$0xff]  }
  0x66   :  { %2886 = vmatprep.subr.bf16.mxu1 %v3197_v56 }
  0x67   :  { %2865 = vmatpush3.bf16.msra.mxu0 %v3196_v55  ;;  %v35_v55 = vld [vmem:[%s4096_s0 + $0x40] sm:$0xff] }
  0x68   :  { %2866 = vmatprep.subr.bf16.mxu0 %v3199_v58  ;;  %v2503_v56 = vcombine.low %v35_v55, %v35_v55  ;;  %v3260_v58 = vld [vmem:[%s4095_s1 + $0x4b8] sm:$0xff]  }
  0x69   :  { %2887 = vmatpush3.bf16.msra.mxu1 %v3198_v57  ;;  %v2504_v57 = vcombine.high %v35_v55, %v35_v55 }
  0x6a   :  { %2888 = vmatprep.subr.bf16.mxu1 %v3201_v60  ;;  %v36_v60 = vld [vmem:[%s4096_s0 + $0x48] sm:$0xff] }
  0x6b   :  { %2867 = vmatpush3.bf16.msra.mxu0 %v3200_v59  ;;  %v3261_v59 = vld [vmem:[%s4095_s1 + $0x540] sm:$0xff]  }
  0x6c   :  { %2868 = vmatprep.subr.bf16.mxu0 %v3203_v62  ;;  %v2506_v62 = vcombine.high %v36_v60, %v36_v60 }
  0x6d   :  { %2889 = vmatpush3.bf16.msra.mxu1 %v3202_v61  ;;  %v2505_v61 = vcombine.low %v36_v60, %v36_v60 }
  0x6e   :  { %2890 = vmatprep.subr.bf16.mxu1 %v3205_v0  ;;  %v3265_v0 = vld [vmem:[%s4095_s1 + $0x5c0] sm:$0xff]  }
  0x6f   :  { %2869 = vmatpush3.bf16.msra.mxu0 %v3204_v63  ;;  %v3264_v63 = vld [vmem:[%s4095_s1 + $0x500] sm:$0xff]  }
  0x70   :  { %2870 = vmatprep.subr.bf16.mxu0 %v3207_v2  ;;  %v3267_v2 = vld [vmem:[%s4095_s1 + $0x548] sm:$0xff]  }
  0x71   :  { %2891 = vmatpush3.bf16.msra.mxu1 %v3206_v1  ;;  %v3266_v1 = vld [vmem:[%s4095_s1 + $0x580] sm:$0xff]  }
  0x72   :  { %2892 = vmatprep.subr.bf16.mxu1 %v3209_v4  ;;  %v3269_v4 = vld [vmem:[%s4095_s1 + $0x5c8] sm:$0xff]  }
  0x73   :  { %2871 = vmatpush3.bf16.msra.mxu0 %v3208_v3  ;;  %v3268_v3 = vld [vmem:[%s4095_s1 + $0x508] sm:$0xff]  }
  0x74   :  { %2872 = vmatprep.subr.bf16.mxu0 %v3211_v6  ;;  %v3271_v6 = vld [vmem:[%s4095_s1 + $0x550] sm:$0xff]  }
  0x75   :  { %2893 = vmatpush3.bf16.msra.mxu1 %v3210_v5  ;;  %v3270_v5 = vld [vmem:[%s4095_s1 + $0x588] sm:$0xff]  }
  0x76   :  { %2894 = vmatprep.subr.bf16.mxu1 %v3213_v8  ;;  %v3273_v8 = vld [vmem:[%s4095_s1 + $0x5d0] sm:$0xff]  }
  0x77   :  { %2873 = vmatpush3.bf16.msra.mxu0 %v3212_v7  ;;  %v3272_v7 = vld [vmem:[%s4095_s1 + $0x510] sm:$0xff]  }
  0x78   :  { %2874 = vmatprep.subr.bf16.mxu0 %v3215_v10  ;;  %v3275_v10 = vld [vmem:[%s4095_s1 + $0x558] sm:$0xff]  }
  0x79   :  { %2895 = vmatpush3.bf16.msra.mxu1 %v3214_v9  ;;  %v3274_v9 = vld [vmem:[%s4095_s1 + $0x590] sm:$0xff]  }
  0x7a   :  { %2896 = vmatprep.subr.bf16.mxu1 %v3217_v12  ;;  %v3277_v12 = vld [vmem:[%s4095_s1 + $0x5d8] sm:$0xff]  }
  0x7b   :  { %2875 = vmatpush3.bf16.msra.mxu0 %v3216_v11  ;;  %v3276_v11 = vld [vmem:[%s4095_s1 + $0x518] sm:$0xff]  }
  0x7c   :  { %2876 = vmatprep.subr.bf16.mxu0 %v3219_v14  ;;  %v3279_v14 = vld [vmem:[%s4095_s1 + $0x560] sm:$0xff]  }
  0x7d   :  { %2897 = vmatpush3.bf16.msra.mxu1 %v3218_v13  ;;  %v3278_v13 = vld [vmem:[%s4095_s1 + $0x598] sm:$0xff]  }
  0x7e   :  { %2898 = vmatprep.subr.bf16.mxu1 %v3221_v16  ;;  %v3281_v16 = vld [vmem:[%s4095_s1 + $0x5e0] sm:$0xff]  }
  0x7f   :  { %2877 = vmatpush3.bf16.msra.mxu0 %v3220_v15  ;;  %v3280_v15 = vld [vmem:[%s4095_s1 + $0x520] sm:$0xff]  }
  0x80   :  { %2906 = vmatprep.subr.bf16.mxu0 %v3225_v21  ;;  %v3286_v21 = vld [vmem:[%s4095_s1 + $0x5a8] sm:$0xff]  }
  0x81   :  { %2899 = vmatpush3.bf16.msra.mxu1 %v3224_v20  ;;  %v3285_v20 = vld [vmem:[%s4095_s1 + $0x5e8] sm:$0xff]  }
  0x82   :  { %2008 = vmatmul.mubr.bf16.vlgmr.msra.gmra.mrb[12].mxu0 %v2499_v18  ;;  %2928 = vmatprep.subr.bf16.mxu1 %v3229_v26  ;;  %v3283_v18 = vld [vmem:[%s4095_s1 + $0x568] sm:$0xff]   ;;  %v3291_v26 = vld [vmem:[%s4095_s1 + $0x578] sm:$0xff]  }
  0x83   :  { %2907 = vmatpush3.bf16.msra.mxu0 %v3228_v25  ;;  %2087 = vmatprep.mubr.bf16.mxu0 %v2504_v57  ;;  %v3290_v25 = vld [vmem:[%s4095_s1 + $0x5b0] sm:$0xff]  }
  0x84   :  { %2048 = vmatmul.mubr.bf16.vlgmr.msra.gmra.mrb[12].mxu1 %v2501_v23  ;;  %2908 = vmatprep.subr.bf16.mxu0 %v3231_v28  ;;  %v3288_v23 = vld [vmem:[%s4095_s1 + $0x530] sm:$0xff]   ;;  %v3293_v28 = vld [vmem:[%s4095_s1 + $0x5f8] sm:$0xff]  }
  0x85   :  { %2929 = vmatpush3.bf16.msra.mxu1 %v3230_v27  ;;  %2127 = vmatprep.mubr.bf16.mxu1 %v2506_v62  ;;  %v3292_v27 = vld [vmem:[%s4095_s1 + $0x538] sm:$0xff]  }
  0x86   :  { %2930 = vmatprep.subr.bf16.mxu1 %v3233_v30 }
  0x87   :  { %2909 = vmatpush3.bf16.msra.mxu0 %v3232_v29  ;;  %v37_v29 = vld [vmem:[%s4096_s0 + $0x50] sm:$0xff] }
  0x88   :  { %2910 = vmatprep.subr.bf16.mxu0 %v3235_v32  ;;  %v2507_v30 = vcombine.low %v37_v29, %v37_v29  ;;  %v3296_v32 = vld [vmem:[%s4095_s1 + $0x5b8] sm:$0xff]  }
  0x89   :  { %2931 = vmatpush3.bf16.msra.mxu1 %v3234_v31  ;;  %v2508_v31 = vcombine.high %v37_v29, %v37_v29  ;;  %v3318_v29 = vld [vmem:[%s4099_s5 + $0x10] sm:$0xff]  }
  0x8a   :  { %2932 = vmatprep.subr.bf16.mxu1 %v3237_v34  ;;  %v3324_v34 = vmov 0.0  }
  0x8b   :  { %2911 = vmatpush3.bf16.msra.mxu0 %v3236_v33  ;;  %v38_v33 = vld [vmem:[%s4096_s0 + $0x58] sm:$0xff] }
  0x8c   :  { %2912 = vmatprep.subr.bf16.mxu0 %v3239_v36  ;;  %v2510_v36 = vcombine.high %v38_v33, %v38_v33 }
  0x8d   :  { %2933 = vmatpush3.bf16.msra.mxu1 %v3238_v35  ;;  %v2509_v35 = vcombine.low %v38_v33, %v38_v33 }
  0x8e   :  { %2934 = vmatprep.subr.bf16.mxu1 %v3241_v38  ;;  %v3300_v38 = vld [vmem:[%s4095_s1 + $0x608] sm:$0xff]  }
  0x8f   :  { %2913 = vmatpush3.bf16.msra.mxu0 %v3240_v37  ;;  %v3299_v37 = vld [vmem:[%s4095_s1 + $0x600] sm:$0xff]  }
  0x90   :  { %2914 = vmatprep.subr.bf16.mxu0 %v3243_v40  ;;  %v3302_v40 = vld [vmem:[%s4095_s1 + $0x618] sm:$0xff]  }
  0x91   :  { %2935 = vmatpush3.bf16.msra.mxu1 %v3242_v39  ;;  %v3301_v39 = vld [vmem:[%s4095_s1 + $0x610] sm:$0xff]  }
  0x92   :  { %2936 = vmatprep.subr.bf16.mxu1 %v3245_v42  ;;  %v3304_v42 = vld [vmem:[%s4095_s1 + $0x628] sm:$0xff]  }
  0x93   :  { %2915 = vmatpush3.bf16.msra.mxu0 %v3244_v41  ;;  %v3303_v41 = vld [vmem:[%s4095_s1 + $0x620] sm:$0xff]  }
  0x94   :  { %2916 = vmatprep.subr.bf16.mxu0 %v3247_v44  ;;  %v3306_v44 = vld [vmem:[%s4095_s1 + $0x638] sm:$0xff]  }
  0x95   :  { %2937 = vmatpush3.bf16.msra.mxu1 %v3246_v43  ;;  %v3305_v43 = vld [vmem:[%s4095_s1 + $0x630] sm:$0xff]  }
  0x96   :  { %2938 = vmatprep.subr.bf16.mxu1 %v3249_v46 }
  0x97   :  { %2917 = vmatpush3.bf16.msra.mxu0 %v3248_v45  ;;  %v3307_v45 = vld [vmem:[%s4096_s0 + $0x60] ss:$0 sps:$4 sm:$0xff]  }
  0x98   :  { %2918 = vmatprep.subr.bf16.mxu0 %v3251_v48 }
  0x99   :  { %2939 = vmatpush3.bf16.msra.mxu1 %v3250_v47  ;;  %v2486_v47 = vld [vmem:[%s4097_s2] ss:$0 sm:$0xff] }
  0x9a   :  { %2940 = vmatprep.subr.bf16.mxu1 %v3253_v50 }
  0x9b   :  { %2919 = vmatpush3.bf16.msra.mxu0 %v3252_v49 }
  0x9c   :  { %2920 = vmatprep.subr.bf16.mxu0 %v3255_v52 }
  0x9d   :  { %2941 = vmatpush3.bf16.msra.mxu1 %v3254_v51 }
  0x9e   :  { %2942 = vmatprep.subr.bf16.mxu1 %v3257_v54 }
  0x9f   :  { %2921 = vmatpush3.bf16.msra.mxu0 %v3256_v53 }
  0xa0   :  { %2950 = vmatprep.subr.bf16.mxu0 %v3261_v59 }
  0xa1   :  { %2943 = vmatpush3.bf16.msra.mxu1 %v3260_v58 }
  0xa2   :  { %2088 = vmatmul.mubr.bf16.vlgmr.msra.gmra.mrb[16].mxu0 %v2503_v56  ;;  %2972 = vmatprep.subr.bf16.mxu1 %v3265_v0 }
  0xa3   :  { %2951 = vmatpush3.bf16.msra.mxu0 %v3264_v63  ;;  %2167 = vmatprep.mubr.bf16.mxu0 %v2508_v31  ;;  %v3320_v31 = vld [vmem:[%s4099_s5 + $0x20] sm:$0xff]  }
  0xa4   :  { %2128 = vmatmul.mubr.bf16.vlgmr.msra.gmra.mrb[16].mxu1 %v2505_v61  ;;  %2952 = vmatprep.subr.bf16.mxu0 %v3267_v2 }
  0xa5   :  { %2973 = vmatpush3.bf16.msra.mxu1 %v3266_v1  ;;  %2207 = vmatprep.mubr.bf16.mxu1 %v2510_v36 }
  0xa6   :  { %2974 = vmatprep.subr.bf16.mxu1 %v3269_v4 }
  0xa7   :  { %2953 = vmatpush3.bf16.msra.mxu0 %v3268_v3 }
  0xa8   :  { %2954 = vmatprep.subr.bf16.mxu0 %v3271_v6 }
  0xa9   :  { %2975 = vmatpush3.bf16.msra.mxu1 %v3270_v5 }
  0xaa   :  { %2976 = vmatprep.subr.bf16.mxu1 %v3273_v8  ;;  %v3309_v8 = vld [vmem:[%s4098_s3 + $0x8] sm:$0xff]  }
  0xab   :  { %2955 = vmatpush3.bf16.msra.mxu0 %v3272_v7  ;;  %v3308_v7 = vld [vmem:[%s4098_s3] sm:$0xff]  }
  0xac   :  { %2956 = vmatprep.subr.bf16.mxu0 %v3275_v10  ;;  %v3311_v10 = vld [vmem:[%s4098_s3 + $0x18] sm:$0xff]  }
  0xad   :  { %2977 = vmatpush3.bf16.msra.mxu1 %v3274_v9  ;;  %v3310_v9 = vld [vmem:[%s4098_s3 + $0x10] sm:$0xff]  }
  0xae   :  { %2978 = vmatprep.subr.bf16.mxu1 %v3277_v12  ;;  %v3313_v12 = vld [vmem:[%s4098_s3 + $0x28] sm:$0xff]  }
  0xaf   :  { %2957 = vmatpush3.bf16.msra.mxu0 %v3276_v11  ;;  %v3312_v11 = vld [vmem:[%s4098_s3 + $0x20] sm:$0xff]  }
  0xb0   :  { %2958 = vmatprep.subr.bf16.mxu0 %v3279_v14  ;;  %v3314_v14 = vld [vmem:[%s4098_s3 + $0x30] sm:$0xff]  }
  0xb1   :  { %2979 = vmatpush3.bf16.msra.mxu1 %v3278_v13 }
  0xb2   :  { %2980 = vmatprep.subr.bf16.mxu1 %v3281_v16 }
  0xb3   :  { %2959 = vmatpush3.bf16.msra.mxu0 %v3280_v15 }
  0xb4   :  { %2960 = vmatprep.subr.bf16.mxu0 %v3283_v18 }
  0xb5   :  { %2981 = vmatpush3.bf16.msra.mxu1 %v3282_v17 }
  0xb6   :  { %2982 = vmatprep.subr.bf16.mxu1 %v3285_v20 }
  0xb7   :  { %2961 = vmatpush3.bf16.msra.mxu0 %v3284_v19 }
  0xb8   :  { %2962 = vmatprep.subr.bf16.mxu0 %v3287_v22 }
  0xb9   :  { %2983 = vmatpush3.bf16.msra.mxu1 %v3286_v21 }
  0xba   :  { %2984 = vmatprep.subr.bf16.mxu1 %v3289_v24  ;;  %v3315_v24 = vld [vmem:[%s4098_s3 + $0x38] sm:$0xff]  }
  0xbb   :  { %2963 = vmatpush3.bf16.msra.mxu0 %v3288_v23 }
  0xbc   :  { %2964 = vmatprep.subr.bf16.mxu0 %v3291_v26 }
  0xbd   :  { %2985 = vmatpush3.bf16.msra.mxu1 %v3290_v25 }
  0xbe   :  { %2986 = vmatprep.subr.bf16.mxu1 %v3293_v28  ;;  %v3317_v28 = vld [vmem:[%s4099_s5 + $0x8] sm:$0xff]  }
  0xbf   :  { %2965 = vmatpush3.bf16.msra.mxu0 %v3292_v27  ;;  %v3316_v27 = vld [vmem:[%s4099_s5] sm:$0xff]  }
  0xc0   :  { %3021 = vmatprep.subr.bf16.mxu0 %v3324_v34 }
  0xc1   :  { %2987 = vmatpush3.bf16.msra.mxu1 %v3296_v32  ;;  %v3321_v32 = vld [vmem:[%s4099_s5 + $0x28] sm:$0xff]  }
  0xc2   :  { %2168 = vmatmul.mubr.bf16.vlgmr.msra.gmra.mrb[20].mxu0 %v2507_v30  ;;  %3041 = vmatprep.subr.bf16.mxu1 %v3324_v34  ;;  %v3319_v30 = vld [vmem:[%s4099_s5 + $0x18] sm:$0xff]  }
  0xc3   :  { %3022 = vmatpush3.bf16.msra.mxu0 %v3299_v37  ;;  %3037 = vmatprep.mubr.msk.bf16.mxu0 %vm3325_vm0, %v3324_v34 }
  0xc4   :  { %2208 = vmatmul.mubr.bf16.vlgmr.msra.gmra.mrb[20].mxu1 %v2509_v35  ;;  %3023 = vmatprep.subr.bf16.mxu0 %v3324_v34 }
  0xc5   :  { %3057 = vmatprep.mubr.msk.bf16.mxu1 %vm3325_vm0, %v3324_v34  ;;  %3042 = vmatpush3.bf16.msra.mxu1 %v3308_v7 }
  0xc6   :  { %3043 = vmatprep.subr.bf16.mxu1 %v3324_v34 }
  0xc7   :  { %3024 = vmatpush3.bf16.msra.mxu0 %v3300_v38 }
  0xc8   :  { %3025 = vmatprep.subr.bf16.mxu0 %v3324_v34 }
  0xc9   :  { %3044 = vmatpush3.bf16.msra.mxu1 %v3309_v8 }
  0xca   :  { %3045 = vmatprep.subr.bf16.mxu1 %v3324_v34 }
  0xcb   :  { %3026 = vmatpush3.bf16.msra.mxu0 %v3301_v39 }
  0xcc   :  { %3027 = vmatprep.subr.bf16.mxu0 %v3324_v34 }
  0xcd   :  { %3046 = vmatpush3.bf16.msra.mxu1 %v3310_v9 }
  0xce   :  { %3047 = vmatprep.subr.bf16.mxu1 %v3324_v34 }
  0xcf   :  { %3028 = vmatpush3.bf16.msra.mxu0 %v3302_v40 }
  0xd0   :  { %3029 = vmatprep.subr.bf16.mxu0 %v3324_v34 }
  0xd1   :  { %3048 = vmatpush3.bf16.msra.mxu1 %v3311_v10 }
  0xd2   :  { %3049 = vmatprep.subr.bf16.mxu1 %v3324_v34 }
  0xd3   :  { %3030 = vmatpush3.bf16.msra.mxu0 %v3303_v41 }
  0xd4   :  { %3031 = vmatprep.subr.bf16.mxu0 %v3324_v34 }
  0xd5   :  { %3050 = vmatpush3.bf16.msra.mxu1 %v3312_v11 }
  0xd6   :  { %3051 = vmatprep.subr.bf16.mxu1 %v3324_v34 }
  0xd7   :  { %3032 = vmatpush3.bf16.msra.mxu0 %v3304_v42 }
  0xd8   :  { %3033 = vmatprep.subr.bf16.mxu0 %v3324_v34 }
  0xd9   :  { %3052 = vmatpush3.bf16.msra.mxu1 %v3313_v12 }
  0xda   :  { %3053 = vmatprep.subr.bf16.mxu1 %v3324_v34 }
  0xdb   :  { %3034 = vmatpush3.bf16.msra.mxu0 %v3305_v43 }
  0xdc   :  { %3035 = vmatprep.subr.bf16.mxu0 %v3324_v34 }
  0xdd   :  { %3054 = vmatpush3.bf16.msra.mxu1 %v3314_v14  ;;  %v3323_v14 = vld [vmem:[%s4099_s5 + $0x38] sm:$0xff]  }
  0xde   :  { %3055 = vmatprep.subr.bf16.mxu1 %v3324_v34 }
  0xdf   :  { %3036 = vmatpush3.bf16.msra.mxu0 %v3306_v44 }
  0xe0   :  { %3061 = vmatprep.subr.bf16.mxu0 %v3324_v34 }
  0xe1   :  { %3056 = vmatpush3.bf16.msra.mxu1 %v3315_v24 }
  0xe2   :  { %3038 = vmatmul.mubr.bf16.vlgmr.msra.gmra.mrb[24].mxu0 %v3307_v45 }
  0xe3   :  { %3077 = vmatprep.mubr.msk.bf16.mxu0 %vm3325_vm0, %v3324_v34  ;;  %3062 = vmatpush3.bf16.msra.mxu0 %v3316_v27 }
  0xe4   :  { %3063 = vmatprep.subr.bf16.mxu0 %v3324_v34 }
  0xe7   :  { %3064 = vmatpush3.bf16.msra.mxu0 %v3317_v28 }
  0xe8   :  { %3065 = vmatprep.subr.bf16.mxu0 %v3324_v34 }
  0xeb   :  { %3066 = vmatpush3.bf16.msra.mxu0 %v3318_v29 }
  0xec   :  { %3067 = vmatprep.subr.bf16.mxu0 %v3324_v34 }
  0xef   :  { %3068 = vmatpush3.bf16.msra.mxu0 %v3319_v30 }
  0xf0   :  { %3069 = vmatprep.subr.bf16.mxu0 %v3324_v34 }
  0xf3   :  { %3070 = vmatpush3.bf16.msra.mxu0 %v3320_v31 }
  0xf4   :  { %3071 = vmatprep.subr.bf16.mxu0 %v3324_v34 }
  0xf5   :  { %v2746_v46 = vpop.f32.mrb[0].mxu0 }
  0xf6   :  { %v2747_v48 = vpop.f32.mrb[1].mxu0 }
  0xf7   :  { %v2748_v49 = vadd.f32 %v2747_v48, %v2746_v46  ;;  %v2749_v50 = vpop.f32.mrb[2].mxu0  ;;  %v2768_v51 = vpop.f32.mrb[0].mxu1  ;;  %3072 = vmatpush3.bf16.msra.mxu0 %v3321_v32 }
  0xf8   :  { %v2750_v52 = vpop.f32.mrb[3].mxu0  ;;  %v2769_v53 = vpop.f32.mrb[1].mxu1  ;;  %3073 = vmatprep.subr.bf16.mxu0 %v3324_v34 }
  0xf9   :  { %v1770_v54 = vadd.f32 %v2748_v49, %v2486_v47  ;;  %v2770_v55 = vadd.f32 %v2769_v53, %v2768_v51  ;;  %v2771_v56 = vpop.f32.mrb[2].mxu1 }
  0xfa   :  { %v2772_v57 = vpop.f32.mrb[3].mxu1 }
  0xfb   :  { %v1810_v58 = vadd.f32 %v2770_v55, %v1770_v54 }
 0x115   :  { %v2790_v59 = vpop.f32.mrb[4].mxu0 }
 0x116   :  { %v2791_v60 = vpop.f32.mrb[5].mxu0 }
 0x117   :  { %v2792_v61 = vadd.f32 %v2791_v60, %v2790_v59  ;;  %v2793_v62 = vpop.f32.mrb[6].mxu0  ;;  %v2812_v63 = vpop.f32.mrb[4].mxu1 }
 0x118   :  { %v2794_v0 = vpop.f32.mrb[7].mxu0  ;;  %v2813_v2 = vpop.f32.mrb[5].mxu1 }
 0x119   :  { %v1850_v1 = vadd.f32 %v2792_v61, %v1810_v58  ;;  %v2814_v3 = vadd.f32 %v2813_v2, %v2812_v63  ;;  %v2815_v4 = vpop.f32.mrb[6].mxu1 }
 0x11a   :  { %v2816_v5 = vpop.f32.mrb[7].mxu1 }
 0x11b   :  { %v1890_v6 = vadd.f32 %v2814_v3, %v1850_v1 }
 0x135   :  { %v2834_v13 = vpop.f32.mrb[8].mxu0 }
 0x136   :  { %v2835_v15 = vpop.f32.mrb[9].mxu0 }
 0x137   :  { %v2836_v16 = vadd.f32 %v2835_v15, %v2834_v13  ;;  %v2837_v17 = vpop.f32.mrb[10].mxu0  ;;  %v2856_v18 = vpop.f32.mrb[8].mxu1  ;;  %v3322_v13 = vld [vmem:[%s4099_s5 + $0x30] sm:$0xff]   ;;  %v2712_v15 = vld [vmem:[%s4100_s4] ss:$0 sm:$0xff] }
 0x138   :  { %v2838_v19 = vpop.f32.mrb[11].mxu0  ;;  %v2857_v20 = vpop.f32.mrb[9].mxu1  ;;  %3074 = vmatpush3.bf16.msra.mxu0 %v3322_v13 }
 0x139   :  { %v1930_v21 = vadd.f32 %v2836_v16, %v1890_v6  ;;  %v2858_v22 = vadd.f32 %v2857_v20, %v2856_v18  ;;  %v2859_v23 = vpop.f32.mrb[10].mxu1  ;;  %3075 = vmatprep.subr.bf16.mxu0 %v3324_v34  ;;  %v2721_v34 = vld [vmem:[%s4101_s6] ss:$0 sm:$0xff] }
 0x13a   :  { %v2860_v25 = vpop.f32.mrb[11].mxu1 }
 0x13b   :  { %v1970_v26 = vadd.f32 %v2858_v22, %v1930_v21 }
 0x13c   :  { %3076 = vmatpush3.bf16.msra.mxu0 %v3323_v14 }
 0x155   :  { %v2878_v33 = vpop.f32.mrb[12].mxu0 }
 0x156   :  { %v2879_v35 = vpop.f32.mrb[13].mxu0 }
 0x157   :  { %v2880_v36 = vadd.f32 %v2879_v35, %v2878_v33  ;;  %v2881_v37 = vpop.f32.mrb[14].mxu0  ;;  %v2900_v38 = vpop.f32.mrb[12].mxu1 }
 0x158   :  { %v2882_v39 = vpop.f32.mrb[15].mxu0  ;;  %v2901_v40 = vpop.f32.mrb[13].mxu1 }
 0x159   :  { %v2010_v41 = vadd.f32 %v2880_v36, %v1970_v26  ;;  %v2902_v42 = vadd.f32 %v2901_v40, %v2900_v38  ;;  %v2903_v43 = vpop.f32.mrb[14].mxu1 }
 0x15a   :  { %v2904_v44 = vpop.f32.mrb[15].mxu1 }
 0x15b   :  { %v2050_v45 = vadd.f32 %v2902_v42, %v2010_v41 }
 0x175   :  { %v2922_v46 = vpop.f32.mrb[16].mxu0 }
 0x176   :  { %v2923_v47 = vpop.f32.mrb[17].mxu0 }
 0x177   :  { %v2924_v48 = vadd.f32 %v2923_v47, %v2922_v46  ;;  %v2925_v49 = vpop.f32.mrb[18].mxu0  ;;  %v2944_v50 = vpop.f32.mrb[16].mxu1 }
 0x178   :  { %v2926_v51 = vpop.f32.mrb[19].mxu0  ;;  %v2945_v53 = vpop.f32.mrb[17].mxu1 }
 0x179   :  { %v2090_v52 = vadd.f32 %v2924_v48, %v2050_v45  ;;  %v2946_v54 = vadd.f32 %v2945_v53, %v2944_v50  ;;  %v2947_v55 = vpop.f32.mrb[18].mxu1 }
 0x17a   :  { %v2948_v56 = vpop.f32.mrb[19].mxu1 }
 0x17b   :  { %v2130_v57 = vadd.f32 %v2946_v54, %v2090_v52 }
 0x195   :  { %v2966_v58 = vpop.f32.mrb[20].mxu0 }
 0x196   :  { %v2967_v59 = vpop.f32.mrb[21].mxu0 }
 0x197   :  { %v2968_v60 = vadd.f32 %v2967_v59, %v2966_v58  ;;  %v2969_v61 = vpop.f32.mrb[22].mxu0  ;;  %v2988_v62 = vpop.f32.mrb[20].mxu1 }
 0x198   :  { %v2970_v63 = vpop.f32.mrb[23].mxu0  ;;  %v2989_v0 = vpop.f32.mrb[21].mxu1 }
 0x199   :  { %v2170_v1 = vadd.f32 %v2968_v60, %v2130_v57  ;;  %v2990_v2 = vadd.f32 %v2989_v0, %v2988_v62  ;;  %v2991_v3 = vpop.f32.mrb[22].mxu1 }
 0x19a   :  { %v2992_v4 = vpop.f32.mrb[23].mxu1 }
 0x19b   :  { %v2210_v5 = vadd.f32 %v2990_v2, %v2170_v1 }
 0x1b5   :  { %v2249_v6 = vpop.f32.mrb[24].mxu0 }
 0x1b6   :  { %v2250_v7 = vadd.f32 %v2249_v6, %v2210_v5  ;;  %v3039_v8 = vpop.f32.mrb[25].mxu0 }
 0x1b7   :  { %v2252_v9 = vpop.f32.mrb[26].mxu0 }
 0x1b8   :  { %v2255_v10 = vmax.f32 %v2250_v7, 0.0  ;;  %v3040_v11 = vpop.f32.mrb[27].mxu0 }
 0x1ba   :  { %v2256_v12 = vpack.c.bf16 %v2255_v10, %v2255_v10 }
 0x1bc   :  { %3058 = vmatmul.mubr.bf16.vlgmr.msra.gmra.mrb[24].mxu1 %v2256_v12 }
 0x28f   :  { %v2362_v16 = vpop.f32.mrb[24].mxu1 }
 0x290   :  { %v2363_v17 = vadd.f32 %v2712_v15, %v2362_v16  ;;  %v3059_v18 = vpop.f32.mrb[25].mxu1 }
 0x291   :  { %v2365_v19 = vpop.f32.mrb[26].mxu1 }
 0x292   :  { %v2368_v20 = vmax.f32 %v2363_v17, 0.0  ;;  %v3060_v21 = vpop.f32.mrb[27].mxu1 }
 0x294   :  { %v2369_v22 = vpack.c.bf16 %v2368_v20, %v2368_v20 }
 0x296   :  { %3078 = vmatmul.mubr.bf16.vlgmr.msra.gmra.mrb[28].mxu0 %v2369_v22 }
 0x369   :  { %v2475_v23 = vpop.f32.mrb[28].mxu0 }
 0x36a   :  { %v2476_v24 = vadd.f32 %v2721_v34, %v2475_v23  ;;  %v3079_v25 = vpop.f32.mrb[29].mxu0 }
 0x36b   :  { %v2478_v26 = vpop.f32.mrb[30].mxu0 }
 0x36c   :  { %2481 = vst [vmem:[%s4102_s7] sm:$0xff] %v2476_v24  ;;  %v3080_v27 = vpop.f32.mrb[31].mxu0 }

</bundles_post_ra>
